<compile_context>
chip_gen: v7x
topology: tpu7x:2x2x1
jax: 0.10.0
libtpu: 0.0.40
codegen_flags: <defaults>
</compile_context>

<pallas_src>
import functools

import jax
import jax.numpy as jnp
import numpy as np
from jax.experimental import pallas as pl
from jax.experimental.pallas import tpu as pltpu


def _round_up(x, m):
    return ((x + m - 1) // m) * m


def _vmem_limit(need_bytes):
    # Explicit scoped-VMEM limit: actual working set + headroom, floored at the
    # largest default (32 MiB) and kept under physical VMEM.
    return int(min(max(need_bytes + (4 << 20), 32 << 20), 100 << 20))


# ----------------------------------------------------------------------------
# Fused multi-layer LSTM + linear head, time-chunked, batch-chunk parallel.
#   gx_ref    : (Tc, Bc, 4H) f32  precomputed  x @ W_ih0^T + (b_ih0 + b_hh0)
#   w_hh0_ref : (H, 4H)      bf16 layer-0 recurrent weights
#   w_stk_ref : (Lr, 2H, 4H) bf16 stacked [W_ih^T; W_hh^T] for layers >= 1
#   b_ref     : (Lr, 1, 4H)  f32  fused biases for layers >= 1
#   w_lin_ref : (H, E)       bf16 linear head weights (W_lin^T)
#   b_lin_ref : (1, E)       f32  linear head bias
#   z_ref     : (Tc, Bc, E)  bf16 output: z_t = h_top_t @ W_lin^T + b_lin
#   h_scr     : (L, Bc, H)   bf16 carried hidden state (matmul-LHS dtype)
#   c_scr     : (L, Bc, H)   f32  carried cell state (full precision)
# PyTorch gate order: i, f, g, o.
# ----------------------------------------------------------------------------
def _lstm_fused_kernel(gx_ref, w_hh0_ref, w_stk_ref, b_ref, w_lin_ref,
                       b_lin_ref, z_ref, h_scr, c_scr, *,
                       hidden_size, num_layers, t_chunk):
    H = hidden_size
    L = num_layers

    @pl.when(pl.program_id(1) == 0)   # first time-chunk of this batch chunk
    def _init():
        h_scr[...] = jnp.zeros_like(h_scr)
        c_scr[...] = jnp.zeros_like(c_scr)

    def _sigmoid(x):
        # One EUP tanh push instead of exp + reciprocal.
        return 0.5 * jnp.tanh(0.5 * x) + 0.5

    def lstm_cell(gates, c_prev):
        i_g = _sigmoid(gates[:, 0 * H:1 * H])
        f_g = _sigmoid(gates[:, 1 * H:2 * H])
        g_g = jnp.tanh(gates[:, 2 * H:3 * H])
        o_g = _sigmoid(gates[:, 3 * H:4 * H])
        c_new = f_g * c_prev + i_g * g_g
        h_new = o_g * jnp.tanh(c_new)
        return h_new, c_new

    # Loop-invariant loads hoisted out of the unrolled time loop (JAX does not
    # CSE these; inside the loop they would be re-emitted Tc*(L-1) times).
    b_rest = [b_ref[l] for l in range(L - 1)]
    b_lin = b_lin_ref[...]

    def step(s, carry):
        # ---- Layer 0: input-to-hidden term precomputed outside the kernel.
        gates = gx_ref[s] + jnp.dot(h_scr[0], w_hh0_ref[...],
                                    preferred_element_type=jnp.float32)
        h_f32, c_new = lstm_cell(gates, c_scr[0])
        h_below = h_f32.astype(jnp.bfloat16)
        h_scr[0] = h_below
        c_scr[0] = c_new

        # ---- Layers 1..L-1: ONE fused (Bc, 2H) @ (2H, 4H) matmul per layer.
        for l in range(1, L):
            lhs = jnp.concatenate([h_below, h_scr[l]], axis=-1)   # (Bc, 2H) bf16
            gates = b_rest[l - 1] + jnp.dot(lhs, w_stk_ref[l - 1],
                                            preferred_element_type=jnp.float32)
            h_f32, c_new = lstm_cell(gates, c_scr[l])
            h_below = h_f32.astype(jnp.bfloat16)
            h_scr[l] = h_below
            c_scr[l] = c_new

        # ---- Linear head fused in (MXU idle during recurrence -> free).
        z = jnp.dot(h_below, w_lin_ref[...],
                    preferred_element_type=jnp.float32) + b_lin
        z_ref[s] = z.astype(z_ref.dtype)
        return carry

    jax.lax.fori_loop(0, t_chunk, step, 0, unroll=True)


def fused_lstm_linear(gx0, w_hh0, w_stk, b_rest, w_lin_t, b_lin_row,
                      hidden_size, num_layers, embed_size, t_chunk,
                      b_chunk=None):
    """gx0: (T_pad, B_pad, 4H) f32.  Returns z: (T_pad, B_pad, E) bf16."""
    T_pad, B_pad, _ = gx0.shape
    H, L, E = hidden_size, num_layers, embed_size
    Lr = w_stk.shape[0]
    if b_chunk is None:
        b_chunk = B_pad
    assert T_pad % t_chunk == 0 and B_pad % b_chunk == 0

    block_bytes = (t_chunk * b_chunk * 4 * H * 4          # gx block (f32)
                   + H * 4 * H * 2                        # w_hh0 (bf16)
                   + Lr * 2 * H * 4 * H * 2               # stacked weights
                   + Lr * 4 * H * 4                       # biases (f32)
                   + H * E * 2 + E * 4                    # linear head
                   + t_chunk * b_chunk * E * 2)           # z output (bf16)
    scratch_bytes = L * b_chunk * H * (2 + 4)
    need = 2 * block_bytes + scratch_bytes                # double-buffered

    return pl.pallas_call(
        functools.partial(_lstm_fused_kernel, hidden_size=H, num_layers=L,
                          t_chunk=t_chunk),
        out_shape=jax.ShapeDtypeStruct((T_pad, B_pad, E), jnp.bfloat16),
        grid_spec=pltpu.PrefetchScalarGridSpec(
            num_scalar_prefetch=0,
            grid=(B_pad // b_chunk, T_pad // t_chunk),
            in_specs=[
                pl.BlockSpec((t_chunk, b_chunk, 4 * H), lambda b, t: (t, b, 0)),
                pl.BlockSpec((H, 4 * H), lambda b, t: (0, 0)),
                pl.BlockSpec((Lr, 2 * H, 4 * H), lambda b, t: (0, 0, 0)),
                pl.BlockSpec((Lr, 1, 4 * H), lambda b, t: (0, 0, 0)),
                pl.BlockSpec((H, E), lambda b, t: (0, 0)),
                pl.BlockSpec((1, E), lambda b, t: (0, 0)),
            ],
            out_specs=pl.BlockSpec((t_chunk, b_chunk, E),
                                   lambda b, t: (t, b, 0)),
            scratch_shapes=[
                pltpu.VMEM((L, b_chunk, H), jnp.bfloat16),   # h (LHS dtype)
                pltpu.VMEM((L, b_chunk, H), jnp.float32),    # c (full precision)
            ],
        ),
        compiler_params=pltpu.CompilerParams(
            dimension_semantics=("parallel", "arbitrary"),
            vmem_limit_bytes=_vmem_limit(need)),
    )(gx0, w_hh0, w_stk, b_rest, w_lin_t, b_lin_row)


# ----------------------------------------------------------------------------
# Vocab projection: out = z @ W_emb^T, tiled over a wide (lane-dense) vocab
# tile.  z is consumed as-is (no recompute); vocab axis "parallel".
# ----------------------------------------------------------------------------
def _vocab_kernel(z_ref, wemb_ref, out_ref):
    out_ref[...] = jnp.dot(z_ref[...], wemb_ref[...],
                           preferred_element_type=jnp.float32)


def project_to_vocab(z_bf16, w_emb_t_bf16, tv=512):
    Np, E = z_bf16.shape
    V = w_emb_t_bf16.shape[1]
    tv = min(tv, _round_up(V, 128))
    V_pad = _round_up(V, tv)
    if V_pad != V:                       # remainder path: pad, slice back
        w_emb_t_bf16 = jnp.pad(w_emb_t_bf16, ((0, 0), (0, V_pad - V)))
    need = 2 * (Np * E * 2 + E * tv * 2 + Np * tv * 4)
    out = pl.pallas_call(
        _vocab_kernel,
        out_shape=jax.ShapeDtypeStruct((Np, V_pad), jnp.float32),
        grid_spec=pltpu.PrefetchScalarGridSpec(
            num_scalar_prefetch=0,
            grid=(V_pad // tv,),
            in_specs=[
                pl.BlockSpec((Np, E), lambda j: (0, 0)),
                pl.BlockSpec((E, tv), lambda j: (0, j)),
            ],
            out_specs=pl.BlockSpec((Np, tv), lambda j: (0, j)),
        ),
        compiler_params=pltpu.CompilerParams(
            dimension_semantics=("parallel",),
            vmem_limit_bytes=_vmem_limit(need)),
    )(z_bf16, w_emb_t_bf16)
    return out[:, :V]


# ----------------------------------------------------------------------------
# DecoderRNN forward
# ----------------------------------------------------------------------------
def decoder_rnn_forward(params, captions, lengths, *, t_chunk=8, tv=512,
                        b_chunk=None):
    """captions: (B, T) int32, lengths: python list sorted descending.
    Returns (sum(lengths), vocab_size) f32 in pack_padded_sequence order."""
    w_emb = params["w_emb"]                       # (V, E) f32
    B, T = captions.shape
    H = params["hidden_size"]
    L = params["num_layers"]
    E = w_emb.shape[1]

    t_chunk = min(t_chunk, T)
    B_pad = _round_up(B, 16)                      # bf16 LHS: 16 sublanes/vreg
    T_pad = _round_up(T, t_chunk)

    # Embedding lookup (glue) + batch/time padding.
    emb = jnp.take(w_emb, captions, axis=0).astype(jnp.float32)   # (B, T, E)
    x_tbe = jnp.transpose(emb, (1, 0, 2))                         # (T, B, E)
    x_pad = jnp.zeros((T_pad, B_pad, E), jnp.float32).at[:T, :B].set(x_tbe)

    # Layer-0 input gates for ALL timesteps: one large MXU matmul (plain XLA).
    # TODO(synk): optionally store gx0 as bf16 on v5e to halve the largest
    #   streamed input of the recurrence (small numerics change).
    gx0 = (x_pad.reshape(T_pad * B_pad, E) @ params["w_ih0_t"]
           + params["b0_row"]).reshape(T_pad, B_pad, 4 * H)

    # Fused stacked LSTM + linear head (z = h_top @ W_lin^T + b), bf16 output.
    z_all = fused_lstm_linear(gx0, params["w_hh0_bf16"], params["w_stk_bf16"],
                              params["b_rest"], params["w_lin_t_bf16"],
                              params["b_lin_row"], H, L, E, t_chunk,
                              b_chunk)            # (T_pad, B_pad, E) bf16

    # pack_padded_sequence ordering (trace-time glue).
    # TODO(synk): lengths are consumed at trace time; every new (B, T,
    #   lengths) pattern recompiles, and the gather goes through XLA/HBM.
    packed_idx = [(t, b) for t in range(T) for b in range(B) if lengths[b] > t]
    t_idx = jnp.array([p[0] for p in packed_idx], dtype=jnp.int32)
    b_idx = jnp.array([p[1] for p in packed_idx], dtype=jnp.int32)
    z_packed = z_all[t_idx, b_idx]                # (N, E) bf16

    N = len(packed_idx)
    Np = _round_up(N, 16)
    z_pad = jnp.zeros((Np, E), jnp.bfloat16).at[:N].set(z_packed)

    out = project_to_vocab(z_pad, params["w_emb_t_bf16"], tv=tv)   # (Np, V)
    return out[:N]


# ----------------------------------------------------------------------------
# Pure-JAX f32 reference (mirrors PyTorch semantics) for verification.
# ----------------------------------------------------------------------------
def reference_forward(params, captions, lengths):
    B, T = captions.shape
    H = params["hidden_size"]
    x = jnp.take(params["w_emb"], captions, axis=0).astype(jnp.float32)

    for layer in params["raw_lstm"]:
        w_ih_t, w_hh_t, bias = layer["w_ih_t"], layer["w_hh_t"], layer["bias"]
        h = jnp.zeros((B, H), jnp.float32)
        c = jnp.zeros((B, H), jnp.float32)
        outs = []
        for t in range(T):
            gates = x[:, t] @ w_ih_t + h @ w_hh_t + bias
            i_g = jax.nn.sigmoid(gates[:, 0 * H:1 * H])
            f_g = jax.nn.sigmoid(gates[:, 1 * H:2 * H])
            g_g = jnp.tanh(gates[:, 2 * H:3 * H])
            o_g = jax.nn.sigmoid(gates[:, 3 * H:4 * H])
            c = f_g * c + i_g * g_g
            h = o_g * jnp.tanh(c)
            outs.append(h)
        x = jnp.stack(outs, axis=1)               # (B, T, H)

    packed_idx = [(t, b) for t in range(T) for b in range(B) if lengths[b] > t]
    h_packed = jnp.stack([x[b, t] for (t, b) in packed_idx], axis=0)
    z = h_packed @ params["w_lin_t"] + params["b_lin_row"][0]
    return z @ jnp.transpose(params["w_emb"])


# ----------------------------------------------------------------------------
def make_params(key, vocab_size, embed_size, hidden_size, num_layers):
    ks = jax.random.split(key, 3 + 4 * num_layers)
    w_emb = (0.1 * jax.random.normal(ks[0], (vocab_size, embed_size))
             ).astype(jnp.float32)
    w_lin = (0.1 * jax.random.normal(ks[1], (embed_size, hidden_size))
             ).astype(jnp.float32)
    b_lin = (0.1 * jax.random.normal(ks[2], (embed_size,))).astype(jnp.float32)

    raw_lstm = []
    for l in range(num_layers):
        in_size = embed_size if l == 0 else hidden_size
        kk = ks[3 + 4 * l: 3 + 4 * (l + 1)]
        w_ih = (0.1 * jax.random.normal(kk[0], (4 * hidden_size, in_size))
                ).astype(jnp.float32)
        w_hh = (0.1 * jax.random.normal(kk[1], (4 * hidden_size, hidden_size))
                ).astype(jnp.float32)
        b_ih = (0.1 * jax.random.normal(kk[2], (4 * hidden_size,))
                ).astype(jnp.float32)
        b_hh = (0.1 * jax.random.normal(kk[3], (4 * hidden_size,))
                ).astype(jnp.float32)
        raw_lstm.append(dict(
            w_ih_t=w_ih.T,                               # (in, 4H) f32
            w_hh_t=w_hh.T,                               # (H, 4H) f32
            bias=(b_ih + b_hh).reshape(1, 4 * hidden_size)))

    H, L = hidden_size, num_layers
    if L > 1:
        # Fused (2H, 4H) recurrent weight per upper layer:
        #   gates = concat([h_below, h_prev]) @ [[W_ih^T], [W_hh^T]] + b
        w_stk = jnp.stack(
            [jnp.concatenate([raw_lstm[l]["w_ih_t"], raw_lstm[l]["w_hh_t"]],
                             axis=0) for l in range(1, L)], axis=0)
        b_rest = jnp.stack([raw_lstm[l]["bias"] for l in range(1, L)], 0)
    else:
        # TODO(synk): when L == 1 a dummy block is still DMA'd (waste only).
        w_stk = jnp.zeros((1, 2 * H, 4 * H), jnp.float32)
        b_rest = jnp.zeros((1, 1, 4 * H), jnp.float32)

    return dict(
        w_emb=w_emb,
        w_emb_t_bf16=w_emb.T.astype(jnp.bfloat16),       # (E, V) bf16
        w_lin_t=w_lin.T,                                 # (H, E) f32 (ref)
        w_lin_t_bf16=w_lin.T.astype(jnp.bfloat16),       # (H, E) bf16
        b_lin_row=b_lin.reshape(1, embed_size),          # (1, E) f32
        w_ih0_t=raw_lstm[0]["w_ih_t"],                   # (E, 4H) f32
        b0_row=raw_lstm[0]["bias"],                      # (1, 4H) f32
        w_hh0_bf16=raw_lstm[0]["w_hh_t"].astype(jnp.bfloat16),   # (H, 4H)
        w_stk_bf16=w_stk.astype(jnp.bfloat16),           # (L-1, 2H, 4H)
        b_rest=b_rest,                                   # (L-1, 1, 4H) f32
        raw_lstm=raw_lstm,
        hidden_size=hidden_size,
        num_layers=num_layers,
    )


if __name__ == "__main__":
    # Lane/sublane-friendly small shapes: H, E multiples of 128; V a multiple
    # of 128 (the vocab tile pads any remainder anyway).
    vocab_size, embed_size, hidden_size, num_layers = 1024, 128, 128, 2
    B, T = 2, 8
    lengths = [8, 5]  # sorted descending, as pack_padded_sequence requires

    key = jax.random.PRNGKey(0)
    k_params, k_caps = jax.random.split(key)
    params = make_params(k_params, vocab_size, embed_size, hidden_size,
                         num_layers)
    captions = jax.random.randint(k_caps, (B, T), 0, vocab_size,
                                  dtype=jnp.int32)

    # t_chunk=4 so the time grid has >1 step and exercises the scratch carry.
    out = decoder_rnn_forward(params, captions, lengths, t_chunk=4, tv=512)
    out = jax.block_until_ready(out)

    ref = reference_forward(params, captions, lengths)
    assert out.shape == (sum(lengths), vocab_size), out.shape
    np.testing.assert_allclose(np.asarray(out), np.asarray(ref),
                               atol=2e-2, rtol=2e-2)
    print("KERNEL_OK")
</pallas_src>

<mosaic_0001>
module attributes {stable_mosaic.version = 11 : i64} {
  func.func @_lstm_fused_kernel(%arg0: i32, %arg1: i32, %arg2: memref<4x16x512xf32, #tpu.memory_space<vmem>>, %arg3: memref<128x512xbf16, #tpu.memory_space<vmem>>, %arg4: memref<1x256x512xbf16, #tpu.memory_space<vmem>>, %arg5: memref<1x1x512xf32, #tpu.memory_space<vmem>>, %arg6: memref<128x128xbf16, #tpu.memory_space<vmem>>, %arg7: memref<1x128xf32, #tpu.memory_space<vmem>>, %arg8: memref<4x16x128xbf16, #tpu.memory_space<vmem>>, %arg9: memref<2x16x128xbf16, #tpu.memory_space<vmem>>, %arg10: memref<2x16x128xf32, #tpu.memory_space<vmem>>) attributes {dimension_semantics = [#tpu.dimension_semantics<parallel>, #tpu.dimension_semantics<arbitrary>], iteration_bounds = array<i64: 1, 2>, scalar_prefetch = 0 : i64, scratch_operands = 2 : i64, tpu.core_type = #tpu.core_type<tc>, window_params = [{transform_indices = @transform_0, window_bounds = array<i64: 4, 16, 512>}, {pipeline_mode = #tpu.pipeline_mode<synchronous>, transform_indices = @transform_1, window_bounds = array<i64: 128, 512>}, {pipeline_mode = #tpu.pipeline_mode<synchronous>, transform_indices = @transform_2, window_bounds = array<i64: 1, 256, 512>}, {pipeline_mode = #tpu.pipeline_mode<synchronous>, transform_indices = @transform_3, window_bounds = array<i64: 1, 1, 512>}, {pipeline_mode = #tpu.pipeline_mode<synchronous>, transform_indices = @transform_4, window_bounds = array<i64: 128, 128>}, {pipeline_mode = #tpu.pipeline_mode<synchronous>, transform_indices = @transform_5, window_bounds = array<i64: 1, 128>}, {transform_indices = @transform_6, window_bounds = array<i64: 4, 16, 128>}]} {
    %c0_i32 = arith.constant 0 : i32
    %0 = arith.cmpi eq, %arg1, %c0_i32 : i32
    %1 = arith.extui %0 : i1 to i32
    %c0_i32_0 = arith.constant 0 : i32
    %2 = arith.cmpi ne, %1, %c0_i32_0 : i32
    scf.if %2 {
      %cst_228 = arith.constant 0.000000e+00 : bf16
      %426 = vector.broadcast %cst_228 : bf16 to vector<2x16x128xbf16>
      %c0_229 = arith.constant 0 : index
      %c0_230 = arith.constant 0 : index
      %c0_231 = arith.constant 0 : index
      %427 = vector.load %arg9[%c0_229, %c0_230, %c0_231] : memref<2x16x128xbf16, #tpu.memory_space<vmem>>, vector<2x16x128xbf16>
      tpu.vector_store %arg9[%c0_229, %c0_230, %c0_231], %426 {strides = array<i32>} : memref<2x16x128xbf16, #tpu.memory_space<vmem>>, vector<2x16x128xbf16>,
      %cst_232 = arith.constant 0.000000e+00 : f32
      %428 = vector.broadcast %cst_232 : f32 to vector<2x16x128xf32>
      %c0_233 = arith.constant 0 : index
      %c0_234 = arith.constant 0 : index
      %c0_235 = arith.constant 0 : index
      %429 = vector.load %arg10[%c0_233, %c0_234, %c0_235] : memref<2x16x128xf32, #tpu.memory_space<vmem>>, vector<2x16x128xf32>
      tpu.vector_store %arg10[%c0_233, %c0_234, %c0_235], %428 {strides = array<i32>} : memref<2x16x128xf32, #tpu.memory_space<vmem>>, vector<2x16x128xf32>,
    } else {
    }
    %c0 = arith.constant 0 : index
    %c0_1 = arith.constant 0 : index
    %c0_2 = arith.constant 0 : index
    %3 = vector.load %arg5[%c0, %c0_1, %c0_2] : memref<1x1x512xf32, #tpu.memory_space<vmem>>, vector<1x1x512xf32>
    %4 = vector.shape_cast %3 : vector<1x1x512xf32> to vector<1x512xf32>
    %c0_3 = arith.constant 0 : index
    %c0_4 = arith.constant 0 : index
    %5 = vector.load %arg7[%c0_3, %c0_4] : memref<1x128xf32, #tpu.memory_space<vmem>>, vector<1x128xf32>
    %c0_i32_5 = arith.constant 0 : i32
    %6 = arith.index_cast %c0_i32_5 : i32 to index
    %c0_6 = arith.constant 0 : index
    %c0_7 = arith.constant 0 : index
    %7 = vector.load %arg2[%6, %c0_6, %c0_7] : memref<4x16x512xf32, #tpu.memory_space<vmem>>, vector<1x16x512xf32>
    %8 = vector.shape_cast %7 : vector<1x16x512xf32> to vector<16x512xf32>
    %c0_8 = arith.constant 0 : index
    %c0_9 = arith.constant 0 : index
    %c0_10 = arith.constant 0 : index
    %9 = vector.load %arg9[%c0_8, %c0_9, %c0_10] : memref<2x16x128xbf16, #tpu.memory_space<vmem>>, vector<1x16x128xbf16>
    %10 = vector.shape_cast %9 : vector<1x16x128xbf16> to vector<16x128xbf16>
    %c0_11 = arith.constant 0 : index
    %c0_12 = arith.constant 0 : index
    %11 = vector.load %arg3[%c0_11, %c0_12] : memref<128x512xbf16, #tpu.memory_space<vmem>>, vector<128x512xbf16>
    %cst = arith.constant dense<0.000000e+00> : vector<16x512xf32>
    %12 = tpu.matmul %10, %11, %cst {dimension_numbers = #tpu.dot_dimension_numbers<[1], [0], [0], [1], [0, 0, 1, 1], [], []>} : vector<16x128xbf16>, vector<128x512xbf16>, vector<16x512xf32> -> vector<16x512xf32>
    %13 = arith.addf %8, %12 : vector<16x512xf32>
    %c0_13 = arith.constant 0 : index
    %c0_14 = arith.constant 0 : index
    %c0_15 = arith.constant 0 : index
    %14 = vector.load %arg10[%c0_13, %c0_14, %c0_15] : memref<2x16x128xf32, #tpu.memory_space<vmem>>, vector<1x16x128xf32>
    %15 = vector.shape_cast %14 : vector<1x16x128xf32> to vector<16x128xf32>
    %16 = vector.extract_strided_slice %13 {offsets = [0, 0], sizes = [16, 128], strides = [1, 1]} : vector<16x512xf32> to vector<16x128xf32>
    %cst_16 = arith.constant 5.000000e-01 : f32
    %17 = vector.broadcast %cst_16 : f32 to vector<16x128xf32>
    %18 = arith.mulf %17, %16 : vector<16x128xf32>
    %19 = math.tanh %18 : vector<16x128xf32>
    %cst_17 = arith.constant 5.000000e-01 : f32
    %20 = vector.broadcast %cst_17 : f32 to vector<16x128xf32>
    %21 = arith.mulf %20, %19 : vector<16x128xf32>
    %cst_18 = arith.constant 5.000000e-01 : f32
    %22 = vector.broadcast %cst_18 : f32 to vector<16x128xf32>
    %23 = arith.addf %21, %22 : vector<16x128xf32>
    %24 = vector.extract_strided_slice %13 {offsets = [0, 128], sizes = [16, 128], strides = [1, 1]} : vector<16x512xf32> to vector<16x128xf32>
    %cst_19 = arith.constant 5.000000e-01 : f32
    %25 = vector.broadcast %cst_19 : f32 to vector<16x128xf32>
    %26 = arith.mulf %25, %24 : vector<16x128xf32>
    %27 = math.tanh %26 : vector<16x128xf32>
    %cst_20 = arith.constant 5.000000e-01 : f32
    %28 = vector.broadcast %cst_20 : f32 to vector<16x128xf32>
    %29 = arith.mulf %28, %27 : vector<16x128xf32>
    %cst_21 = arith.constant 5.000000e-01 : f32
    %30 = vector.broadcast %cst_21 : f32 to vector<16x128xf32>
    %31 = arith.addf %29, %30 : vector<16x128xf32>
    %32 = vector.extract_strided_slice %13 {offsets = [0, 256], sizes = [16, 128], strides = [1, 1]} : vector<16x512xf32> to vector<16x128xf32>
    %33 = math.tanh %32 : vector<16x128xf32>
    %34 = vector.extract_strided_slice %13 {offsets = [0, 384], sizes = [16, 128], strides = [1, 1]} : vector<16x512xf32> to vector<16x128xf32>
    %cst_22 = arith.constant 5.000000e-01 : f32
    %35 = vector.broadcast %cst_22 : f32 to vector<16x128xf32>
    %36 = arith.mulf %35, %34 : vector<16x128xf32>
    %37 = math.tanh %36 : vector<16x128xf32>
    %cst_23 = arith.constant 5.000000e-01 : f32
    %38 = vector.broadcast %cst_23 : f32 to vector<16x128xf32>
    %39 = arith.mulf %38, %37 : vector<16x128xf32>
    %cst_24 = arith.constant 5.000000e-01 : f32
    %40 = vector.broadcast %cst_24 : f32 to vector<16x128xf32>
    %41 = arith.addf %39, %40 : vector<16x128xf32>
    %42 = arith.mulf %31, %15 : vector<16x128xf32>
    %43 = arith.mulf %23, %33 : vector<16x128xf32>
    %44 = arith.addf %42, %43 : vector<16x128xf32>
    %45 = math.tanh %44 : vector<16x128xf32>
    %46 = arith.mulf %41, %45 : vector<16x128xf32>
    %47 = arith.truncf %46 : vector<16x128xf32> to vector<16x128xbf16>
    %c0_25 = arith.constant 0 : index
    %c0_26 = arith.constant 0 : index
    %c0_27 = arith.constant 0 : index
    %48 = vector.load %arg9[%c0_25, %c0_26, %c0_27] : memref<2x16x128xbf16, #tpu.memory_space<vmem>>, vector<1x16x128xbf16>
    %49 = vector.shape_cast %48 : vector<1x16x128xbf16> to vector<16x128xbf16>
    %50 = vector.shape_cast %47 : vector<16x128xbf16> to vector<1x16x128xbf16>
    tpu.vector_store %arg9[%c0_25, %c0_26, %c0_27], %50 {strides = array<i32>} : memref<2x16x128xbf16, #tpu.memory_space<vmem>>, vector<1x16x128xbf16>,
    %c0_28 = arith.constant 0 : index
    %c0_29 = arith.constant 0 : index
    %c0_30 = arith.constant 0 : index
    %51 = vector.load %arg10[%c0_28, %c0_29, %c0_30] : memref<2x16x128xf32, #tpu.memory_space<vmem>>, vector<1x16x128xf32>
    %52 = vector.shape_cast %51 : vector<1x16x128xf32> to vector<16x128xf32>
    %53 = vector.shape_cast %44 : vector<16x128xf32> to vector<1x16x128xf32>
    tpu.vector_store %arg10[%c0_28, %c0_29, %c0_30], %53 {strides = array<i32>} : memref<2x16x128xf32, #tpu.memory_space<vmem>>, vector<1x16x128xf32>,
    %c1 = arith.constant 1 : index
    %c0_31 = arith.constant 0 : index
    %c0_32 = arith.constant 0 : index
    %54 = vector.load %arg9[%c1, %c0_31, %c0_32] : memref<2x16x128xbf16, #tpu.memory_space<vmem>>, vector<1x16x128xbf16>
    %55 = vector.shape_cast %54 : vector<1x16x128xbf16> to vector<16x128xbf16>
    %56 = tpu.concatenate %47, %55 in 1 : vector<16x128xbf16>, vector<16x128xbf16> -> vector<16x256xbf16>
    %c0_33 = arith.constant 0 : index
    %c0_34 = arith.constant 0 : index
    %c0_35 = arith.constant 0 : index
    %57 = vector.load %arg4[%c0_33, %c0_34, %c0_35] : memref<1x256x512xbf16, #tpu.memory_space<vmem>>, vector<1x256x512xbf16>
    %58 = vector.shape_cast %57 : vector<1x256x512xbf16> to vector<256x512xbf16>
    %cst_36 = arith.constant dense<0.000000e+00> : vector<16x512xf32>
    %59 = tpu.matmul %56, %58, %cst_36 {dimension_numbers = #tpu.dot_dimension_numbers<[1], [0], [0], [1], [0, 0, 1, 1], [], []>} : vector<16x256xbf16>, vector<256x512xbf16>, vector<16x512xf32> -> vector<16x512xf32>
    %60 = vector.broadcast %4 : vector<1x512xf32> to vector<16x512xf32>
    %61 = arith.addf %60, %59 : vector<16x512xf32>
    %c1_37 = arith.constant 1 : index
    %c0_38 = arith.constant 0 : index
    %c0_39 = arith.constant 0 : index
    %62 = vector.load %arg10[%c1_37, %c0_38, %c0_39] : memref<2x16x128xf32, #tpu.memory_space<vmem>>, vector<1x16x128xf32>
    %63 = vector.shape_cast %62 : vector<1x16x128xf32> to vector<16x128xf32>
    %64 = vector.extract_strided_slice %61 {offsets = [0, 0], sizes = [16, 128], strides = [1, 1]} : vector<16x512xf32> to vector<16x128xf32>
    %cst_40 = arith.constant 5.000000e-01 : f32
    %65 = vector.broadcast %cst_40 : f32 to vector<16x128xf32>
    %66 = arith.mulf %65, %64 : vector<16x128xf32>
    %67 = math.tanh %66 : vector<16x128xf32>
    %cst_41 = arith.constant 5.000000e-01 : f32
    %68 = vector.broadcast %cst_41 : f32 to vector<16x128xf32>
    %69 = arith.mulf %68, %67 : vector<16x128xf32>
    %cst_42 = arith.constant 5.000000e-01 : f32
    %70 = vector.broadcast %cst_42 : f32 to vector<16x128xf32>
    %71 = arith.addf %69, %70 : vector<16x128xf32>
    %72 = vector.extract_strided_slice %61 {offsets = [0, 128], sizes = [16, 128], strides = [1, 1]} : vector<16x512xf32> to vector<16x128xf32>
    %cst_43 = arith.constant 5.000000e-01 : f32
    %73 = vector.broadcast %cst_43 : f32 to vector<16x128xf32>
    %74 = arith.mulf %73, %72 : vector<16x128xf32>
    %75 = math.tanh %74 : vector<16x128xf32>
    %cst_44 = arith.constant 5.000000e-01 : f32
    %76 = vector.broadcast %cst_44 : f32 to vector<16x128xf32>
    %77 = arith.mulf %76, %75 : vector<16x128xf32>
    %cst_45 = arith.constant 5.000000e-01 : f32
    %78 = vector.broadcast %cst_45 : f32 to vector<16x128xf32>
    %79 = arith.addf %77, %78 : vector<16x128xf32>
    %80 = vector.extract_strided_slice %61 {offsets = [0, 256], sizes = [16, 128], strides = [1, 1]} : vector<16x512xf32> to vector<16x128xf32>
    %81 = math.tanh %80 : vector<16x128xf32>
    %82 = vector.extract_strided_slice %61 {offsets = [0, 384], sizes = [16, 128], strides = [1, 1]} : vector<16x512xf32> to vector<16x128xf32>
    %cst_46 = arith.constant 5.000000e-01 : f32
    %83 = vector.broadcast %cst_46 : f32 to vector<16x128xf32>
    %84 = arith.mulf %83, %82 : vector<16x128xf32>
    %85 = math.tanh %84 : vector<16x128xf32>
    %cst_47 = arith.constant 5.000000e-01 : f32
    %86 = vector.broadcast %cst_47 : f32 to vector<16x128xf32>
    %87 = arith.mulf %86, %85 : vector<16x128xf32>
    %cst_48 = arith.constant 5.000000e-01 : f32
    %88 = vector.broadcast %cst_48 : f32 to vector<16x128xf32>
    %89 = arith.addf %87, %88 : vector<16x128xf32>
    %90 = arith.mulf %79, %63 : vector<16x128xf32>
    %91 = arith.mulf %71, %81 : vector<16x128xf32>
    %92 = arith.addf %90, %91 : vector<16x128xf32>
    %93 = math.tanh %92 : vector<16x128xf32>
    %94 = arith.mulf %89, %93 : vector<16x128xf32>
    %95 = arith.truncf %94 : vector<16x128xf32> to vector<16x128xbf16>
    %c1_49 = arith.constant 1 : index
    %c0_50 = arith.constant 0 : index
    %c0_51 = arith.constant 0 : index
    %96 = vector.load %arg9[%c1_49, %c0_50, %c0_51] : memref<2x16x128xbf16, #tpu.memory_space<vmem>>, vector<1x16x128xbf16>
    %97 = vector.shape_cast %96 : vector<1x16x128xbf16> to vector<16x128xbf16>
    %98 = vector.shape_cast %95 : vector<16x128xbf16> to vector<1x16x128xbf16>
    tpu.vector_store %arg9[%c1_49, %c0_50, %c0_51], %98 {strides = array<i32>} : memref<2x16x128xbf16, #tpu.memory_space<vmem>>, vector<1x16x128xbf16>,
    %c1_52 = arith.constant 1 : index
    %c0_53 = arith.constant 0 : index
    %c0_54 = arith.constant 0 : index
    %99 = vector.load %arg10[%c1_52, %c0_53, %c0_54] : memref<2x16x128xf32, #tpu.memory_space<vmem>>, vector<1x16x128xf32>
    %100 = vector.shape_cast %99 : vector<1x16x128xf32> to vector<16x128xf32>
    %101 = vector.shape_cast %92 : vector<16x128xf32> to vector<1x16x128xf32>
    tpu.vector_store %arg10[%c1_52, %c0_53, %c0_54], %101 {strides = array<i32>} : memref<2x16x128xf32, #tpu.memory_space<vmem>>, vector<1x16x128xf32>,
    %c0_55 = arith.constant 0 : index
    %c0_56 = arith.constant 0 : index
    %102 = vector.load %arg6[%c0_55, %c0_56] : memref<128x128xbf16, #tpu.memory_space<vmem>>, vector<128x128xbf16>
    %cst_57 = arith.constant dense<0.000000e+00> : vector<16x128xf32>
    %103 = tpu.matmul %95, %102, %cst_57 {dimension_numbers = #tpu.dot_dimension_numbers<[1], [0], [0], [1], [0, 0, 1, 1], [], []>} : vector<16x128xbf16>, vector<128x128xbf16>, vector<16x128xf32> -> vector<16x128xf32>
    %104 = vector.broadcast %5 : vector<1x128xf32> to vector<16x128xf32>
    %105 = arith.addf %103, %104 : vector<16x128xf32>
    %106 = arith.truncf %105 : vector<16x128xf32> to vector<16x128xbf16>
    %107 = arith.index_cast %c0_i32_5 : i32 to index
    %c0_58 = arith.constant 0 : index
    %c0_59 = arith.constant 0 : index
    %108 = vector.load %arg8[%107, %c0_58, %c0_59] : memref<4x16x128xbf16, #tpu.memory_space<vmem>>, vector<1x16x128xbf16>
    %109 = vector.shape_cast %108 : vector<1x16x128xbf16> to vector<16x128xbf16>
    %110 = vector.shape_cast %106 : vector<16x128xbf16> to vector<1x16x128xbf16>
    tpu.vector_store %arg8[%107, %c0_58, %c0_59], %110 {strides = array<i32>} : memref<4x16x128xbf16, #tpu.memory_space<vmem>>, vector<1x16x128xbf16>,
    %c1_i32 = arith.constant 1 : i32
    %111 = arith.index_cast %c1_i32 : i32 to index
    %c0_60 = arith.constant 0 : index
    %c0_61 = arith.constant 0 : index
    %112 = vector.load %arg2[%111, %c0_60, %c0_61] : memref<4x16x512xf32, #tpu.memory_space<vmem>>, vector<1x16x512xf32>
    %113 = vector.shape_cast %112 : vector<1x16x512xf32> to vector<16x512xf32>
    %c0_62 = arith.constant 0 : index
    %c0_63 = arith.constant 0 : index
    %c0_64 = arith.constant 0 : index
    %114 = vector.load %arg9[%c0_62, %c0_63, %c0_64] : memref<2x16x128xbf16, #tpu.memory_space<vmem>>, vector<1x16x128xbf16>
    %115 = vector.shape_cast %114 : vector<1x16x128xbf16> to vector<16x128xbf16>
    %c0_65 = arith.constant 0 : index
    %c0_66 = arith.constant 0 : index
    %116 = vector.load %arg3[%c0_65, %c0_66] : memref<128x512xbf16, #tpu.memory_space<vmem>>, vector<128x512xbf16>
    %cst_67 = arith.constant dense<0.000000e+00> : vector<16x512xf32>
    %117 = tpu.matmul %115, %116, %cst_67 {dimension_numbers = #tpu.dot_dimension_numbers<[1], [0], [0], [1], [0, 0, 1, 1], [], []>} : vector<16x128xbf16>, vector<128x512xbf16>, vector<16x512xf32> -> vector<16x512xf32>
    %118 = arith.addf %113, %117 : vector<16x512xf32>
    %c0_68 = arith.constant 0 : index
    %c0_69 = arith.constant 0 : index
    %c0_70 = arith.constant 0 : index
    %119 = vector.load %arg10[%c0_68, %c0_69, %c0_70] : memref<2x16x128xf32, #tpu.memory_space<vmem>>, vector<1x16x128xf32>
    %120 = vector.shape_cast %119 : vector<1x16x128xf32> to vector<16x128xf32>
    %121 = vector.extract_strided_slice %118 {offsets = [0, 0], sizes = [16, 128], strides = [1, 1]} : vector<16x512xf32> to vector<16x128xf32>
    %cst_71 = arith.constant 5.000000e-01 : f32
    %122 = vector.broadcast %cst_71 : f32 to vector<16x128xf32>
    %123 = arith.mulf %122, %121 : vector<16x128xf32>
    %124 = math.tanh %123 : vector<16x128xf32>
    %cst_72 = arith.constant 5.000000e-01 : f32
    %125 = vector.broadcast %cst_72 : f32 to vector<16x128xf32>
    %126 = arith.mulf %125, %124 : vector<16x128xf32>
    %cst_73 = arith.constant 5.000000e-01 : f32
    %127 = vector.broadcast %cst_73 : f32 to vector<16x128xf32>
    %128 = arith.addf %126, %127 : vector<16x128xf32>
    %129 = vector.extract_strided_slice %118 {offsets = [0, 128], sizes = [16, 128], strides = [1, 1]} : vector<16x512xf32> to vector<16x128xf32>
    %cst_74 = arith.constant 5.000000e-01 : f32
    %130 = vector.broadcast %cst_74 : f32 to vector<16x128xf32>
    %131 = arith.mulf %130, %129 : vector<16x128xf32>
    %132 = math.tanh %131 : vector<16x128xf32>
    %cst_75 = arith.constant 5.000000e-01 : f32
    %133 = vector.broadcast %cst_75 : f32 to vector<16x128xf32>
    %134 = arith.mulf %133, %132 : vector<16x128xf32>
    %cst_76 = arith.constant 5.000000e-01 : f32
    %135 = vector.broadcast %cst_76 : f32 to vector<16x128xf32>
    %136 = arith.addf %134, %135 : vector<16x128xf32>
    %137 = vector.extract_strided_slice %118 {offsets = [0, 256], sizes = [16, 128], strides = [1, 1]} : vector<16x512xf32> to vector<16x128xf32>
    %138 = math.tanh %137 : vector<16x128xf32>
    %139 = vector.extract_strided_slice %118 {offsets = [0, 384], sizes = [16, 128], strides = [1, 1]} : vector<16x512xf32> to vector<16x128xf32>
    %cst_77 = arith.constant 5.000000e-01 : f32
    %140 = vector.broadcast %cst_77 : f32 to vector<16x128xf32>
    %141 = arith.mulf %140, %139 : vector<16x128xf32>
    %142 = math.tanh %141 : vector<16x128xf32>
    %cst_78 = arith.constant 5.000000e-01 : f32
    %143 = vector.broadcast %cst_78 : f32 to vector<16x128xf32>
    %144 = arith.mulf %143, %142 : vector<16x128xf32>
    %cst_79 = arith.constant 5.000000e-01 : f32
    %145 = vector.broadcast %cst_79 : f32 to vector<16x128xf32>
    %146 = arith.addf %144, %145 : vector<16x128xf32>
    %147 = arith.mulf %136, %120 : vector<16x128xf32>
    %148 = arith.mulf %128, %138 : vector<16x128xf32>
    %149 = arith.addf %147, %148 : vector<16x128xf32>
    %150 = math.tanh %149 : vector<16x128xf32>
    %151 = arith.mulf %146, %150 : vector<16x128xf32>
    %152 = arith.truncf %151 : vector<16x128xf32> to vector<16x128xbf16>
    %c0_80 = arith.constant 0 : index
    %c0_81 = arith.constant 0 : index
    %c0_82 = arith.constant 0 : index
    %153 = vector.load %arg9[%c0_80, %c0_81, %c0_82] : memref<2x16x128xbf16, #tpu.memory_space<vmem>>, vector<1x16x128xbf16>
    %154 = vector.shape_cast %153 : vector<1x16x128xbf16> to vector<16x128xbf16>
    %155 = vector.shape_cast %152 : vector<16x128xbf16> to vector<1x16x128xbf16>
    tpu.vector_store %arg9[%c0_80, %c0_81, %c0_82], %155 {strides = array<i32>} : memref<2x16x128xbf16, #tpu.memory_space<vmem>>, vector<1x16x128xbf16>,
    %c0_83 = arith.constant 0 : index
    %c0_84 = arith.constant 0 : index
    %c0_85 = arith.constant 0 : index
    %156 = vector.load %arg10[%c0_83, %c0_84, %c0_85] : memref<2x16x128xf32, #tpu.memory_space<vmem>>, vector<1x16x128xf32>
    %157 = vector.shape_cast %156 : vector<1x16x128xf32> to vector<16x128xf32>
    %158 = vector.shape_cast %149 : vector<16x128xf32> to vector<1x16x128xf32>
    tpu.vector_store %arg10[%c0_83, %c0_84, %c0_85], %158 {strides = array<i32>} : memref<2x16x128xf32, #tpu.memory_space<vmem>>, vector<1x16x128xf32>,
    %c1_86 = arith.constant 1 : index
    %c0_87 = arith.constant 0 : index
    %c0_88 = arith.constant 0 : index
    %159 = vector.load %arg9[%c1_86, %c0_87, %c0_88] : memref<2x16x128xbf16, #tpu.memory_space<vmem>>, vector<1x16x128xbf16>
    %160 = vector.shape_cast %159 : vector<1x16x128xbf16> to vector<16x128xbf16>
    %161 = tpu.concatenate %152, %160 in 1 : vector<16x128xbf16>, vector<16x128xbf16> -> vector<16x256xbf16>
    %c0_89 = arith.constant 0 : index
    %c0_90 = arith.constant 0 : index
    %c0_91 = arith.constant 0 : index
    %162 = vector.load %arg4[%c0_89, %c0_90, %c0_91] : memref<1x256x512xbf16, #tpu.memory_space<vmem>>, vector<1x256x512xbf16>
    %163 = vector.shape_cast %162 : vector<1x256x512xbf16> to vector<256x512xbf16>
    %cst_92 = arith.constant dense<0.000000e+00> : vector<16x512xf32>
    %164 = tpu.matmul %161, %163, %cst_92 {dimension_numbers = #tpu.dot_dimension_numbers<[1], [0], [0], [1], [0, 0, 1, 1], [], []>} : vector<16x256xbf16>, vector<256x512xbf16>, vector<16x512xf32> -> vector<16x512xf32>
    %165 = vector.broadcast %4 : vector<1x512xf32> to vector<16x512xf32>
    %166 = arith.addf %165, %164 : vector<16x512xf32>
    %c1_93 = arith.constant 1 : index
    %c0_94 = arith.constant 0 : index
    %c0_95 = arith.constant 0 : index
    %167 = vector.load %arg10[%c1_93, %c0_94, %c0_95] : memref<2x16x128xf32, #tpu.memory_space<vmem>>, vector<1x16x128xf32>
    %168 = vector.shape_cast %167 : vector<1x16x128xf32> to vector<16x128xf32>
    %169 = vector.extract_strided_slice %166 {offsets = [0, 0], sizes = [16, 128], strides = [1, 1]} : vector<16x512xf32> to vector<16x128xf32>
    %cst_96 = arith.constant 5.000000e-01 : f32
    %170 = vector.broadcast %cst_96 : f32 to vector<16x128xf32>
    %171 = arith.mulf %170, %169 : vector<16x128xf32>
    %172 = math.tanh %171 : vector<16x128xf32>
    %cst_97 = arith.constant 5.000000e-01 : f32
    %173 = vector.broadcast %cst_97 : f32 to vector<16x128xf32>
    %174 = arith.mulf %173, %172 : vector<16x128xf32>
    %cst_98 = arith.constant 5.000000e-01 : f32
    %175 = vector.broadcast %cst_98 : f32 to vector<16x128xf32>
    %176 = arith.addf %174, %175 : vector<16x128xf32>
    %177 = vector.extract_strided_slice %166 {offsets = [0, 128], sizes = [16, 128], strides = [1, 1]} : vector<16x512xf32> to vector<16x128xf32>
    %cst_99 = arith.constant 5.000000e-01 : f32
    %178 = vector.broadcast %cst_99 : f32 to vector<16x128xf32>
    %179 = arith.mulf %178, %177 : vector<16x128xf32>
    %180 = math.tanh %179 : vector<16x128xf32>
    %cst_100 = arith.constant 5.000000e-01 : f32
    %181 = vector.broadcast %cst_100 : f32 to vector<16x128xf32>
    %182 = arith.mulf %181, %180 : vector<16x128xf32>
    %cst_101 = arith.constant 5.000000e-01 : f32
    %183 = vector.broadcast %cst_101 : f32 to vector<16x128xf32>
    %184 = arith.addf %182, %183 : vector<16x128xf32>
    %185 = vector.extract_strided_slice %166 {offsets = [0, 256], sizes = [16, 128], strides = [1, 1]} : vector<16x512xf32> to vector<16x128xf32>
    %186 = math.tanh %185 : vector<16x128xf32>
    %187 = vector.extract_strided_slice %166 {offsets = [0, 384], sizes = [16, 128], strides = [1, 1]} : vector<16x512xf32> to vector<16x128xf32>
    %cst_102 = arith.constant 5.000000e-01 : f32
    %188 = vector.broadcast %cst_102 : f32 to vector<16x128xf32>
    %189 = arith.mulf %188, %187 : vector<16x128xf32>
    %190 = math.tanh %189 : vector<16x128xf32>
    %cst_103 = arith.constant 5.000000e-01 : f32
    %191 = vector.broadcast %cst_103 : f32 to vector<16x128xf32>
    %192 = arith.mulf %191, %190 : vector<16x128xf32>
    %cst_104 = arith.constant 5.000000e-01 : f32
    %193 = vector.broadcast %cst_104 : f32 to vector<16x128xf32>
    %194 = arith.addf %192, %193 : vector<16x128xf32>
    %195 = arith.mulf %184, %168 : vector<16x128xf32>
    %196 = arith.mulf %176, %186 : vector<16x128xf32>
    %197 = arith.addf %195, %196 : vector<16x128xf32>
    %198 = math.tanh %197 : vector<16x128xf32>
    %199 = arith.mulf %194, %198 : vector<16x128xf32>
    %200 = arith.truncf %199 : vector<16x128xf32> to vector<16x128xbf16>
    %c1_105 = arith.constant 1 : index
    %c0_106 = arith.constant 0 : index
    %c0_107 = arith.constant 0 : index
    %201 = vector.load %arg9[%c1_105, %c0_106, %c0_107] : memref<2x16x128xbf16, #tpu.memory_space<vmem>>, vector<1x16x128xbf16>
    %202 = vector.shape_cast %201 : vector<1x16x128xbf16> to vector<16x128xbf16>
    %203 = vector.shape_cast %200 : vector<16x128xbf16> to vector<1x16x128xbf16>
    tpu.vector_store %arg9[%c1_105, %c0_106, %c0_107], %203 {strides = array<i32>} : memref<2x16x128xbf16, #tpu.memory_space<vmem>>, vector<1x16x128xbf16>,
    %c1_108 = arith.constant 1 : index
    %c0_109 = arith.constant 0 : index
    %c0_110 = arith.constant 0 : index
    %204 = vector.load %arg10[%c1_108, %c0_109, %c0_110] : memref<2x16x128xf32, #tpu.memory_space<vmem>>, vector<1x16x128xf32>
    %205 = vector.shape_cast %204 : vector<1x16x128xf32> to vector<16x128xf32>
    %206 = vector.shape_cast %197 : vector<16x128xf32> to vector<1x16x128xf32>
    tpu.vector_store %arg10[%c1_108, %c0_109, %c0_110], %206 {strides = array<i32>} : memref<2x16x128xf32, #tpu.memory_space<vmem>>, vector<1x16x128xf32>,
    %c0_111 = arith.constant 0 : index
    %c0_112 = arith.constant 0 : index
    %207 = vector.load %arg6[%c0_111, %c0_112] : memref<128x128xbf16, #tpu.memory_space<vmem>>, vector<128x128xbf16>
    %cst_113 = arith.constant dense<0.000000e+00> : vector<16x128xf32>
    %208 = tpu.matmul %200, %207, %cst_113 {dimension_numbers = #tpu.dot_dimension_numbers<[1], [0], [0], [1], [0, 0, 1, 1], [], []>} : vector<16x128xbf16>, vector<128x128xbf16>, vector<16x128xf32> -> vector<16x128xf32>
    %209 = vector.broadcast %5 : vector<1x128xf32> to vector<16x128xf32>
    %210 = arith.addf %208, %209 : vector<16x128xf32>
    %211 = arith.truncf %210 : vector<16x128xf32> to vector<16x128xbf16>
    %212 = arith.index_cast %c1_i32 : i32 to index
    %c0_114 = arith.constant 0 : index
    %c0_115 = arith.constant 0 : index
    %213 = vector.load %arg8[%212, %c0_114, %c0_115] : memref<4x16x128xbf16, #tpu.memory_space<vmem>>, vector<1x16x128xbf16>
    %214 = vector.shape_cast %213 : vector<1x16x128xbf16> to vector<16x128xbf16>
    %215 = vector.shape_cast %211 : vector<16x128xbf16> to vector<1x16x128xbf16>
    tpu.vector_store %arg8[%212, %c0_114, %c0_115], %215 {strides = array<i32>} : memref<4x16x128xbf16, #tpu.memory_space<vmem>>, vector<1x16x128xbf16>,
    %c2_i32 = arith.constant 2 : i32
    %216 = arith.index_cast %c2_i32 : i32 to index
    %c0_116 = arith.constant 0 : index
    %c0_117 = arith.constant 0 : index
    %217 = vector.load %arg2[%216, %c0_116, %c0_117] : memref<4x16x512xf32, #tpu.memory_space<vmem>>, vector<1x16x512xf32>
    %218 = vector.shape_cast %217 : vector<1x16x512xf32> to vector<16x512xf32>
    %c0_118 = arith.constant 0 : index
    %c0_119 = arith.constant 0 : index
    %c0_120 = arith.constant 0 : index
    %219 = vector.load %arg9[%c0_118, %c0_119, %c0_120] : memref<2x16x128xbf16, #tpu.memory_space<vmem>>, vector<1x16x128xbf16>
    %220 = vector.shape_cast %219 : vector<1x16x128xbf16> to vector<16x128xbf16>
    %c0_121 = arith.constant 0 : index
    %c0_122 = arith.constant 0 : index
    %221 = vector.load %arg3[%c0_121, %c0_122] : memref<128x512xbf16, #tpu.memory_space<vmem>>, vector<128x512xbf16>
    %cst_123 = arith.constant dense<0.000000e+00> : vector<16x512xf32>
    %222 = tpu.matmul %220, %221, %cst_123 {dimension_numbers = #tpu.dot_dimension_numbers<[1], [0], [0], [1], [0, 0, 1, 1], [], []>} : vector<16x128xbf16>, vector<128x512xbf16>, vector<16x512xf32> -> vector<16x512xf32>
    %223 = arith.addf %218, %222 : vector<16x512xf32>
    %c0_124 = arith.constant 0 : index
    %c0_125 = arith.constant 0 : index
    %c0_126 = arith.constant 0 : index
    %224 = vector.load %arg10[%c0_124, %c0_125, %c0_126] : memref<2x16x128xf32, #tpu.memory_space<vmem>>, vector<1x16x128xf32>
    %225 = vector.shape_cast %224 : vector<1x16x128xf32> to vector<16x128xf32>
    %226 = vector.extract_strided_slice %223 {offsets = [0, 0], sizes = [16, 128], strides = [1, 1]} : vector<16x512xf32> to vector<16x128xf32>
    %cst_127 = arith.constant 5.000000e-01 : f32
    %227 = vector.broadcast %cst_127 : f32 to vector<16x128xf32>
    %228 = arith.mulf %227, %226 : vector<16x128xf32>
    %229 = math.tanh %228 : vector<16x128xf32>
    %cst_128 = arith.constant 5.000000e-01 : f32
    %230 = vector.broadcast %cst_128 : f32 to vector<16x128xf32>
    %231 = arith.mulf %230, %229 : vector<16x128xf32>
    %cst_129 = arith.constant 5.000000e-01 : f32
    %232 = vector.broadcast %cst_129 : f32 to vector<16x128xf32>
    %233 = arith.addf %231, %232 : vector<16x128xf32>
    %234 = vector.extract_strided_slice %223 {offsets = [0, 128], sizes = [16, 128], strides = [1, 1]} : vector<16x512xf32> to vector<16x128xf32>
    %cst_130 = arith.constant 5.000000e-01 : f32
    %235 = vector.broadcast %cst_130 : f32 to vector<16x128xf32>
    %236 = arith.mulf %235, %234 : vector<16x128xf32>
    %237 = math.tanh %236 : vector<16x128xf32>
    %cst_131 = arith.constant 5.000000e-01 : f32
    %238 = vector.broadcast %cst_131 : f32 to vector<16x128xf32>
    %239 = arith.mulf %238, %237 : vector<16x128xf32>
    %cst_132 = arith.constant 5.000000e-01 : f32
    %240 = vector.broadcast %cst_132 : f32 to vector<16x128xf32>
    %241 = arith.addf %239, %240 : vector<16x128xf32>
    %242 = vector.extract_strided_slice %223 {offsets = [0, 256], sizes = [16, 128], strides = [1, 1]} : vector<16x512xf32> to vector<16x128xf32>
    %243 = math.tanh %242 : vector<16x128xf32>
    %244 = vector.extract_strided_slice %223 {offsets = [0, 384], sizes = [16, 128], strides = [1, 1]} : vector<16x512xf32> to vector<16x128xf32>
    %cst_133 = arith.constant 5.000000e-01 : f32
    %245 = vector.broadcast %cst_133 : f32 to vector<16x128xf32>
    %246 = arith.mulf %245, %244 : vector<16x128xf32>
    %247 = math.tanh %246 : vector<16x128xf32>
    %cst_134 = arith.constant 5.000000e-01 : f32
    %248 = vector.broadcast %cst_134 : f32 to vector<16x128xf32>
    %249 = arith.mulf %248, %247 : vector<16x128xf32>
    %cst_135 = arith.constant 5.000000e-01 : f32
    %250 = vector.broadcast %cst_135 : f32 to vector<16x128xf32>
    %251 = arith.addf %249, %250 : vector<16x128xf32>
    %252 = arith.mulf %241, %225 : vector<16x128xf32>
    %253 = arith.mulf %233, %243 : vector<16x128xf32>
    %254 = arith.addf %252, %253 : vector<16x128xf32>
    %255 = math.tanh %254 : vector<16x128xf32>
    %256 = arith.mulf %251, %255 : vector<16x128xf32>
    %257 = arith.truncf %256 : vector<16x128xf32> to vector<16x128xbf16>
    %c0_136 = arith.constant 0 : index
    %c0_137 = arith.constant 0 : index
    %c0_138 = arith.constant 0 : index
    %258 = vector.load %arg9[%c0_136, %c0_137, %c0_138] : memref<2x16x128xbf16, #tpu.memory_space<vmem>>, vector<1x16x128xbf16>
    %259 = vector.shape_cast %258 : vector<1x16x128xbf16> to vector<16x128xbf16>
    %260 = vector.shape_cast %257 : vector<16x128xbf16> to vector<1x16x128xbf16>
    tpu.vector_store %arg9[%c0_136, %c0_137, %c0_138], %260 {strides = array<i32>} : memref<2x16x128xbf16, #tpu.memory_space<vmem>>, vector<1x16x128xbf16>,
    %c0_139 = arith.constant 0 : index
    %c0_140 = arith.constant 0 : index
    %c0_141 = arith.constant 0 : index
    %261 = vector.load %arg10[%c0_139, %c0_140, %c0_141] : memref<2x16x128xf32, #tpu.memory_space<vmem>>, vector<1x16x128xf32>
    %262 = vector.shape_cast %261 : vector<1x16x128xf32> to vector<16x128xf32>
    %263 = vector.shape_cast %254 : vector<16x128xf32> to vector<1x16x128xf32>
    tpu.vector_store %arg10[%c0_139, %c0_140, %c0_141], %263 {strides = array<i32>} : memref<2x16x128xf32, #tpu.memory_space<vmem>>, vector<1x16x128xf32>,
    %c1_142 = arith.constant 1 : index
    %c0_143 = arith.constant 0 : index
    %c0_144 = arith.constant 0 : index
    %264 = vector.load %arg9[%c1_142, %c0_143, %c0_144] : memref<2x16x128xbf16, #tpu.memory_space<vmem>>, vector<1x16x128xbf16>
    %265 = vector.shape_cast %264 : vector<1x16x128xbf16> to vector<16x128xbf16>
    %266 = tpu.concatenate %257, %265 in 1 : vector<16x128xbf16>, vector<16x128xbf16> -> vector<16x256xbf16>
    %c0_145 = arith.constant 0 : index
    %c0_146 = arith.constant 0 : index
    %c0_147 = arith.constant 0 : index
    %267 = vector.load %arg4[%c0_145, %c0_146, %c0_147] : memref<1x256x512xbf16, #tpu.memory_space<vmem>>, vector<1x256x512xbf16>
    %268 = vector.shape_cast %267 : vector<1x256x512xbf16> to vector<256x512xbf16>
    %cst_148 = arith.constant dense<0.000000e+00> : vector<16x512xf32>
    %269 = tpu.matmul %266, %268, %cst_148 {dimension_numbers = #tpu.dot_dimension_numbers<[1], [0], [0], [1], [0, 0, 1, 1], [], []>} : vector<16x256xbf16>, vector<256x512xbf16>, vector<16x512xf32> -> vector<16x512xf32>
    %270 = vector.broadcast %4 : vector<1x512xf32> to vector<16x512xf32>
    %271 = arith.addf %270, %269 : vector<16x512xf32>
    %c1_149 = arith.constant 1 : index
    %c0_150 = arith.constant 0 : index
    %c0_151 = arith.constant 0 : index
    %272 = vector.load %arg10[%c1_149, %c0_150, %c0_151] : memref<2x16x128xf32, #tpu.memory_space<vmem>>, vector<1x16x128xf32>
    %273 = vector.shape_cast %272 : vector<1x16x128xf32> to vector<16x128xf32>
    %274 = vector.extract_strided_slice %271 {offsets = [0, 0], sizes = [16, 128], strides = [1, 1]} : vector<16x512xf32> to vector<16x128xf32>
    %cst_152 = arith.constant 5.000000e-01 : f32
    %275 = vector.broadcast %cst_152 : f32 to vector<16x128xf32>
    %276 = arith.mulf %275, %274 : vector<16x128xf32>
    %277 = math.tanh %276 : vector<16x128xf32>
    %cst_153 = arith.constant 5.000000e-01 : f32
    %278 = vector.broadcast %cst_153 : f32 to vector<16x128xf32>
    %279 = arith.mulf %278, %277 : vector<16x128xf32>
    %cst_154 = arith.constant 5.000000e-01 : f32
    %280 = vector.broadcast %cst_154 : f32 to vector<16x128xf32>
    %281 = arith.addf %279, %280 : vector<16x128xf32>
    %282 = vector.extract_strided_slice %271 {offsets = [0, 128], sizes = [16, 128], strides = [1, 1]} : vector<16x512xf32> to vector<16x128xf32>
    %cst_155 = arith.constant 5.000000e-01 : f32
    %283 = vector.broadcast %cst_155 : f32 to vector<16x128xf32>
    %284 = arith.mulf %283, %282 : vector<16x128xf32>
    %285 = math.tanh %284 : vector<16x128xf32>
    %cst_156 = arith.constant 5.000000e-01 : f32
    %286 = vector.broadcast %cst_156 : f32 to vector<16x128xf32>
    %287 = arith.mulf %286, %285 : vector<16x128xf32>
    %cst_157 = arith.constant 5.000000e-01 : f32
    %288 = vector.broadcast %cst_157 : f32 to vector<16x128xf32>
    %289 = arith.addf %287, %288 : vector<16x128xf32>
    %290 = vector.extract_strided_slice %271 {offsets = [0, 256], sizes = [16, 128], strides = [1, 1]} : vector<16x512xf32> to vector<16x128xf32>
    %291 = math.tanh %290 : vector<16x128xf32>
    %292 = vector.extract_strided_slice %271 {offsets = [0, 384], sizes = [16, 128], strides = [1, 1]} : vector<16x512xf32> to vector<16x128xf32>
    %cst_158 = arith.constant 5.000000e-01 : f32
    %293 = vector.broadcast %cst_158 : f32 to vector<16x128xf32>
    %294 = arith.mulf %293, %292 : vector<16x128xf32>
    %295 = math.tanh %294 : vector<16x128xf32>
    %cst_159 = arith.constant 5.000000e-01 : f32
    %296 = vector.broadcast %cst_159 : f32 to vector<16x128xf32>
    %297 = arith.mulf %296, %295 : vector<16x128xf32>
    %cst_160 = arith.constant 5.000000e-01 : f32
    %298 = vector.broadcast %cst_160 : f32 to vector<16x128xf32>
    %299 = arith.addf %297, %298 : vector<16x128xf32>
    %300 = arith.mulf %289, %273 : vector<16x128xf32>
    %301 = arith.mulf %281, %291 : vector<16x128xf32>
    %302 = arith.addf %300, %301 : vector<16x128xf32>
    %303 = math.tanh %302 : vector<16x128xf32>
    %304 = arith.mulf %299, %303 : vector<16x128xf32>
    %305 = arith.truncf %304 : vector<16x128xf32> to vector<16x128xbf16>
    %c1_161 = arith.constant 1 : index
    %c0_162 = arith.constant 0 : index
    %c0_163 = arith.constant 0 : index
    %306 = vector.load %arg9[%c1_161, %c0_162, %c0_163] : memref<2x16x128xbf16, #tpu.memory_space<vmem>>, vector<1x16x128xbf16>
    %307 = vector.shape_cast %306 : vector<1x16x128xbf16> to vector<16x128xbf16>
    %308 = vector.shape_cast %305 : vector<16x128xbf16> to vector<1x16x128xbf16>
    tpu.vector_store %arg9[%c1_161, %c0_162, %c0_163], %308 {strides = array<i32>} : memref<2x16x128xbf16, #tpu.memory_space<vmem>>, vector<1x16x128xbf16>,
    %c1_164 = arith.constant 1 : index
    %c0_165 = arith.constant 0 : index
    %c0_166 = arith.constant 0 : index
    %309 = vector.load %arg10[%c1_164, %c0_165, %c0_166] : memref<2x16x128xf32, #tpu.memory_space<vmem>>, vector<1x16x128xf32>
    %310 = vector.shape_cast %309 : vector<1x16x128xf32> to vector<16x128xf32>
    %311 = vector.shape_cast %302 : vector<16x128xf32> to vector<1x16x128xf32>
    tpu.vector_store %arg10[%c1_164, %c0_165, %c0_166], %311 {strides = array<i32>} : memref<2x16x128xf32, #tpu.memory_space<vmem>>, vector<1x16x128xf32>,
    %c0_167 = arith.constant 0 : index
    %c0_168 = arith.constant 0 : index
    %312 = vector.load %arg6[%c0_167, %c0_168] : memref<128x128xbf16, #tpu.memory_space<vmem>>, vector<128x128xbf16>
    %cst_169 = arith.constant dense<0.000000e+00> : vector<16x128xf32>
    %313 = tpu.matmul %305, %312, %cst_169 {dimension_numbers = #tpu.dot_dimension_numbers<[1], [0], [0], [1], [0, 0, 1, 1], [], []>} : vector<16x128xbf16>, vector<128x128xbf16>, vector<16x128xf32> -> vector<16x128xf32>
    %314 = vector.broadcast %5 : vector<1x128xf32> to vector<16x128xf32>
    %315 = arith.addf %313, %314 : vector<16x128xf32>
    %316 = arith.truncf %315 : vector<16x128xf32> to vector<16x128xbf16>
    %317 = arith.index_cast %c2_i32 : i32 to index
    %c0_170 = arith.constant 0 : index
    %c0_171 = arith.constant 0 : index
    %318 = vector.load %arg8[%317, %c0_170, %c0_171] : memref<4x16x128xbf16, #tpu.memory_space<vmem>>, vector<1x16x128xbf16>
    %319 = vector.shape_cast %318 : vector<1x16x128xbf16> to vector<16x128xbf16>
    %320 = vector.shape_cast %316 : vector<16x128xbf16> to vector<1x16x128xbf16>
    tpu.vector_store %arg8[%317, %c0_170, %c0_171], %320 {strides = array<i32>} : memref<4x16x128xbf16, #tpu.memory_space<vmem>>, vector<1x16x128xbf16>,
    %c3_i32 = arith.constant 3 : i32
    %321 = arith.index_cast %c3_i32 : i32 to index
    %c0_172 = arith.constant 0 : index
    %c0_173 = arith.constant 0 : index
    %322 = vector.load %arg2[%321, %c0_172, %c0_173] : memref<4x16x512xf32, #tpu.memory_space<vmem>>, vector<1x16x512xf32>
    %323 = vector.shape_cast %322 : vector<1x16x512xf32> to vector<16x512xf32>
    %c0_174 = arith.constant 0 : index
    %c0_175 = arith.constant 0 : index
    %c0_176 = arith.constant 0 : index
    %324 = vector.load %arg9[%c0_174, %c0_175, %c0_176] : memref<2x16x128xbf16, #tpu.memory_space<vmem>>, vector<1x16x128xbf16>
    %325 = vector.shape_cast %324 : vector<1x16x128xbf16> to vector<16x128xbf16>
    %c0_177 = arith.constant 0 : index
    %c0_178 = arith.constant 0 : index
    %326 = vector.load %arg3[%c0_177, %c0_178] : memref<128x512xbf16, #tpu.memory_space<vmem>>, vector<128x512xbf16>
    %cst_179 = arith.constant dense<0.000000e+00> : vector<16x512xf32>
    %327 = tpu.matmul %325, %326, %cst_179 {dimension_numbers = #tpu.dot_dimension_numbers<[1], [0], [0], [1], [0, 0, 1, 1], [], []>} : vector<16x128xbf16>, vector<128x512xbf16>, vector<16x512xf32> -> vector<16x512xf32>
    %328 = arith.addf %323, %327 : vector<16x512xf32>
    %c0_180 = arith.constant 0 : index
    %c0_181 = arith.constant 0 : index
    %c0_182 = arith.constant 0 : index
    %329 = vector.load %arg10[%c0_180, %c0_181, %c0_182] : memref<2x16x128xf32, #tpu.memory_space<vmem>>, vector<1x16x128xf32>
    %330 = vector.shape_cast %329 : vector<1x16x128xf32> to vector<16x128xf32>
    %331 = vector.extract_strided_slice %328 {offsets = [0, 0], sizes = [16, 128], strides = [1, 1]} : vector<16x512xf32> to vector<16x128xf32>
    %cst_183 = arith.constant 5.000000e-01 : f32
    %332 = vector.broadcast %cst_183 : f32 to vector<16x128xf32>
    %333 = arith.mulf %332, %331 : vector<16x128xf32>
    %334 = math.tanh %333 : vector<16x128xf32>
    %cst_184 = arith.constant 5.000000e-01 : f32
    %335 = vector.broadcast %cst_184 : f32 to vector<16x128xf32>
    %336 = arith.mulf %335, %334 : vector<16x128xf32>
    %cst_185 = arith.constant 5.000000e-01 : f32
    %337 = vector.broadcast %cst_185 : f32 to vector<16x128xf32>
    %338 = arith.addf %336, %337 : vector<16x128xf32>
    %339 = vector.extract_strided_slice %328 {offsets = [0, 128], sizes = [16, 128], strides = [1, 1]} : vector<16x512xf32> to vector<16x128xf32>
    %cst_186 = arith.constant 5.000000e-01 : f32
    %340 = vector.broadcast %cst_186 : f32 to vector<16x128xf32>
    %341 = arith.mulf %340, %339 : vector<16x128xf32>
    %342 = math.tanh %341 : vector<16x128xf32>
    %cst_187 = arith.constant 5.000000e-01 : f32
    %343 = vector.broadcast %cst_187 : f32 to vector<16x128xf32>
    %344 = arith.mulf %343, %342 : vector<16x128xf32>
    %cst_188 = arith.constant 5.000000e-01 : f32
    %345 = vector.broadcast %cst_188 : f32 to vector<16x128xf32>
    %346 = arith.addf %344, %345 : vector<16x128xf32>
    %347 = vector.extract_strided_slice %328 {offsets = [0, 256], sizes = [16, 128], strides = [1, 1]} : vector<16x512xf32> to vector<16x128xf32>
    %348 = math.tanh %347 : vector<16x128xf32>
    %349 = vector.extract_strided_slice %328 {offsets = [0, 384], sizes = [16, 128], strides = [1, 1]} : vector<16x512xf32> to vector<16x128xf32>
    %cst_189 = arith.constant 5.000000e-01 : f32
    %350 = vector.broadcast %cst_189 : f32 to vector<16x128xf32>
    %351 = arith.mulf %350, %349 : vector<16x128xf32>
    %352 = math.tanh %351 : vector<16x128xf32>
    %cst_190 = arith.constant 5.000000e-01 : f32
    %353 = vector.broadcast %cst_190 : f32 to vector<16x128xf32>
    %354 = arith.mulf %353, %352 : vector<16x128xf32>
    %cst_191 = arith.constant 5.000000e-01 : f32
    %355 = vector.broadcast %cst_191 : f32 to vector<16x128xf32>
    %356 = arith.addf %354, %355 : vector<16x128xf32>
    %357 = arith.mulf %346, %330 : vector<16x128xf32>
    %358 = arith.mulf %338, %348 : vector<16x128xf32>
    %359 = arith.addf %357, %358 : vector<16x128xf32>
    %360 = math.tanh %359 : vector<16x128xf32>
    %361 = arith.mulf %356, %360 : vector<16x128xf32>
    %362 = arith.truncf %361 : vector<16x128xf32> to vector<16x128xbf16>
    %c0_192 = arith.constant 0 : index
    %c0_193 = arith.constant 0 : index
    %c0_194 = arith.constant 0 : index
    %363 = vector.load %arg9[%c0_192, %c0_193, %c0_194] : memref<2x16x128xbf16, #tpu.memory_space<vmem>>, vector<1x16x128xbf16>
    %364 = vector.shape_cast %363 : vector<1x16x128xbf16> to vector<16x128xbf16>
    %365 = vector.shape_cast %362 : vector<16x128xbf16> to vector<1x16x128xbf16>
    tpu.vector_store %arg9[%c0_192, %c0_193, %c0_194], %365 {strides = array<i32>} : memref<2x16x128xbf16, #tpu.memory_space<vmem>>, vector<1x16x128xbf16>,
    %c0_195 = arith.constant 0 : index
    %c0_196 = arith.constant 0 : index
    %c0_197 = arith.constant 0 : index
    %366 = vector.load %arg10[%c0_195, %c0_196, %c0_197] : memref<2x16x128xf32, #tpu.memory_space<vmem>>, vector<1x16x128xf32>
    %367 = vector.shape_cast %366 : vector<1x16x128xf32> to vector<16x128xf32>
    %368 = vector.shape_cast %359 : vector<16x128xf32> to vector<1x16x128xf32>
    tpu.vector_store %arg10[%c0_195, %c0_196, %c0_197], %368 {strides = array<i32>} : memref<2x16x128xf32, #tpu.memory_space<vmem>>, vector<1x16x128xf32>,
    %c1_198 = arith.constant 1 : index
    %c0_199 = arith.constant 0 : index
    %c0_200 = arith.constant 0 : index
    %369 = vector.load %arg9[%c1_198, %c0_199, %c0_200] : memref<2x16x128xbf16, #tpu.memory_space<vmem>>, vector<1x16x128xbf16>
    %370 = vector.shape_cast %369 : vector<1x16x128xbf16> to vector<16x128xbf16>
    %371 = tpu.concatenate %362, %370 in 1 : vector<16x128xbf16>, vector<16x128xbf16> -> vector<16x256xbf16>
    %c0_201 = arith.constant 0 : index
    %c0_202 = arith.constant 0 : index
    %c0_203 = arith.constant 0 : index
    %372 = vector.load %arg4[%c0_201, %c0_202, %c0_203] : memref<1x256x512xbf16, #tpu.memory_space<vmem>>, vector<1x256x512xbf16>
    %373 = vector.shape_cast %372 : vector<1x256x512xbf16> to vector<256x512xbf16>
    %cst_204 = arith.constant dense<0.000000e+00> : vector<16x512xf32>
    %374 = tpu.matmul %371, %373, %cst_204 {dimension_numbers = #tpu.dot_dimension_numbers<[1], [0], [0], [1], [0, 0, 1, 1], [], []>} : vector<16x256xbf16>, vector<256x512xbf16>, vector<16x512xf32> -> vector<16x512xf32>
    %375 = vector.broadcast %4 : vector<1x512xf32> to vector<16x512xf32>
    %376 = arith.addf %375, %374 : vector<16x512xf32>
    %c1_205 = arith.constant 1 : index
    %c0_206 = arith.constant 0 : index
    %c0_207 = arith.constant 0 : index
    %377 = vector.load %arg10[%c1_205, %c0_206, %c0_207] : memref<2x16x128xf32, #tpu.memory_space<vmem>>, vector<1x16x128xf32>
    %378 = vector.shape_cast %377 : vector<1x16x128xf32> to vector<16x128xf32>
    %379 = vector.extract_strided_slice %376 {offsets = [0, 0], sizes = [16, 128], strides = [1, 1]} : vector<16x512xf32> to vector<16x128xf32>
    %cst_208 = arith.constant 5.000000e-01 : f32
    %380 = vector.broadcast %cst_208 : f32 to vector<16x128xf32>
    %381 = arith.mulf %380, %379 : vector<16x128xf32>
    %382 = math.tanh %381 : vector<16x128xf32>
    %cst_209 = arith.constant 5.000000e-01 : f32
    %383 = vector.broadcast %cst_209 : f32 to vector<16x128xf32>
    %384 = arith.mulf %383, %382 : vector<16x128xf32>
    %cst_210 = arith.constant 5.000000e-01 : f32
    %385 = vector.broadcast %cst_210 : f32 to vector<16x128xf32>
    %386 = arith.addf %384, %385 : vector<16x128xf32>
    %387 = vector.extract_strided_slice %376 {offsets = [0, 128], sizes = [16, 128], strides = [1, 1]} : vector<16x512xf32> to vector<16x128xf32>
    %cst_211 = arith.constant 5.000000e-01 : f32
    %388 = vector.broadcast %cst_211 : f32 to vector<16x128xf32>
    %389 = arith.mulf %388, %387 : vector<16x128xf32>
    %390 = math.tanh %389 : vector<16x128xf32>
    %cst_212 = arith.constant 5.000000e-01 : f32
    %391 = vector.broadcast %cst_212 : f32 to vector<16x128xf32>
    %392 = arith.mulf %391, %390 : vector<16x128xf32>
    %cst_213 = arith.constant 5.000000e-01 : f32
    %393 = vector.broadcast %cst_213 : f32 to vector<16x128xf32>
    %394 = arith.addf %392, %393 : vector<16x128xf32>
    %395 = vector.extract_strided_slice %376 {offsets = [0, 256], sizes = [16, 128], strides = [1, 1]} : vector<16x512xf32> to vector<16x128xf32>
    %396 = math.tanh %395 : vector<16x128xf32>
    %397 = vector.extract_strided_slice %376 {offsets = [0, 384], sizes = [16, 128], strides = [1, 1]} : vector<16x512xf32> to vector<16x128xf32>
    %cst_214 = arith.constant 5.000000e-01 : f32
    %398 = vector.broadcast %cst_214 : f32 to vector<16x128xf32>
    %399 = arith.mulf %398, %397 : vector<16x128xf32>
    %400 = math.tanh %399 : vector<16x128xf32>
    %cst_215 = arith.constant 5.000000e-01 : f32
    %401 = vector.broadcast %cst_215 : f32 to vector<16x128xf32>
    %402 = arith.mulf %401, %400 : vector<16x128xf32>
    %cst_216 = arith.constant 5.000000e-01 : f32
    %403 = vector.broadcast %cst_216 : f32 to vector<16x128xf32>
    %404 = arith.addf %402, %403 : vector<16x128xf32>
    %405 = arith.mulf %394, %378 : vector<16x128xf32>
    %406 = arith.mulf %386, %396 : vector<16x128xf32>
    %407 = arith.addf %405, %406 : vector<16x128xf32>
    %408 = math.tanh %407 : vector<16x128xf32>
    %409 = arith.mulf %404, %408 : vector<16x128xf32>
    %410 = arith.truncf %409 : vector<16x128xf32> to vector<16x128xbf16>
    %c1_217 = arith.constant 1 : index
    %c0_218 = arith.constant 0 : index
    %c0_219 = arith.constant 0 : index
    %411 = vector.load %arg9[%c1_217, %c0_218, %c0_219] : memref<2x16x128xbf16, #tpu.memory_space<vmem>>, vector<1x16x128xbf16>
    %412 = vector.shape_cast %411 : vector<1x16x128xbf16> to vector<16x128xbf16>
    %413 = vector.shape_cast %410 : vector<16x128xbf16> to vector<1x16x128xbf16>
    tpu.vector_store %arg9[%c1_217, %c0_218, %c0_219], %413 {strides = array<i32>} : memref<2x16x128xbf16, #tpu.memory_space<vmem>>, vector<1x16x128xbf16>,
    %c1_220 = arith.constant 1 : index
    %c0_221 = arith.constant 0 : index
    %c0_222 = arith.constant 0 : index
    %414 = vector.load %arg10[%c1_220, %c0_221, %c0_222] : memref<2x16x128xf32, #tpu.memory_space<vmem>>, vector<1x16x128xf32>
    %415 = vector.shape_cast %414 : vector<1x16x128xf32> to vector<16x128xf32>
    %416 = vector.shape_cast %407 : vector<16x128xf32> to vector<1x16x128xf32>
    tpu.vector_store %arg10[%c1_220, %c0_221, %c0_222], %416 {strides = array<i32>} : memref<2x16x128xf32, #tpu.memory_space<vmem>>, vector<1x16x128xf32>,
    %c0_223 = arith.constant 0 : index
    %c0_224 = arith.constant 0 : index
    %417 = vector.load %arg6[%c0_223, %c0_224] : memref<128x128xbf16, #tpu.memory_space<vmem>>, vector<128x128xbf16>
    %cst_225 = arith.constant dense<0.000000e+00> : vector<16x128xf32>
    %418 = tpu.matmul %410, %417, %cst_225 {dimension_numbers = #tpu.dot_dimension_numbers<[1], [0], [0], [1], [0, 0, 1, 1], [], []>} : vector<16x128xbf16>, vector<128x128xbf16>, vector<16x128xf32> -> vector<16x128xf32>
    %419 = vector.broadcast %5 : vector<1x128xf32> to vector<16x128xf32>
    %420 = arith.addf %418, %419 : vector<16x128xf32>
    %421 = arith.truncf %420 : vector<16x128xf32> to vector<16x128xbf16>
    %422 = arith.index_cast %c3_i32 : i32 to index
    %c0_226 = arith.constant 0 : index
    %c0_227 = arith.constant 0 : index
    %423 = vector.load %arg8[%422, %c0_226, %c0_227] : memref<4x16x128xbf16, #tpu.memory_space<vmem>>, vector<1x16x128xbf16>
    %424 = vector.shape_cast %423 : vector<1x16x128xbf16> to vector<16x128xbf16>
    %425 = vector.shape_cast %421 : vector<16x128xbf16> to vector<1x16x128xbf16>
    tpu.vector_store %arg8[%422, %c0_226, %c0_227], %425 {strides = array<i32>} : memref<4x16x128xbf16, #tpu.memory_space<vmem>>, vector<1x16x128xbf16>,
    %c4_i32 = arith.constant 4 : i32
    return
  }
  func.func @transform_0(%arg0: i32, %arg1: i32) -> (i32, i32, i32) {
    %c0_i32 = arith.constant 0 : i32
    %c0_i32_0 = arith.constant 0 : i32
    return %arg1, %arg0, %c0_i32 : i32, i32, i32
  }
  func.func @transform_1(%arg0: i32, %arg1: i32) -> (i32, i32) {
    %c0_i32 = arith.constant 0 : i32
    %c0_i32_0 = arith.constant 0 : i32
    %c0_i32_1 = arith.constant 0 : i32
    return %c0_i32, %c0_i32_0 : i32, i32
  }
  func.func @transform_2(%arg0: i32, %arg1: i32) -> (i32, i32, i32) {
    %c0_i32 = arith.constant 0 : i32
    %c0_i32_0 = arith.constant 0 : i32
    %c0_i32_1 = arith.constant 0 : i32
    %c0_i32_2 = arith.constant 0 : i32
    return %c0_i32, %c0_i32_0, %c0_i32_1 : i32, i32, i32
  }
  func.func @transform_3(%arg0: i32, %arg1: i32) -> (i32, i32, i32) {
    %c0_i32 = arith.constant 0 : i32
    %c0_i32_0 = arith.constant 0 : i32
    %c0_i32_1 = arith.constant 0 : i32
    %c0_i32_2 = arith.constant 0 : i32
    return %c0_i32, %c0_i32_0, %c0_i32_1 : i32, i32, i32
  }
  func.func @transform_4(%arg0: i32, %arg1: i32) -> (i32, i32) {
    %c0_i32 = arith.constant 0 : i32
    %c0_i32_0 = arith.constant 0 : i32
    %c0_i32_1 = arith.constant 0 : i32
    return %c0_i32, %c0_i32_0 : i32, i32
  }
  func.func @transform_5(%arg0: i32, %arg1: i32) -> (i32, i32) {
    %c0_i32 = arith.constant 0 : i32
    %c0_i32_0 = arith.constant 0 : i32
    %c0_i32_1 = arith.constant 0 : i32
    return %c0_i32, %c0_i32_0 : i32, i32
  }
  func.func @transform_6(%arg0: i32, %arg1: i32) -> (i32, i32, i32) {
    %c0_i32 = arith.constant 0 : i32
    %c0_i32_0 = arith.constant 0 : i32
    return %arg1, %arg0, %c0_i32 : i32, i32, i32
  }
}

</mosaic_0001>

<bundles_post_ra>
// kernel: tpu_custom_call.1
= control target key start
LH: loop header
LB: loop body
LE: loop exit
PB: predicated region body
PF: predicated region fallthrough
CT: control target
= control target key end

     0   :  { %s7058_s0 = inlined_call_operand.hbm [shape: f32[8,16,512], index: 0, kind: input, shape index: {}]   ;;  %s7059_s1 = inlined_call_operand.hbm [shape: bf16[128,512], index: 1, kind: input, shape index: {}]   ;;  %s7060_s2 = inlined_call_operand.hbm [shape: bf16[1,256,512], index: 2, kind: input, shape index: {}]   ;;  %s7061_s3 = inlined_call_operand.vmem [shape: f32[1,1,512], index: 3, kind: input, shape index: {}]   ;;  %s7062_s4 = inlined_call_operand.hbm [shape: bf16[128,128], index: 4, kind: input, shape index: {}]   ;;  %s7063_s5 = inlined_call_operand.vmem [shape: f32[1,128], index: 5, kind: input, shape index: {}]   ;;  %s7064_s6 = inlined_call_operand.hbm [shape: bf16[8,16,128], index: 6, kind: output, shape index: {}]  }
   0x1   :  { %7132 = sst [smem:[#allocation46_spill]] %s7064_s6 }
   0x2   :  { %11 = vsyncpa [#allocation5], 0 }
   0x3   :  { %13 = vsyncpa [#allocation5 + $0x1], 0 }
   0x4   :  { %14 = vsyncpa [#allocation8], 0 }
   0x5   :  { %15 = vsyncpa [#allocation11], 0 }
   0x6   :  { %16 = vsyncpa [#allocation6], 0 }
   0x7   :  { %18 = vsyncpa [#allocation6 + $0x1], 0  ;;  %s5956_s21 = smov 0   ;;  %s5958_s22 = smov 0  }
   0x8   :  { %s5960_s23 = smov 0   ;;  %s5962_s24 = smov 0  }
   0x9   :  { %s5964_s25 = smov 0   ;;  %s5966_s26 = smov 0  }
   0xa LB: > { %7133 = sst [smem:[#allocation17_spill]] %s5881_s21  ;;  %s4411_s27 = sadd.s32 4294967295, %s5901_s26   ;;  %s5901_s26 = sphi %s5966_s26, %s24_s26   ;;  %s5897_s25 = sphi %s5964_s25, %s7266_s25   ;;  %s5893_s24 = sphi %s5962_s24, %s7265_s24   ;;  %s5889_s23 = sphi %s5960_s23, %s7264_s23   ;;  %s5885_s22 = sphi %s5958_s22, %s7263_s22   ;;  %s5881_s21 = sphi %s5956_s21, %s7262_s21  }
   0xb   : > { %s4412_s28 = sadd.s32 4294967294, %s5901_s26   ;;  %p58_p0 = scmp.ne.s32.totalorder %s5885_s22, %s5881_s21 }
   0xc   : > { %p5990_p1 = scmp.eq.s32.totalorder %s4411_s27, 0  ;;  %p5994_p2 = scmp.eq.s32.totalorder %s4411_s27, 1 }
   0xd   : > { %p195_p3 = scmp.eq.s32.totalorder %s4412_s28, 1  ;;  %p4413_p5 = scmp.ge.s32.totalorder %s5901_s26, 1 }
   0xe   : > { %s7134_s29 = scalar_select %p5990_p1, 1, 0 }
   0xf   : > { %s7135_s30 = scalar_select %p5994_p2, 1, 0 }
  0x10   : > { %p6000_p4 = por %p5990_p1, %p58_p0  ;;  %p6005_p6 = por %p195_p3, %p58_p0 }
  0x11   : > { %p202_p7 = scmp.lt.s32.totalorder %s5901_s26, 3  ;;  %s5903_s10 = smov [#allocation7]  }
  0x12   : > { %s7136_s7 = scalar_select %p6000_p4, 1, 0 }
  0x13   : > { %s7137_s8 = scalar_select %p6005_p6, 1, 0 }
  0x14   : > { %p6010_p8 = pnand %p4413_p5, %p202_p7  ;;  %s214_s11 = sshll.u32 %s5903_s10, 4  ;;  %s6014_s11 = int_to_ptr.vmem [resolvable:$true] %s214_s11 }
  0x15   : > { %7138 = sst [smem:[#allocation18_spill]] %s7137_s8  ;;  %s5904_s13 = smov [#allocation9]  }
  0x16   : > { %s7139_s9 = scalar_select %p6010_p8, 1, 0 }
  0x17   : > { %p5057_p9 = pneg %p6010_p8  ;;  %s227_s14 = sshll.u32 %s5904_s13, 4  ;;  %s6025_s14 = int_to_ptr.vmem [resolvable:$true] %s227_s14 }
  0x18   : > { %s5905_s15 = smov [#allocation10]   ;;  %s5697_s19 = scalar_lea.hbm %s7059_s1, 4096 }
  0x19   : > { %p6021_p11 = pnand %p5057_p9, %p5990_p1  ;;  %s6027_s16 = sshll.u32 %s5905_s15, 4  ;;  %s244_s16 = int_to_ptr.vmem [resolvable:$true] %s6027_s16 }
  0x1a   : > { %p5698_p12 = scmp.ne.s32.totalorder %s7059_s1, %s5697_s19  ;;  %p5704_p5 = scmp.lt.u32.totalorder %s5697_s19, %s7059_s1 }
  0x1b   : > { %p6037_p13 = pneg %p6021_p11 }
  0x1d   : > { %p5700_p0 = pnand %p6037_p13, %p5698_p12 }
  0x1f   : > { %p5701_p3 = pneg %p5700_p0 }
  0x21   : > { %p5706_p7 = pnand %p5704_p5, %p5701_p3 }
  0x23   : > { %5709 = shalt.err (!%p5706_p7)
}
  0x24   : > { %s5710_s15 = scalar_lea.vmem %s6014_s11, 4096  ;;  %p5718_p1 = scmp.lt.s32.totalorder %s6014_s11, %s6014_s11 }
  0x25   : > { %p5711_p9 = scmp.ne.s32.totalorder %s6014_s11, %s5710_s15  ;;  %p5719_p4 = scmp.lt.s32.totalorder %s5710_s15, %s5710_s15 }
  0x27   : > { %p5713_p10 = pnand %p5711_p9, %p6037_p13  ;;  %p5720_p12 = por %p5719_p4, %p5718_p1 }
  0x29   : > { %p5714_p6 = pneg %p5713_p10 }
  0x2b   : > { %p5721_p0 = pnand %p5720_p12, %p5714_p6 }
  0x2d   : > { %5724 = shalt.err (!%p5721_p0)
}
  0x2e   : > { %s5906_s17 = smov 256   ;;  %s5907_s18 = smov 16  }
  0x2f   : > { %5060 = dma.hbm_to_vmem [thread:$0]  (!%p6021_p11), %s7059_s1, 4096, %s6014_s11, [#allocation8], %s5906_s17, %s5906_s17, %s5907_s18  }
  0x30   : > { %s5725_s13 = scalar_lea.hbm %s7060_s2, 8192 }
  0x31   : > { %p5726_p1 = scmp.ne.s32.totalorder %s7060_s2, %s5725_s13  ;;  %p5732_p10 = scmp.lt.u32.totalorder %s5725_s13, %s7060_s2 }
  0x33   : > { %p5728_p4 = pnand %p5726_p1, %p6037_p13 }
  0x35   : > { %p5729_p6 = pneg %p5728_p4 }
  0x37   : > { %p5734_p3 = pnand %p5732_p10, %p5729_p6 }
  0x39   : > { %5737 = shalt.err (!%p5734_p3)
}
  0x3a   : > { %s5738_s11 = scalar_lea.vmem %s6025_s14, 8192  ;;  %p5746_p12 = scmp.lt.s32.totalorder %s6025_s14, %s6025_s14 }
  0x3b   : > { %p5739_p5 = scmp.ne.s32.totalorder %s6025_s14, %s5738_s11  ;;  %p5747_p0 = scmp.lt.s32.totalorder %s5738_s11, %s5738_s11 }
  0x3d   : > { %p5741_p7 = pnand %p5739_p5, %p6037_p13  ;;  %p5748_p1 = por %p5747_p0, %p5746_p12 }
  0x3f   : > { %p5742_p9 = pneg %p5741_p7 }
  0x41   : > { %p5749_p4 = pnand %p5748_p1, %p5742_p9 }
  0x43   : > { %5752 = shalt.err (!%p5749_p4)
}
  0x44   : > { %5063 = dma.hbm_to_vmem [thread:$0]  (!%p6021_p11), %s7060_s2, 8192, %s6025_s14, [#allocation8], %s5906_s17, %s5906_s17, %s5907_s18  }
  0x45   : > { %s5753_s20 = scalar_lea.hbm %s7062_s4, 1024 }
  0x46   : > { %p5754_p6 = scmp.ne.s32.totalorder %s7062_s4, %s5753_s20  ;;  %p5760_p5 = scmp.lt.u32.totalorder %s5753_s20, %s7062_s4 }
  0x48   : > { %p5756_p10 = pnand %p5754_p6, %p6037_p13 }
  0x4a   : > { %p5757_p3 = pneg %p5756_p10 }
  0x4c   : > { %p5762_p7 = pnand %p5760_p5, %p5757_p3 }
  0x4e   : > { %5765 = shalt.err (!%p5762_p7)
}
  0x4f   : > { %s5766_s11 = scalar_lea.vmem %s244_s16, 1024  ;;  %p5774_p1 = scmp.lt.s32.totalorder %s244_s16, %s244_s16 }
  0x50   : > { %p5767_p9 = scmp.ne.s32.totalorder %s244_s16, %s5766_s11  ;;  %p5775_p4 = scmp.lt.s32.totalorder %s5766_s11, %s5766_s11 }
  0x52   : > { %p5769_p12 = pnand %p5767_p9, %p6037_p13  ;;  %p5776_p8 = por %p5775_p4, %p5774_p1 }
  0x54   : > { %p5770_p0 = pneg %p5769_p12 }
  0x56   : > { %p5777_p2 = pnand %p5776_p8, %p5770_p0 }
  0x58   : > { %5780 = shalt.err (!%p5777_p2)
}
  0x59   : > { %s5908_s14 = smov 64   ;;  %s5909_s28 = smov 4  }
  0x5a   : > { %5066 = dma.hbm_to_vmem [thread:$0]  (!%p6021_p11), %s7062_s4, 1024, %s244_s16, [#allocation11], %s5908_s14, %s5908_s14, %s5909_s28  }
  0x5b   : > { %s45_s6 = sadd.s32 1, %s5889_s23  ;;  %s33_s21 = sadd.s32 1, %s5897_s25 }
  0x5c   : > { %p52_p2 = scmp.ne.s32.totalorder %s5889_s23, %s5885_s22  ;;  %p34_p8 = scmp.ge.s32.totalorder %s33_s21, 2 }
  0x5d   : > { %p53_p13 = scmp.eq.s32.totalorder %s5901_s26, 0  ;;  %p7142_p6 = scmp.ne.s32.totalorder %s7135_s30, 0 }
  0x5e   : > { %p5078_p3 = scmp.lt.s32.totalorder %s5901_s26, 2  ;;  %s7268_s21 = smov (%p34_p8, %s33_s21), 0 }
  0x5f   : > { %p6107_p10 = por %p7142_p6, %p52_p2  ;;  %p54_p5 = por %p53_p13, %p52_p2 }
  0x60   : > { %s260_s12 = sand.u32 1, %s5889_s23   ;;  %s40_s19 = ssub.s32 %s5897_s25, %s7268_s21 }
  0x61   : > { %p43_p7 = scmp.eq.s32.totalorder %s40_s19, 0  ;;  %s4418_s16 = sshll.u32 %s260_s12, 8 }
  0x62   : > { %s4891_s20 = sshll.u32 %s5897_s25, 12  ;;  %s264_s15 = scalar_lea.vmem [#allocation4], %s4418_s16 }
  0x63   : > { %s6119_s27 = scalar_select %p43_p7, %s5889_s23, %s45_s6  }
  0x64   : > { %s6124_s30 = scalar_lea.hbm %s7058_s0, %s4891_s20  ;;  %s275_s11 = sshll.u32 %s264_s15, 4  ;;  %s6126_s11 = int_to_ptr.vmem [resolvable:$true] %s275_s11 }
  0x65   : > { %p6130_p11 = pnand %p5078_p3, %p54_p5  ;;  %s6134_s28 = scalar_lea.sflag [#allocation5], %s260_s12 }
  0x66   : > { %s5781_s17 = scalar_lea.hbm %s6124_s30, 4096  ;;  %s5786_s19 = scalar_lea.hbm %s7058_s0, 8192 }
  0x67   : > { %p5782_p9 = scmp.ne.s32.totalorder %s6124_s30, %s5781_s17  ;;  %p5783_p12 = pneg %p6130_p11 }
  0x68   : > { %p5787_p4 = scmp.lt.u32.totalorder %s6124_s30, %s7058_s0  ;;  %p5788_p2 = scmp.lt.u32.totalorder %s5786_s19, %s5781_s17 }
  0x69   : > { %p5784_p0 = pnand %p5783_p12, %p5782_p9  ;;  %p5790_p13 = scmp.lt.u32.totalorder %s5781_s17, %s6124_s30 }
  0x6a   : > { %p5789_p8 = por %p5788_p2, %p5787_p4 }
  0x6b   : > { %p5785_p1 = pneg %p5784_p0 }
  0x6c   : > { %p5791_p6 = por %p5790_p13, %p5789_p8 }
  0x6e   : > { %p5792_p3 = pnand %p5791_p6, %p5785_p1 }
  0x70   : > { %5795 = shalt.err (!%p5792_p3)
}
  0x71   : > { %s5796_s12 = scalar_lea.vmem %s6126_s11, 4096  ;;  %s5910_s10 = smov [#allocation4]  }
  0x72   : > { %p5797_p5 = scmp.ne.s32.totalorder %s6126_s11, %s5796_s12  ;;  %s5801_s13 = sshll.u32 %s5910_s10, 4  ;;  %s5802_s13 = int_to_ptr.vmem [resolvable:$false] %s5801_s13 }
  0x73   : > { %s5803_s15 = scalar_lea.vmem %s5802_s13, 8192  ;;  %p5804_p0 = scmp.lt.s32.totalorder %s6126_s11, %s5802_s13 }
  0x74   : > { %p5799_p7 = pnand %p5797_p5, %p5783_p12  ;;  %p5805_p4 = scmp.lt.s32.totalorder %s5803_s15, %s5796_s12 }
  0x76   : > { %p5800_p9 = pneg %p5799_p7  ;;  %p5806_p2 = por %p5805_p4, %p5804_p0 }
  0x78   : > { %p5807_p8 = pnand %p5806_p2, %p5800_p9 }
  0x7a   : > { %5810 = shalt.err (!%p5807_p8)
}
  0x7b   : > { %s5911_s17 = smov 512   ;;  %s5912_s18 = smov 32  }
  0x7c   : > { %5070 = dma.hbm_to_vmem [thread:$0]  (!%p6130_p11), %s6124_s30, 4096, %s6126_s11, %s6134_s28, %s5911_s17, %s5911_s17, %s5912_s18  }
  0x7d   : > { %p7145_p12 = scmp.ne.s32.totalorder %s7139_s9, 0 }
  0x7f   : > { %287 = sbr.rel (%p7145_p12) target bundleno = 2522 (0x9da), region = 44 }
  0x86   : > { %s6165_s6 = sand.u32 1, %s5885_s22   ;;  %p7146_p1 = scmp.ne.s32.totalorder %s7136_s7, 0 }
  0x87   : > { %s4423_s19 = sshll.u32 %s6165_s6, 8  ;;  %s290_s16 = scalar_lea.sflag [#allocation5], %s6165_s6 }
  0x88   : > { %s6169_s20 = scalar_lea.vmem [#allocation4], %s4423_s19 }
  0x89   : > { %5864 = dma.done.wait (%p7146_p1), %s290_s16, 4096  }
  0x8a   : > { %5866 = vsyncadd (%p7146_p1), %s290_s16, 4294963200  ;;  %p7147_p11 = scmp.ne.s32.totalorder %s7134_s29, 0 }
  0x8c   : > { %5868 = dma.done.wait (%p7147_p11), [#allocation8], 12288  }
  0x8d   : > { %5870 = vsyncadd (%p7147_p11), [#allocation8], 4294955008 }
  0x8e   : > { %5872 = dma.done.wait (%p7147_p11), [#allocation11], 1024  }
  0x8f   : > { %5874 = vsyncadd (%p7147_p11), [#allocation11], 4294966272  ;;  %s4427_s9 = sshll.u32 %s6165_s6, 5  ;;  %p4428_p13 = scmp.ne.s32.totalorder %s5893_s24, 0 }
  0x90   : > { %s6184_s30 = scalar_lea.vmem [#allocation12], %s4427_s9  ;;  %v5913_v0 = vmov (!%p4428_p13), 0   ;;  %v5914_v1 = vmov (!%p4428_p13), 0.0  }
  0x91   : > { %342 = sbr.rel (%p4428_p13) target bundleno = 152 (0x98), region = 64  ;;  %343 = vst [vmem:[#allocation2] sm:$0xff] (!%p4428_p13), %v5913_v0  ;;  %344 = vst [vmem:[#allocation2 + $0x8] sm:$0xff] (!%p4428_p13), %v5913_v0 }
  0x92   : > { %345 = vst [vmem:[#allocation3] sm:$0xff] (!%p4428_p13), %v5914_v1  ;;  %346 = vst [vmem:[#allocation3 + $0x8] sm:$0xff] (!%p4428_p13), %v5914_v1 }
  0x93   : > { %347 = vst [vmem:[#allocation3 + $0x10] sm:$0xff] (!%p4428_p13), %v5914_v1  ;;  %348 = vst [vmem:[#allocation3 + $0x18] sm:$0xff] (!%p4428_p13), %v5914_v1 }
  0x98 PF: > { %v6187_v2 = vld [vmem:[#allocation7 + $0x4] ss:$16 sps:$4 sm:$0xff]   ;;  %v5149_v3 = vld [vmem:[#allocation7] ss:$16 sps:$4 sm:$0xff]   ;;  %v7072_v4 = vmov 0   ;;  %vm5917_vm0 = vmmov 0  }
  0x99   : > { %584 = vmatprep.mubr.bf16.mxu0 %v7072_v4  ;;  %627 = vmatprep.mubr.bf16.mxu1 %v7072_v4  ;;  %v5150_v5 = vld [vmem:[#allocation7 + $0x24] ss:$16 sps:$4 sm:$0xff]   ;;  %v5152_v6 = vld [vmem:[#allocation7 + $0xc] ss:$16 sps:$4 sm:$0xff]   ;;  %v5154_v7 = vld [vmem:[#allocation7 + $0x20] ss:$16 sps:$4 sm:$0xff]  }
  0x9a   : > { %552 = vmatprep.subr.bf16.mxu0 %v6187_v2  ;;  %v5155_v8 = vld [vmem:[#allocation7 + $0x8] ss:$16 sps:$4 sm:$0xff]   ;;  %v5156_v9 = vld [vmem:[#allocation7 + $0x44] ss:$16 sps:$4 sm:$0xff]   ;;  %595 = vmatprep.subr.bf16.mxu1 %v5152_v6  ;;  %v5158_v10 = vld [vmem:[#allocation7 + $0x2c] ss:$16 sps:$4 sm:$0xff]  }
  0x9b   : > { %553 = vmatpush1.bf16.msra.mxu0 %v5149_v3  ;;  %596 = vmatpush1.bf16.msra.mxu1 %v5155_v8  ;;  %v5161_v11 = vld [vmem:[#allocation7 + $0x28] ss:$16 sps:$4 sm:$0xff]   ;;  %v5160_v12 = vld [vmem:[#allocation7 + $0x40] ss:$16 sps:$4 sm:$0xff]   ;;  %v5162_v13 = vld [vmem:[#allocation7 + $0x64] ss:$16 sps:$4 sm:$0xff]  }
  0x9c   : > { %554 = vmatprep.subr.bf16.mxu0 %v5150_v5  ;;  %597 = vmatprep.subr.bf16.mxu1 %v5158_v10  ;;  %v5164_v14 = vld [vmem:[#allocation7 + $0x4c] ss:$16 sps:$4 sm:$0xff]   ;;  %v5167_v15 = vld [vmem:[#allocation7 + $0x48] ss:$16 sps:$4 sm:$0xff]   ;;  %v5166_v16 = vld [vmem:[#allocation7 + $0x60] ss:$16 sps:$4 sm:$0xff]  }
  0x9d   : > { %v5170_v17 = vld [vmem:[#allocation7 + $0x6c] ss:$16 sps:$4 sm:$0xff]   ;;  %v5168_v18 = vld [vmem:[#allocation7 + $0x84] ss:$16 sps:$4 sm:$0xff]   ;;  %v5172_v19 = vld [vmem:[#allocation7 + $0x80] ss:$16 sps:$4 sm:$0xff]  }
  0x9e   : > { %v5173_v20 = vld [vmem:[#allocation7 + $0x68] ss:$16 sps:$4 sm:$0xff]   ;;  %v5176_v21 = vld [vmem:[#allocation7 + $0x8c] ss:$16 sps:$4 sm:$0xff]   ;;  %v5174_v22 = vld [vmem:[#allocation7 + $0xa4] ss:$16 sps:$4 sm:$0xff]  }
  0x9f   : > { %555 = vmatpush1.bf16.msra.mxu0 %v5154_v7  ;;  %598 = vmatpush1.bf16.msra.mxu1 %v5161_v11  ;;  %v5179_v23 = vld [vmem:[#allocation7 + $0x88] ss:$16 sps:$4 sm:$0xff]   ;;  %v6192_v24 = vld [vmem:[#allocation7 + $0xa0] ss:$16 sps:$4 sm:$0xff]   ;;  %v5182_v25 = vld [vmem:[#allocation7 + $0xac] ss:$16 sps:$4 sm:$0xff]  }
  0xa0   : > { %556 = vmatprep.subr.bf16.mxu0 %v5156_v9  ;;  %599 = vmatprep.subr.bf16.mxu1 %v5164_v14  ;;  %v6194_v26 = vld [vmem:[#allocation7 + $0xc4] ss:$16 sps:$4 sm:$0xff]   ;;  %v6196_v27 = vld [vmem:[#allocation7 + $0xc0] ss:$16 sps:$4 sm:$0xff]   ;;  %v5185_v28 = vld [vmem:[#allocation7 + $0xa8] ss:$16 sps:$4 sm:$0xff]  }
  0xa1   : > { %v5188_v29 = vld [vmem:[#allocation7 + $0xcc] ss:$16 sps:$4 sm:$0xff]   ;;  %v6200_v30 = vld [vmem:[#allocation7 + $0xe4] ss:$16 sps:$4 sm:$0xff]   ;;  %v6202_v31 = vld [vmem:[#allocation7 + $0xe0] ss:$16 sps:$4 sm:$0xff]  }
  0xa2   : > { %v5191_v32 = vld [vmem:[#allocation7 + $0xc8] ss:$16 sps:$4 sm:$0xff]   ;;  %v5192_v33 = vld [vmem:[#allocation7 + $0xec] ss:$16 sps:$4 sm:$0xff]   ;;  %v5200_v34 = vld [vmem:[#allocation9 + $0x4] ss:$16 sps:$4 sm:$0xff]  }
  0xa3   : > { %557 = vmatpush1.bf16.msra.mxu0 %v5160_v12  ;;  %600 = vmatpush1.bf16.msra.mxu1 %v5167_v15  ;;  %v359_v35 = vld [vmem:[#allocation2] sm:$0xff]  ;;  %v5194_v36 = vld [vmem:[#allocation7 + $0xe8] ss:$16 sps:$4 sm:$0xff]   ;;  %v5197_v37 = vld [vmem:[#allocation9 + $0xc] ss:$16 sps:$4 sm:$0xff]   ;;  %s4901_s10 = sshll.u32 %s5893_s24, 9 }
  0xa4   : > { %558 = vmatprep.subr.bf16.mxu0 %v5162_v13  ;;  %601 = vmatprep.subr.bf16.mxu1 %v5170_v17  ;;  %v5198_v38 = vld [vmem:[#allocation9] ss:$16 sps:$4 sm:$0xff]   ;;  %v5206_v39 = vld [vmem:[#allocation9 + $0x24] ss:$16 sps:$4 sm:$0xff]   ;;  %v5195_v40 = vld [vmem:[#allocation9 + $0x8] ss:$16 sps:$4 sm:$0xff]  }
  0xa5   : > { %v5203_v41 = vld [vmem:[#allocation9 + $0x2c] ss:$16 sps:$4 sm:$0xff]   ;;  %v5204_v42 = vld [vmem:[#allocation9 + $0x20] ss:$16 sps:$4 sm:$0xff]   ;;  %v5212_v43 = vld [vmem:[#allocation9 + $0x44] ss:$16 sps:$4 sm:$0xff]  }
  0xa6   : > { %v5201_v44 = vld [vmem:[#allocation9 + $0x28] ss:$16 sps:$4 sm:$0xff]   ;;  %v5209_v45 = vld [vmem:[#allocation9 + $0x4c] ss:$16 sps:$4 sm:$0xff]   ;;  %v5210_v46 = vld [vmem:[#allocation9 + $0x40] ss:$16 sps:$4 sm:$0xff]  }
  0xa7   : > { %559 = vmatpush1.bf16.msra.mxu0 %v5166_v16  ;;  %602 = vmatpush1.bf16.msra.mxu1 %v5173_v20  ;;  %v5218_v47 = vld [vmem:[#allocation9 + $0x64] ss:$16 sps:$4 sm:$0xff]   ;;  %v5207_v48 = vld [vmem:[#allocation9 + $0x48] ss:$16 sps:$4 sm:$0xff]   ;;  %v5215_v49 = vld [vmem:[#allocation9 + $0x6c] ss:$16 sps:$4 sm:$0xff]  }
  0xa8   : > { %560 = vmatprep.subr.bf16.mxu0 %v5168_v18  ;;  %603 = vmatprep.subr.bf16.mxu1 %v5176_v21  ;;  %v5216_v50 = vld [vmem:[#allocation9 + $0x60] ss:$16 sps:$4 sm:$0xff]   ;;  %v5224_v51 = vld [vmem:[#allocation9 + $0x84] ss:$16 sps:$4 sm:$0xff]   ;;  %v5213_v52 = vld [vmem:[#allocation9 + $0x68] ss:$16 sps:$4 sm:$0xff]  }
  0xa9   : > { %v5221_v53 = vld [vmem:[#allocation9 + $0x8c] ss:$16 sps:$4 sm:$0xff]   ;;  %v5222_v54 = vld [vmem:[#allocation9 + $0x80] ss:$16 sps:$4 sm:$0xff]   ;;  %v5230_v55 = vld [vmem:[#allocation9 + $0xa4] ss:$16 sps:$4 sm:$0xff]  }
  0xaa   : > { %v5219_v56 = vld [vmem:[#allocation9 + $0x88] ss:$16 sps:$4 sm:$0xff]   ;;  %v5227_v57 = vld [vmem:[#allocation9 + $0xac] ss:$16 sps:$4 sm:$0xff]   ;;  %v5228_v58 = vld [vmem:[#allocation9 + $0xa0] ss:$16 sps:$4 sm:$0xff]  }
  0xab   : > { %561 = vmatpush1.bf16.msra.mxu0 %v5172_v19  ;;  %604 = vmatpush1.bf16.msra.mxu1 %v5179_v23  ;;  %v5225_v59 = vld [vmem:[#allocation9 + $0xa8] ss:$16 sps:$4 sm:$0xff]   ;;  %v6207_v60 = vld [vmem:[#allocation9 + $0xcc] ss:$16 sps:$4 sm:$0xff]   ;;  %v6211_v62 = vld [vmem:[#allocation9 + $0xc4] ss:$16 sps:$4 sm:$0xff]  }
  0xac   : > { %562 = vmatprep.subr.bf16.mxu0 %v5174_v22  ;;  %605 = vmatprep.subr.bf16.mxu1 %v5182_v25  ;;  %v6209_v61 = vld [vmem:[#allocation9 + $0xc8] ss:$16 sps:$4 sm:$0xff]   ;;  %v6214_v63 = vld [vmem:[#allocation9 + $0xc0] ss:$16 sps:$4 sm:$0xff]   ;;  %v6219_v0 = vld [vmem:[#allocation9 + $0xec] ss:$16 sps:$4 sm:$0xff]  }
  0xad   : > { %v6221_v1 = vld [vmem:[#allocation9 + $0xe8] ss:$16 sps:$4 sm:$0xff]   ;;  %v6224_v3 = vld [vmem:[#allocation9 + $0xe4] ss:$16 sps:$4 sm:$0xff]   ;;  %v6226_v5 = vld [vmem:[#allocation9 + $0xe0] ss:$16 sps:$4 sm:$0xff]  }
  0xae   : > { %v6231_v6 = vld [vmem:[#allocation9 + $0x10c] ss:$16 sps:$4 sm:$0xff]   ;;  %v6233_v7 = vld [vmem:[#allocation9 + $0x108] ss:$16 sps:$4 sm:$0xff]   ;;  %v6235_v8 = vld [vmem:[#allocation9 + $0x104] ss:$16 sps:$4 sm:$0xff]  }
  0xaf   : > { %563 = vmatpush1.bf16.msra.mxu0 %v6192_v24  ;;  %606 = vmatpush1.bf16.msra.mxu1 %v5185_v28  ;;  %v6238_v9 = vld [vmem:[#allocation9 + $0x100] ss:$16 sps:$4 sm:$0xff]   ;;  %v6243_v10 = vld [vmem:[#allocation9 + $0x12c] ss:$16 sps:$4 sm:$0xff]   ;;  %v6245_v11 = vld [vmem:[#allocation9 + $0x128] ss:$16 sps:$4 sm:$0xff]  }
  0xb0   : > { %564 = vmatprep.subr.bf16.mxu0 %v6194_v26  ;;  %607 = vmatprep.subr.bf16.mxu1 %v5188_v29  ;;  %v6247_v12 = vld [vmem:[#allocation9 + $0x124] ss:$16 sps:$4 sm:$0xff]   ;;  %v6250_v13 = vld [vmem:[#allocation9 + $0x120] ss:$16 sps:$4 sm:$0xff]   ;;  %v6255_v14 = vld [vmem:[#allocation9 + $0x14c] ss:$16 sps:$4 sm:$0xff]  }
  0xb1   : > { %v6257_v15 = vld [vmem:[#allocation9 + $0x148] ss:$16 sps:$4 sm:$0xff]   ;;  %v6259_v16 = vld [vmem:[#allocation9 + $0x144] ss:$16 sps:$4 sm:$0xff]   ;;  %v6262_v17 = vld [vmem:[#allocation9 + $0x140] ss:$16 sps:$4 sm:$0xff]  }
  0xb2   : > { %v6267_v18 = vld [vmem:[#allocation9 + $0x16c] ss:$16 sps:$4 sm:$0xff]   ;;  %v6269_v19 = vld [vmem:[#allocation9 + $0x168] ss:$16 sps:$4 sm:$0xff]   ;;  %v6271_v20 = vld [vmem:[#allocation9 + $0x164] ss:$16 sps:$4 sm:$0xff]  }
  0xb3   : > { %565 = vmatpush1.bf16.msra.mxu0 %v6196_v27  ;;  %608 = vmatpush1.bf16.msra.mxu1 %v5191_v32  ;;  %v6274_v21 = vld [vmem:[#allocation9 + $0x160] ss:$16 sps:$4 sm:$0xff]   ;;  %v6279_v22 = vld [vmem:[#allocation9 + $0x18c] ss:$16 sps:$4 sm:$0xff]   ;;  %v6281_v23 = vld [vmem:[#allocation9 + $0x188] ss:$16 sps:$4 sm:$0xff]  }
  0xb4   : > { %566 = vmatprep.subr.bf16.mxu0 %v6200_v30  ;;  %609 = vmatprep.subr.bf16.mxu1 %v5192_v33  ;;  %v6283_v25 = vld [vmem:[#allocation9 + $0x184] ss:$16 sps:$4 sm:$0xff]   ;;  %v6286_v28 = vld [vmem:[#allocation9 + $0x180] ss:$16 sps:$4 sm:$0xff]   ;;  %v6291_v29 = vld [vmem:[#allocation9 + $0x1ac] ss:$16 sps:$4 sm:$0xff]  }
  0xb5   : > { %v6293_v32 = vld [vmem:[#allocation9 + $0x1a8] ss:$16 sps:$4 sm:$0xff]   ;;  %v6295_v33 = vld [vmem:[#allocation9 + $0x1a4] ss:$16 sps:$4 sm:$0xff]   ;;  %s4295_s13 = sshll.u32 %s6184_s30, 4  ;;  %s7256_s18 = sld [smem:[#allocation46_spill]]  ;;  %s7008_s13 = int_to_ptr.vmem [resolvable:$true] %s4295_s13 }
  0xb6   : > { %s4279_s24 = scalar_lea.sflag [#allocation6], %s6165_s6  ;;  %s5811_s16 = scalar_lea.vmem %s7008_s13, 512 }
  0xb7   : > { %567 = vmatpush1.bf16.msra.mxu0 %v6202_v31  ;;  %610 = vmatpush1.bf16.msra.mxu1 %v5194_v36  ;;  %v6305_v36 = vld [vmem:[#allocation9 + $0x1c8] ss:$16 sps:$4 sm:$0xff]   ;;  %p5812_p6 = scmp.ne.s32.totalorder %s7008_s13, %s5811_s16 }
  0xb8   : > { %1074 = vmatprep.subr.bf16.mxu0 %v5200_v34  ;;  %1117 = vmatprep.subr.bf16.mxu1 %v5197_v37  ;;  %v6298_v34 = vld [vmem:[#allocation9 + $0x1a0] ss:$16 sps:$4 sm:$0xff]   ;;  %v6307_v37 = vld [vmem:[#allocation9 + $0x1c4] ss:$16 sps:$4 sm:$0xff]  }
  0xb9   : > { %p5813_p3 = pnand %p5812_p6, %p6107_p10 }
  0xba   : > { %585 = vmatmul.mubr.bf16.vlgmr.msra.gmra.mrb[0].mxu0 %v359_v35  ;;  %628 = vmatmul.mubr.bf16.vlgmr.msra.gmra.mrb[0].mxu1 %v359_v35  ;;  %v6303_v35 = vld [vmem:[#allocation9 + $0x1cc] ss:$16 sps:$4 sm:$0xff]  }
  0xbb   : > { %1075 = vmatpush1.bf16.msra.mxu0 %v5198_v38  ;;  %1118 = vmatpush1.bf16.msra.mxu1 %v5195_v40  ;;  %v6310_v38 = vld [vmem:[#allocation9 + $0x1c0] ss:$16 sps:$4 sm:$0xff]   ;;  %v6317_v40 = vld [vmem:[#allocation9 + $0x1e8] ss:$16 sps:$4 sm:$0xff]   ;;  %s7006_s19 = scalar_lea.hbm %s7256_s18, %s4901_s10  ;;  %p5814_p5 = pneg %p5813_p3 }
  0xbc   : > { %1076 = vmatprep.subr.bf16.mxu0 %v5206_v39  ;;  %1119 = vmatprep.subr.bf16.mxu1 %v5203_v41  ;;  %v6315_v39 = vld [vmem:[#allocation9 + $0x1ec] ss:$16 sps:$4 sm:$0xff]   ;;  %7149 = vst [vmem:[#allocation20_spill] sm:$0xff] %v6317_v40  ;;  %v6319_v41 = vld [vmem:[#allocation9 + $0x1e4] ss:$16 sps:$4 sm:$0xff]  }
  0xbd   : > { %7148 = vst [vmem:[#allocation19_spill] sm:$0xff] %v6315_v39  ;;  %7150 = vst [vmem:[#allocation21_spill] sm:$0xff] %v6319_v41 }
  0xbf   : > { %1077 = vmatpush1.bf16.msra.mxu0 %v5204_v42  ;;  %1120 = vmatpush1.bf16.msra.mxu1 %v5201_v44  ;;  %v6322_v42 = vld [vmem:[#allocation9 + $0x1e0] ss:$16 sps:$4 sm:$0xff]  }
  0xc0   : > { %1078 = vmatprep.subr.bf16.mxu0 %v5212_v43  ;;  %1121 = vmatprep.subr.bf16.mxu1 %v5209_v45  ;;  %7151 = vst [vmem:[#allocation22_spill] sm:$0xff] %v6322_v42  ;;  %v689_v43 = vld [vmem:[#allocation2 + $0x8] sm:$0xff]  ;;  %v351_v44 = vld [vmem:[%s6169_s20] sm:$0xff]  ;;  %v352_v45 = vld [vmem:[%s6169_s20 + $0x8] sm:$0xff] }
  0xc1   : > { %1106 = vmatprep.mubr.bf16.mxu0 %v689_v43  ;;  %1149 = vmatprep.mubr.bf16.mxu1 %v689_v43  ;;  %v357_v43 = vld [vmem:[%s6169_s20 + $0x30] sm:$0xff] }
  0xc3   : > { %1079 = vmatpush1.bf16.msra.mxu0 %v5210_v46  ;;  %1122 = vmatpush1.bf16.msra.mxu1 %v5207_v48 }
  0xc4   : > { %1080 = vmatprep.subr.bf16.mxu0 %v5218_v47  ;;  %1123 = vmatprep.subr.bf16.mxu1 %v5215_v49  ;;  %v355_v47 = vld [vmem:[%s6169_s20 + $0x20] sm:$0xff] }
  0xc7   : > { %1081 = vmatpush1.bf16.msra.mxu0 %v5216_v50  ;;  %1124 = vmatpush1.bf16.msra.mxu1 %v5213_v52  ;;  %v356_v50 = vld [vmem:[%s6169_s20 + $0x28] sm:$0xff] }
  0xc8   : > { %1082 = vmatprep.subr.bf16.mxu0 %v5224_v51  ;;  %1125 = vmatprep.subr.bf16.mxu1 %v5221_v53  ;;  %v353_v53 = vld [vmem:[%s6169_s20 + $0x10] sm:$0xff] }
  0xcb   : > { %1083 = vmatpush1.bf16.msra.mxu0 %v5222_v54  ;;  %1126 = vmatpush1.bf16.msra.mxu1 %v5219_v56 }
  0xcc   : > { %1084 = vmatprep.subr.bf16.mxu0 %v5230_v55  ;;  %1127 = vmatprep.subr.bf16.mxu1 %v5227_v57 }
  0xcf   : > { %1085 = vmatpush1.bf16.msra.mxu0 %v5228_v58  ;;  %1128 = vmatpush1.bf16.msra.mxu1 %v5225_v59 }
  0xd0   : > { %1129 = vmatprep.subr.bf16.mxu1 %v6207_v60  ;;  %1086 = vmatprep.subr.bf16.mxu0 %v6211_v62 }
  0xd3   : > { %1130 = vmatpush1.bf16.msra.mxu1 %v6209_v61  ;;  %1087 = vmatpush1.bf16.msra.mxu0 %v6214_v63 }
  0xd4   : > { %1131 = vmatprep.subr.bf16.mxu1 %v6219_v0  ;;  %1088 = vmatprep.subr.bf16.mxu0 %v6224_v3 }
  0xd7   : > { %1132 = vmatpush1.bf16.msra.mxu1 %v6221_v1  ;;  %1089 = vmatpush1.bf16.msra.mxu0 %v6226_v5 }
  0xd8   : > { %1133 = vmatprep.subr.bf16.mxu1 %v6231_v6  ;;  %1090 = vmatprep.subr.bf16.mxu0 %v6235_v8 }
  0xdb   : > { %1134 = vmatpush1.bf16.msra.mxu1 %v6233_v7  ;;  %1091 = vmatpush1.bf16.msra.mxu0 %v6238_v9 }
  0xdc   : > { %1135 = vmatprep.subr.bf16.mxu1 %v6243_v10  ;;  %1092 = vmatprep.subr.bf16.mxu0 %v6247_v12 }
  0xdf   : > { %1136 = vmatpush1.bf16.msra.mxu1 %v6245_v11  ;;  %1093 = vmatpush1.bf16.msra.mxu0 %v6250_v13 }
  0xe0   : > { %1137 = vmatprep.subr.bf16.mxu1 %v6255_v14  ;;  %1094 = vmatprep.subr.bf16.mxu0 %v6259_v16 }
  0xe3   : > { %1138 = vmatpush1.bf16.msra.mxu1 %v6257_v15  ;;  %1095 = vmatpush1.bf16.msra.mxu0 %v6262_v17 }
  0xe4   : > { %1139 = vmatprep.subr.bf16.mxu1 %v6267_v18  ;;  %1096 = vmatprep.subr.bf16.mxu0 %v6271_v20 }
  0xe7   : > { %1140 = vmatpush1.bf16.msra.mxu1 %v6269_v19  ;;  %1097 = vmatpush1.bf16.msra.mxu0 %v6274_v21 }
  0xe8   : > { %1141 = vmatprep.subr.bf16.mxu1 %v6279_v22  ;;  %1098 = vmatprep.subr.bf16.mxu0 %v6283_v25 }
  0xeb   : > { %1142 = vmatpush1.bf16.msra.mxu1 %v6281_v23  ;;  %1099 = vmatpush1.bf16.msra.mxu0 %v6286_v28 }
  0xec   : > { %1143 = vmatprep.subr.bf16.mxu1 %v6291_v29  ;;  %1100 = vmatprep.subr.bf16.mxu0 %v6295_v33 }
  0xef   : > { %1144 = vmatpush1.bf16.msra.mxu1 %v6293_v32  ;;  %1101 = vmatpush1.bf16.msra.mxu0 %v6298_v34 }
  0xf0   : > { %1145 = vmatprep.subr.bf16.mxu1 %v6303_v35  ;;  %1102 = vmatprep.subr.bf16.mxu0 %v6307_v37 }
  0xf3   : > { %1146 = vmatpush1.bf16.msra.mxu1 %v6305_v36  ;;  %1103 = vmatpush1.bf16.msra.mxu0 %v6310_v38 }
  0xf4   : > { %1147 = vmatprep.subr.bf16.mxu1 %v6315_v39  ;;  %1104 = vmatprep.subr.bf16.mxu0 %v6319_v41 }
  0xf7   : > { %1148 = vmatpush1.bf16.msra.mxu1 %v6317_v40  ;;  %1105 = vmatpush1.bf16.msra.mxu0 %v6322_v42 }
  0xf8   : > { %1555 = vmatprep.subr.bf16.mxu1 %v6187_v2 }
 0x18d   : > { %v586_v46 = vpop.f32.mrb[0].mxu0  ;;  %v629_v57 = vpop.f32.mrb[0].mxu1 }
 0x18e   : > { %v638_v48 = vadd.f32 %v586_v46, %v351_v44  ;;  %v588_v49 = vpop.f32.mrb[1].mxu0  ;;  %v631_v2 = vpop.f32.mrb[1].mxu1  ;;  %v640_v42 = vadd.f32 %v629_v57, %v353_v53 }
 0x18f   : > { %v639_v51 = vadd.f32 %v588_v49, %v352_v45  ;;  %v590_v52 = vpop.f32.mrb[2].mxu0  ;;  %v633_v40 = vpop.f32.mrb[2].mxu1  ;;  %v354_v45 = vld [vmem:[%s6169_s20 + $0x18] sm:$0xff] }
 0x190   : > { %v648_v54 = vmul.f32 0.5, %v638_v48  ;;  %v642_v55 = vadd.f32 %v590_v52, %v355_v47  ;;  %v592_v56 = vpop.f32.mrb[3].mxu0  ;;  %v635_v46 = vpop.f32.mrb[3].mxu1  ;;  %v644_v49 = vadd.f32 %v633_v40, %v357_v43  ;;  %v358_v48 = vld [vmem:[%s6169_s20 + $0x38] sm:$0xff]  ;;  %v641_v47 = vadd.f32 %v631_v2, %v354_v45  ;;  %v647_v2 = vld [vmem:[#allocation3 + $0x8] sm:$0xff] }
 0x191   : > { %v656_v58 = vmul.f32 0.5, %v639_v51  ;;  %v643_v59 = vadd.f32 %v592_v56, %v356_v50  ;;  %v645_v52 = vadd.f32 %v635_v46, %v358_v48 }
 0x192   : > { %5524 = vtanh.f32 %v648_v54  ;;  %v649_v4 = vmul.f32 0.5, %v642_v55  ;;  %v666_v51 = vmul.f32 0.5, %v641_v47 }
 0x193   : > { %5526 = vtanh.f32 %v656_v58  ;;  %v657_v44 = vmul.f32 0.5, %v643_v59  ;;  %v667_v56 = vmul.f32 0.5, %v645_v52  ;;  %v646_v59 = vld [vmem:[#allocation3] sm:$0xff] }
 0x194   : > { %5528 = vtanh.f32 %v649_v4 }
 0x195   : > { %5530 = vtanh.f32 %v657_v44 }
 0x196   : > { %5532 = vtanh.f32 %v640_v42 }
 0x197   : > { %5534 = vtanh.f32 %v644_v49 }
 0x198   : > { %5536 = vtanh.f32 %v666_v51 }
 0x199   : > { %5538 = vtanh.f32 %v667_v56 }
 0x19c   : > { %v5525_v50 = vpop.eup %5524 }
 0x19d   : > { %v5527_v41 = vpop.eup %5526  ;;  %v652_v54 = vmul.f32 0.5, %v5525_v50 }
 0x19e   : > { %v5529_v55 = vpop.eup %5528  ;;  %v660_v53 = vmul.f32 0.5, %v5527_v41 }
 0x19f   : > { %v5531_v57 = vpop.eup %5530  ;;  %v654_v58 = vadd.f32 0.5, %v652_v54  ;;  %v653_v39 = vmul.f32 0.5, %v5529_v55 }
 0x1a0   : > { %v5533_v4 = vpop.eup %5532  ;;  %v662_v40 = vadd.f32 0.5, %v660_v53  ;;  %v661_v43 = vmul.f32 0.5, %v5531_v57 }
 0x1a1   : > { %v655_v42 = vadd.f32 0.5, %v653_v39  ;;  %v676_v44 = vmul.f32 %v5533_v4, %v654_v58  ;;  %v5535_v46 = vpop.eup %5534 }
 0x1a2   : > { %v674_v45 = vmul.f32 %v662_v40, %v646_v59  ;;  %v663_v49 = vadd.f32 0.5, %v661_v43  ;;  %v5537_v51 = vpop.eup %5536  ;;  %v5684_v40 = vld [vmem:[#allocation7] ss:$16 sps:$4 sm:$0xff]   ;;  %v7152_v43 = vmov 0  }
 0x1a3   : > { %v677_v48 = vmul.f32 %v5535_v46, %v655_v42  ;;  %v5539_v50 = vpop.eup %5538  ;;  %v670_v54 = vmul.f32 0.5, %v5537_v51  ;;  %v5685_v42 = vld [vmem:[#allocation7 + $0x24] ss:$16 sps:$4 sm:$0xff]   ;;  %v5688_v46 = vld [vmem:[#allocation7 + $0x40] ss:$16 sps:$4 sm:$0xff]  }
 0x1a4   : > { %v675_v47 = vmul.f32 %v663_v49, %v647_v2  ;;  %v6336_v52 = vadd.f32 %v676_v44, %v674_v45  ;;  %v671_v56 = vmul.f32 0.5, %v5539_v50  ;;  %v5686_v2 = vld [vmem:[#allocation7 + $0x20] ss:$16 sps:$4 sm:$0xff]   ;;  %v5687_v44 = vld [vmem:[#allocation7 + $0x44] ss:$16 sps:$4 sm:$0xff]  }
 0x1a5   : > { %v672_v55 = vadd.f32 0.5, %v670_v54  ;;  %v5689_v45 = vld [vmem:[#allocation7 + $0x64] ss:$16 sps:$4 sm:$0xff]   ;;  %v5690_v49 = vld [vmem:[#allocation7 + $0x60] ss:$16 sps:$4 sm:$0xff]   ;;  %v7078_v54 = vmov 0.0  }
 0x1a6   : > { %5540 = vtanh.f32 %v6336_v52  ;;  %v6339_v41 = vadd.f32 %v677_v48, %v675_v47  ;;  %v673_v53 = vadd.f32 0.5, %v671_v56  ;;  %v5691_v48 = vld [vmem:[#allocation7 + $0x84] ss:$16 sps:$4 sm:$0xff]   ;;  %v5692_v47 = vld [vmem:[#allocation7 + $0x80] ss:$16 sps:$4 sm:$0xff]   ;;  %4961 = vmatprep.subr.bf16.mxu0 %v7078_v54  ;;  %v5292_v56 = vld [vmem:[#allocation10 + $0x8] sm:$0xff]  }
 0x1a7   : > { %v5693_v51 = vld [vmem:[#allocation7 + $0xa4] ss:$16 sps:$4 sm:$0xff]  }
 0x1a8   : > { %5542 = vtanh.f32 %v6339_v41  ;;  %v5291_v50 = vld [vmem:[#allocation10] sm:$0xff]  }
 0x1b0   : > { %v5541_v39 = vpop.eup %5540 }
 0x1b1   : > { %v682_v58 = vmul.f32 %v5541_v39, %v672_v55  ;;  %v5298_v39 = vld [vmem:[#allocation10 + $0x38] sm:$0xff]  }
 0x1b2   : > { %v5543_v57 = vpop.eup %5542  ;;  %v6361_v55 = vld [vmem:[#allocation7 + $0xc] ss:$16 sps:$4 sm:$0xff]  }
 0x1b3   : > { %v683_v59 = vmul.f32 %v5543_v57, %v673_v53  ;;  %v1161_v53 = vlaneseq }
 0x1b5   : > { %v6342_v4 = vpack.c.bf16 %v683_v59, %v682_v58  ;;  %v1162_v57 = vshrl.u32 %v1161_v53, 7  ;;  %v349_v59 = vld [vmem:[%s7061_s3] sm:$0xf] }
 0x1b7   : > { %1107 = vmatmul.mubr.bf16.vlgmr.msra.gmra.mrb[4].mxu0 %v6342_v4  ;;  %1150 = vmatmul.mubr.bf16.vlgmr.msra.gmra.mrb[4].mxu1 %v6342_v4  ;;  %v1163_v58 = vsub.s32 0, %v1162_v57  ;;  %v1175_v53 = vsub.s32 3, %v1162_v57 }
 0x1b8   : > { %1556 = vmatpush1.bf16.msra.mxu1 %v5684_v40  ;;  %1587 = vmatprep.mubr.bf16.mxu1 %v7152_v43  ;;  %v1167_v40 = vsub.s32 1, %v1162_v57 }
 0x1b9   : > { %1557 = vmatprep.subr.bf16.mxu1 %v5685_v42  ;;  %4962 = vmatpush3.bf16.msra.mxu0 %v5291_v50  ;;  %v6369_v42 = vrot.slane %v349_v59, %v1163_v58 }
 0x1ba   : > { %4963 = vmatprep.subr.bf16.mxu0 %v7078_v54  ;;  %4977 = vmatprep.mubr.msk.bf16.mxu0 %vm5917_vm0, %v7078_v54 }
 0x1bc   : > { %1558 = vmatpush1.bf16.msra.mxu1 %v5686_v2  ;;  %v1171_v2 = vsub.s32 2, %v1162_v57 }
 0x1bd   : > { %1559 = vmatprep.subr.bf16.mxu1 %v5687_v44  ;;  %4964 = vmatpush3.bf16.msra.mxu0 %v5292_v56  ;;  %v6371_v44 = vrot.slane %v349_v59, %v1167_v40 }
 0x1be   : > { %4965 = vmatprep.subr.bf16.mxu0 %v7078_v54 }
 0x1bf   : > { %7153 = vst [vmem:[#allocation23_spill] sm:$0xff] %v6371_v44 }
 0x1c0   : > { %1560 = vmatpush1.bf16.msra.mxu1 %v5688_v46 }
 0x1c1   : > { %1561 = vmatprep.subr.bf16.mxu1 %v5689_v45 }
 0x1c4   : > { %1562 = vmatpush1.bf16.msra.mxu1 %v5690_v49 }
 0x1c5   : > { %1563 = vmatprep.subr.bf16.mxu1 %v5691_v48  ;;  %v6374_v48 = vrot.slane %v349_v59, %v1171_v2 }
 0x1c7   : > { %7154 = vst [vmem:[#allocation24_spill] sm:$0xff] %v6374_v48 }
 0x1c8   : > { %1564 = vmatpush1.bf16.msra.mxu1 %v5692_v47 }
 0x1c9   : > { %1565 = vmatprep.subr.bf16.mxu1 %v5693_v51 }
 0x1cc   : > { %1566 = vmatpush1.bf16.msra.mxu1 %v6192_v24  ;;  %v5293_v24 = vld [vmem:[#allocation10 + $0x10] sm:$0xff]  }
 0x1cd   : > { %1567 = vmatprep.subr.bf16.mxu1 %v6194_v26  ;;  %4966 = vmatpush3.bf16.msra.mxu0 %v5293_v24  ;;  %v5294_v26 = vld [vmem:[#allocation10 + $0x18] sm:$0xff]  }
 0x1ce   : > { %4967 = vmatprep.subr.bf16.mxu0 %v7078_v54 }
 0x1d0   : > { %1568 = vmatpush1.bf16.msra.mxu1 %v6196_v27  ;;  %v5295_v27 = vld [vmem:[#allocation10 + $0x20] sm:$0xff]  }
 0x1d1   : > { %1569 = vmatprep.subr.bf16.mxu1 %v6200_v30  ;;  %4968 = vmatpush3.bf16.msra.mxu0 %v5294_v26  ;;  %v5296_v30 = vld [vmem:[#allocation10 + $0x28] sm:$0xff]  }
 0x1d2   : > { %4969 = vmatprep.subr.bf16.mxu0 %v7078_v54 }
 0x1d4   : > { %1570 = vmatpush1.bf16.msra.mxu1 %v6202_v31  ;;  %v5297_v31 = vld [vmem:[#allocation10 + $0x30] sm:$0xff]  }
 0x1d5   : > { %4970 = vmatpush3.bf16.msra.mxu0 %v5295_v27 }
 0x1d6   : > { %4971 = vmatprep.subr.bf16.mxu0 %v7078_v54 }
 0x1d7   : > { %1588 = vmatmul.mubr.bf16.vlgmr.msra.gmra.mrb[8].mxu1 %v6342_v4 }
 0x1d9   : > { %4972 = vmatpush3.bf16.msra.mxu0 %v5296_v30 }
 0x1da   : > { %4973 = vmatprep.subr.bf16.mxu0 %v7078_v54 }
 0x1dd   : > { %4974 = vmatpush3.bf16.msra.mxu0 %v5297_v31 }
 0x1de   : > { %4975 = vmatprep.subr.bf16.mxu0 %v7078_v54  ;;  %v6380_v54 = vrot.slane %v349_v59, %v1175_v53  ;;  %v1190_v59 = vld [vmem:[#allocation3 + $0x10] sm:$0xff] }
 0x1e0   : > { %7155 = vst [vmem:[#allocation25_spill] sm:$0xff] %v6380_v54 }
 0x1e1   : > { %4976 = vmatpush3.bf16.msra.mxu0 %v5298_v39 }
 0x1e2   : > { %1598 = vmatprep.subr.bf16.mxu0 %v6361_v55 }
 0x28a   : > { %v1108_v46 = vpop.f32.mrb[4].mxu0  ;;  %v1151_v45 = vpop.f32.mrb[4].mxu1 }
 0x28b   : > { %v1181_v49 = vadd.f32 %v6369_v42, %v1108_v46  ;;  %v1110_v47 = vpop.f32.mrb[5].mxu0  ;;  %v1153_v51 = vpop.f32.mrb[5].mxu1  ;;  %v1183_v40 = vadd.f32 %v6374_v48, %v1151_v45 }
 0x28c   : > { %v1182_v50 = vadd.f32 %v6371_v44, %v1110_v47  ;;  %v1112_v56 = vpop.f32.mrb[6].mxu0  ;;  %v1155_v24 = vpop.f32.mrb[6].mxu1 }
 0x28d   : > { %v1192_v26 = vmul.f32 0.5, %v1181_v49  ;;  %v1185_v27 = vadd.f32 %v6369_v42, %v1112_v56  ;;  %v1114_v30 = vpop.f32.mrb[7].mxu0  ;;  %v1157_v31 = vpop.f32.mrb[7].mxu1  ;;  %v1187_v47 = vadd.f32 %v6374_v48, %v1155_v24  ;;  %v1184_v49 = vadd.f32 %v6380_v54, %v1153_v51 }
 0x28e   : > { %v1200_v39 = vmul.f32 0.5, %v1182_v50  ;;  %v1186_v58 = vadd.f32 %v6371_v44, %v1114_v30  ;;  %v1188_v57 = vadd.f32 %v6380_v54, %v1157_v31  ;;  %v1191_v54 = vld [vmem:[#allocation3 + $0x18] sm:$0xff] }
 0x28f   : > { %5544 = vtanh.f32 %v1192_v26  ;;  %v1193_v2 = vmul.f32 0.5, %v1185_v27  ;;  %v1210_v30 = vmul.f32 0.5, %v1184_v49 }
 0x290   : > { %5546 = vtanh.f32 %v1200_v39  ;;  %v1201_v46 = vmul.f32 0.5, %v1186_v58  ;;  %v1211_v27 = vmul.f32 0.5, %v1188_v57 }
 0x291   : > { %5548 = vtanh.f32 %v1193_v2 }
 0x292   : > { %5550 = vtanh.f32 %v1183_v40 }
 0x293   : > { %5552 = vtanh.f32 %v1201_v46 }
 0x294   : > { %5554 = vtanh.f32 %v1187_v47 }
 0x295   : > { %5556 = vtanh.f32 %v1210_v30 }
 0x296   : > { %5558 = vtanh.f32 %v1211_v27 }
 0x299   : > { %v5545_v50 = vpop.eup %5544 }
 0x29a   : > { %v5547_v56 = vpop.eup %5546  ;;  %v1196_v26 = vmul.f32 0.5, %v5545_v50 }
 0x29b   : > { %v1204_v45 = vmul.f32 0.5, %v5547_v56  ;;  %v5549_v39 = vpop.eup %5548 }
 0x29c   : > { %v1198_v58 = vadd.f32 0.5, %v1196_v26  ;;  %v5551_v53 = vpop.eup %5550  ;;  %v1197_v44 = vmul.f32 0.5, %v5549_v39 }
 0x29d   : > { %v1206_v2 = vadd.f32 0.5, %v1204_v45  ;;  %v5553_v24 = vpop.eup %5552 }
 0x29e   : > { %v1220_v40 = vmul.f32 %v5551_v53, %v1198_v58  ;;  %v1199_v51 = vadd.f32 0.5, %v1197_v44  ;;  %v1205_v47 = vmul.f32 0.5, %v5553_v24  ;;  %v5555_v31 = vpop.eup %5554 }
 0x29f   : > { %v1218_v46 = vmul.f32 %v1206_v2, %v1190_v59  ;;  %v5557_v26 = vpop.eup %5556 }
 0x2a0   : > { %v1207_v49 = vadd.f32 0.5, %v1205_v47  ;;  %v1221_v50 = vmul.f32 %v5555_v31, %v1199_v51  ;;  %v5559_v45 = vpop.eup %5558  ;;  %v1214_v27 = vmul.f32 0.5, %v5557_v26  ;;  %v6399_v51 = vld [vmem:[#allocation7 + $0x8] ss:$16 sps:$4 sm:$0xff]   ;;  %v6401_v31 = vld [vmem:[#allocation7 + $0x2c] ss:$16 sps:$4 sm:$0xff]  }
 0x2a1   : > { %v6385_v48 = vadd.f32 %v1220_v40, %v1218_v46  ;;  %v1215_v39 = vmul.f32 0.5, %v5559_v45  ;;  %7156 = vst [vmem:[#allocation26_spill] sm:$0xff] %v6401_v31  ;;  %v6414_v26 = vld [vmem:[#allocation7 + $0x6c] ss:$16 sps:$4 sm:$0xff]   ;;  %v6417_v45 = vld [vmem:[#allocation7 + $0x68] ss:$16 sps:$4 sm:$0xff]  }
 0x2a2   : > { %v1219_v57 = vmul.f32 %v1207_v49, %v1191_v54  ;;  %v1216_v54 = vadd.f32 0.5, %v1214_v27  ;;  %v6404_v49 = vld [vmem:[#allocation7 + $0x28] ss:$16 sps:$4 sm:$0xff]   ;;  %7160 = vst [vmem:[#allocation30_spill] sm:$0xff] %v6414_v26  ;;  %7161 = vst [vmem:[#allocation31_spill] sm:$0xff] %v6417_v45 }
 0x2a3   : > { %5560 = vtanh.f32 %v6385_v48  ;;  %v1217_v2 = vadd.f32 0.5, %v1215_v39  ;;  %7157 = vst [vmem:[#allocation27_spill] sm:$0xff] %v6404_v49  ;;  %v6420_v27 = vld [vmem:[#allocation7 + $0x8c] ss:$16 sps:$4 sm:$0xff]   ;;  %v6423_v39 = vld [vmem:[#allocation7 + $0x88] ss:$16 sps:$4 sm:$0xff]  }
 0x2a4   : > { %v6388_v56 = vadd.f32 %v1221_v50, %v1219_v57  ;;  %v6408_v50 = vld [vmem:[#allocation7 + $0x4c] ss:$16 sps:$4 sm:$0xff]   ;;  %v6411_v57 = vld [vmem:[#allocation7 + $0x48] ss:$16 sps:$4 sm:$0xff]   ;;  %7162 = vst [vmem:[#allocation32_spill] sm:$0xff] %v6420_v27  ;;  %7163 = vst [vmem:[#allocation33_spill] sm:$0xff] %v6423_v39 }
 0x2a5   : > { %7158 = vst [vmem:[#allocation28_spill] sm:$0xff] %v6408_v50  ;;  %7159 = vst [vmem:[#allocation29_spill] sm:$0xff] %v6411_v57 }
 0x2a6   : > { %5562 = vtanh.f32 %v6388_v56 }
 0x2aa   : > { %v6391_v30 = vpop.f32.mrb[8].mxu1 }
 0x2ab   : > { %v6393_v44 = vpop.f32.mrb[9].mxu1 }
 0x2ac   : > { %v6395_v58 = vpop.f32.mrb[10].mxu1 }
 0x2ad   : > { %v6397_v59 = vpop.f32.mrb[11].mxu1  ;;  %v5561_v53 = vpop.eup %5560 }
 0x2ae   : > { %v1226_v40 = vmul.f32 %v5561_v53, %v1216_v54  ;;  %v6426_v53 = vld [vmem:[#allocation7 + $0xac] ss:$16 sps:$4 sm:$0xff]   ;;  %v6429_v54 = vld [vmem:[#allocation7 + $0xa8] ss:$16 sps:$4 sm:$0xff]  }
 0x2af   : > { %7164 = vst [vmem:[#allocation34_spill] sm:$0xff] %v6426_v53  ;;  %7165 = vst [vmem:[#allocation35_spill] sm:$0xff] %v6429_v54 }
 0x2b0   : > { %v5563_v24 = vpop.eup %5562 }
 0x2b1   : > { %v1227_v46 = vmul.f32 %v5563_v24, %v1217_v2  ;;  %v6432_v2 = vld [vmem:[#allocation7 + $0xcc] ss:$16 sps:$4 sm:$0xff]   ;;  %v6435_v24 = vld [vmem:[#allocation7 + $0xc8] ss:$16 sps:$4 sm:$0xff]  }
 0x2b2   : > { %7166 = vst [vmem:[#allocation36_spill] sm:$0xff] %v6432_v2  ;;  %7167 = vst [vmem:[#allocation37_spill] sm:$0xff] %v6435_v24 }
 0x2b3   : > { %v1228_v47 = vpack.c.bf16 %v1227_v46, %v1226_v40  ;;  %v5694_v40 = vld [vmem:[#allocation7 + $0xec] ss:$16 sps:$4 sm:$0xff]   ;;  %v5695_v46 = vld [vmem:[#allocation7 + $0xe8] ss:$16 sps:$4 sm:$0xff]  }
 0x2b5   : > { %4978 = vmatmul.mubr.bf16.vlgmr.msra.gmra.mrb[8].mxu0 %v1228_v47  ;;  %2108 = vmatprep.mubr.bf16.mxu1 %v1228_v47 }
 0x2b6   : > { %1599 = vmatpush1.bf16.msra.mxu0 %v6399_v51  ;;  %1630 = vmatprep.mubr.bf16.mxu0 %v7152_v43 }
 0x2b7   : > { %1600 = vmatprep.subr.bf16.mxu0 %v6401_v31  ;;  %v6503_v31 = vld [vmem:[#allocation9 + $0xa8] ss:$16 sps:$4 sm:$0xff]  }
 0x2ba   : > { %1601 = vmatpush1.bf16.msra.mxu0 %v6404_v49  ;;  %v6497_v49 = vld [vmem:[#allocation9 + $0xac] ss:$16 sps:$4 sm:$0xff]  }
 0x2bb   : > { %1602 = vmatprep.subr.bf16.mxu0 %v6408_v50  ;;  %v6491_v50 = vld [vmem:[#allocation9 + $0x88] ss:$16 sps:$4 sm:$0xff]  }
 0x2be   : > { %1603 = vmatpush1.bf16.msra.mxu0 %v6411_v57  ;;  %v6485_v57 = vld [vmem:[#allocation9 + $0x8c] ss:$16 sps:$4 sm:$0xff]  }
 0x2bf   : > { %1604 = vmatprep.subr.bf16.mxu0 %v6414_v26  ;;  %v6479_v26 = vld [vmem:[#allocation9 + $0x68] ss:$16 sps:$4 sm:$0xff]  }
 0x2c0   : > { %7175 = vst [vmem:[#allocation45_spill] sm:$0xff] %v6479_v26 }
 0x2c2   : > { %1605 = vmatpush1.bf16.msra.mxu0 %v6417_v45  ;;  %v6473_v45 = vld [vmem:[#allocation9 + $0x6c] ss:$16 sps:$4 sm:$0xff]  }
 0x2c3   : > { %1606 = vmatprep.subr.bf16.mxu0 %v6420_v27  ;;  %v6444_v27 = vld [vmem:[#allocation9 + $0x4] ss:$16 sps:$4 sm:$0xff]   ;;  %7174 = vst [vmem:[#allocation44_spill] sm:$0xff] %v6473_v45 }
 0x2c4   : > { %2076 = vmatprep.subr.bf16.mxu1 %v6444_v27 }
 0x2c6   : > { %1607 = vmatpush1.bf16.msra.mxu0 %v6423_v39  ;;  %v6440_v39 = vld [vmem:[#allocation9 + $0x8] ss:$16 sps:$4 sm:$0xff]  }
 0x2c7   : > { %1608 = vmatprep.subr.bf16.mxu0 %v6426_v53  ;;  %7168 = vst [vmem:[#allocation38_spill] sm:$0xff] %v6440_v39  ;;  %v6442_v53 = vld [vmem:[#allocation9 + $0xc] ss:$16 sps:$4 sm:$0xff]  }
 0x2c8   : > { %7169 = vst [vmem:[#allocation39_spill] sm:$0xff] %v6442_v53 }
 0x2ca   : > { %1609 = vmatpush1.bf16.msra.mxu0 %v6429_v54  ;;  %v6447_v54 = vld [vmem:[#allocation9] ss:$16 sps:$4 sm:$0xff]  }
 0x2cb   : > { %1610 = vmatprep.subr.bf16.mxu0 %v6432_v2  ;;  %2077 = vmatpush1.bf16.msra.mxu1 %v6447_v54  ;;  %v6471_v2 = vld [vmem:[#allocation9 + $0x40] ss:$16 sps:$4 sm:$0xff]  }
 0x2ce   : > { %1611 = vmatpush1.bf16.msra.mxu0 %v6435_v24  ;;  %v6461_v24 = vld [vmem:[#allocation9 + $0x4c] ss:$16 sps:$4 sm:$0xff]  }
 0x2cf   : > { %1612 = vmatprep.subr.bf16.mxu0 %v5694_v40  ;;  %v6452_v40 = vld [vmem:[#allocation9 + $0x2c] ss:$16 sps:$4 sm:$0xff]   ;;  %7172 = vst [vmem:[#allocation42_spill] sm:$0xff] %v6461_v24 }
 0x2d0   : > { %7170 = vst [vmem:[#allocation40_spill] sm:$0xff] %v6452_v40 }
 0x2d2   : > { %1613 = vmatpush1.bf16.msra.mxu0 %v5695_v46  ;;  %v6459_v46 = vld [vmem:[#allocation9 + $0x20] ss:$16 sps:$4 sm:$0xff]  }
 0x2d3   : > { %2119 = vmatprep.subr.bf16.mxu0 %v6442_v53  ;;  %v6465_v53 = vld [vmem:[#allocation9 + $0x48] ss:$16 sps:$4 sm:$0xff]  }
 0x2d4   : > { %7173 = vst [vmem:[#allocation43_spill] sm:$0xff] %v6465_v53 }
 0x2d5   : > { %1631 = vmatmul.mubr.bf16.vlgmr.msra.gmra.mrb[12].mxu0 %v6342_v4  ;;  %v6454_v4 = vld [vmem:[#allocation9 + $0x28] ss:$16 sps:$4 sm:$0xff]  }
 0x2d6   : > { %2151 = vmatprep.mubr.bf16.mxu0 %v1228_v47  ;;  %2120 = vmatpush1.bf16.msra.mxu0 %v6440_v39  ;;  %7171 = vst [vmem:[#allocation41_spill] sm:$0xff] %v6454_v4  ;;  %v6456_v47 = vld [vmem:[#allocation9 + $0x24] ss:$16 sps:$4 sm:$0xff]  }
 0x2d7   : > { %2121 = vmatprep.subr.bf16.mxu0 %v6452_v40  ;;  %2078 = vmatprep.subr.bf16.mxu1 %v6456_v47  ;;  %v6467_v39 = vld [vmem:[#allocation9 + $0x44] ss:$16 sps:$4 sm:$0xff]  }
 0x2d8   : > { %2079 = vmatpush1.bf16.msra.mxu1 %v6459_v46  ;;  %v6476_v40 = vld [vmem:[#allocation9 + $0x64] ss:$16 sps:$4 sm:$0xff]  }
 0x2d9   : > { %2080 = vmatprep.subr.bf16.mxu1 %v6467_v39 }
 0x2da   : > { %2122 = vmatpush1.bf16.msra.mxu0 %v6454_v4  ;;  %v6483_v4 = vld [vmem:[#allocation9 + $0x60] ss:$16 sps:$4 sm:$0xff]  }
 0x2db   : > { %2123 = vmatprep.subr.bf16.mxu0 %v6461_v24  ;;  %v6488_v24 = vld [vmem:[#allocation9 + $0x84] ss:$16 sps:$4 sm:$0xff]  }
 0x2dc   : > { %2081 = vmatpush1.bf16.msra.mxu1 %v6471_v2 }
 0x2dd   : > { %2082 = vmatprep.subr.bf16.mxu1 %v6476_v40 }
 0x2de   : > { %2124 = vmatpush1.bf16.msra.mxu0 %v6465_v53  ;;  %v6495_v53 = vld [vmem:[#allocation9 + $0x80] ss:$16 sps:$4 sm:$0xff]  }
 0x2df   : > { %2125 = vmatprep.subr.bf16.mxu0 %v6473_v45  ;;  %v6500_v45 = vld [vmem:[#allocation9 + $0xa4] ss:$16 sps:$4 sm:$0xff]  }
 0x2e0   : > { %2083 = vmatpush1.bf16.msra.mxu1 %v6483_v4 }
 0x2e1   : > { %2084 = vmatprep.subr.bf16.mxu1 %v6488_v24 }
 0x2e2   : > { %2126 = vmatpush1.bf16.msra.mxu0 %v6479_v26  ;;  %v6507_v26 = vld [vmem:[#allocation9 + $0xa0] ss:$16 sps:$4 sm:$0xff]  }
 0x2e3   : > { %2127 = vmatprep.subr.bf16.mxu0 %v6485_v57 }
 0x2e4   : > { %2085 = vmatpush1.bf16.msra.mxu1 %v6495_v53 }
 0x2e5   : > { %2086 = vmatprep.subr.bf16.mxu1 %v6500_v45 }
 0x2e6   : > { %2128 = vmatpush1.bf16.msra.mxu0 %v6491_v50 }
 0x2e7   : > { %2129 = vmatprep.subr.bf16.mxu0 %v6497_v49 }
 0x2e8   : > { %2087 = vmatpush1.bf16.msra.mxu1 %v6507_v26 }
 0x2e9   : > { %2088 = vmatprep.subr.bf16.mxu1 %v6211_v62  ;;  %v6550_v62 = vld [vmem:[#allocation7 + $0x4] ss:$16 sps:$4 sm:$0xff]  }
 0x2ea   : > { %2130 = vmatpush1.bf16.msra.mxu0 %v6503_v31 }
 0x2eb   : > { %2131 = vmatprep.subr.bf16.mxu0 %v6207_v60  ;;  %v7176_v60 = vld [vmem:[#allocation19_spill] sm:$0xff] }
 0x2ec   : > { %2089 = vmatpush1.bf16.msra.mxu1 %v6214_v63  ;;  %v7178_v63 = vld [vmem:[#allocation20_spill] sm:$0xff] }
 0x2ed   : > { %2090 = vmatprep.subr.bf16.mxu1 %v6224_v3  ;;  %v6559_v3 = vld [vmem:[%s7063_s5] ss:$0 sm:$0xff] }
 0x2ee   : > { %2132 = vmatpush1.bf16.msra.mxu0 %v6209_v61  ;;  %v7177_v61 = vld [vmem:[#allocation21_spill] sm:$0xff] }
 0x2ef   : > { %2133 = vmatprep.subr.bf16.mxu0 %v6219_v0  ;;  %v7179_v0 = vld [vmem:[#allocation22_spill] sm:$0xff] }
 0x2f0   : > { %2091 = vmatpush1.bf16.msra.mxu1 %v6226_v5 }
 0x2f1   : > { %2092 = vmatprep.subr.bf16.mxu1 %v6235_v8 }
 0x2f2   : > { %2134 = vmatpush1.bf16.msra.mxu0 %v6221_v1  ;;  %v7180_v1 = vmov 0.0  }
 0x2f3   : > { %2135 = vmatprep.subr.bf16.mxu0 %v6231_v6 }
 0x2f4   : > { %2093 = vmatpush1.bf16.msra.mxu1 %v6238_v9 }
 0x2f5   : > { %2094 = vmatprep.subr.bf16.mxu1 %v6247_v12  ;;  %v4537_v12 = vld [vmem:[%s6169_s20 + $0x48] sm:$0xff] }
 0x2f6   : > { %2136 = vmatpush1.bf16.msra.mxu0 %v6233_v7 }
 0x2f7   : > { %2137 = vmatprep.subr.bf16.mxu0 %v6243_v10 }
 0x2f8   : > { %2095 = vmatpush1.bf16.msra.mxu1 %v6250_v13  ;;  %v4536_v13 = vld [vmem:[%s6169_s20 + $0x40] sm:$0xff] }
 0x2f9   : > { %2096 = vmatprep.subr.bf16.mxu1 %v6259_v16  ;;  %v1641_v16 = vadd.f32 %v4536_v13, %v6391_v30 }
 0x2fa   : > { %2138 = vmatpush1.bf16.msra.mxu0 %v6245_v11 }
 0x2fb   : > { %2139 = vmatprep.subr.bf16.mxu0 %v6255_v14  ;;  %v4541_v14 = vld [vmem:[%s6169_s20 + $0x68] sm:$0xff] }
 0x2fc   : > { %2097 = vmatpush1.bf16.msra.mxu1 %v6262_v17  ;;  %v4540_v17 = vld [vmem:[%s6169_s20 + $0x60] sm:$0xff] }
 0x2fd   : > { %2098 = vmatprep.subr.bf16.mxu1 %v6271_v20  ;;  %v1645_v20 = vadd.f32 %v4540_v17, %v6395_v58 }
 0x2fe   : > { %2140 = vmatpush1.bf16.msra.mxu0 %v6257_v15  ;;  %v1642_v15 = vadd.f32 %v4537_v12, %v6393_v44 }
 0x2ff   : > { %2141 = vmatprep.subr.bf16.mxu0 %v6267_v18  ;;  %v1646_v18 = vadd.f32 %v4541_v14, %v6397_v59 }
 0x300   : > { %2099 = vmatpush1.bf16.msra.mxu1 %v6274_v21  ;;  %v1651_v21 = vmul.f32 0.5, %v1641_v16 }
 0x301   : > { %2100 = vmatprep.subr.bf16.mxu1 %v6283_v25  ;;  %v4538_v25 = vld [vmem:[%s6169_s20 + $0x50] sm:$0xff] }
 0x302   : > { %2142 = vmatpush1.bf16.msra.mxu0 %v6269_v19  ;;  %v1659_v19 = vmul.f32 0.5, %v1642_v15 }
 0x303   : > { %2143 = vmatprep.subr.bf16.mxu0 %v6279_v22  ;;  %v1660_v22 = vmul.f32 0.5, %v1646_v18 }
 0x304   : > { %2101 = vmatpush1.bf16.msra.mxu1 %v6286_v28  ;;  %5564 = vtanh.f32 %v1659_v19 }
 0x305   : > { %2102 = vmatprep.subr.bf16.mxu1 %v6295_v33  ;;  %5566 = vtanh.f32 %v1651_v21 }
 0x306   : > { %2144 = vmatpush1.bf16.msra.mxu0 %v6281_v23  ;;  %v1652_v23 = vmul.f32 0.5, %v1645_v20  ;;  %5568 = vtanh.f32 %v1660_v22 }
 0x307   : > { %2145 = vmatprep.subr.bf16.mxu0 %v6291_v29  ;;  %v4539_v29 = vld [vmem:[%s6169_s20 + $0x58] sm:$0xff] }
 0x308   : > { %2103 = vmatpush1.bf16.msra.mxu1 %v6298_v34  ;;  %5570 = vtanh.f32 %v1652_v23 }
 0x309   : > { %2104 = vmatprep.subr.bf16.mxu1 %v6307_v37 }
 0x30a   : > { %2146 = vmatpush1.bf16.msra.mxu0 %v6293_v32  ;;  %v4542_v32 = vld [vmem:[%s6169_s20 + $0x70] sm:$0xff] }
 0x30b   : > { %2147 = vmatprep.subr.bf16.mxu0 %v6303_v35  ;;  %v4543_v35 = vld [vmem:[%s6169_s20 + $0x78] sm:$0xff] }
 0x30c   : > { %2105 = vmatpush1.bf16.msra.mxu1 %v6310_v38 }
 0x30d   : > { %2106 = vmatprep.subr.bf16.mxu1 %v7177_v61 }
 0x30e   : > { %2148 = vmatpush1.bf16.msra.mxu0 %v6305_v36  ;;  %v5565_v37 = vpop.eup %5564 }
 0x30f   : > { %2149 = vmatprep.subr.bf16.mxu0 %v7176_v60  ;;  %v5567_v58 = vpop.eup %5566  ;;  %v1663_v61 = vmul.f32 0.5, %v5565_v37  ;;  %v6593_v37 = vld [vmem:[#allocation7 + $0x20] ss:$16 sps:$4 sm:$0xff]  }
 0x310   : > { %2107 = vmatpush1.bf16.msra.mxu1 %v7179_v0  ;;  %v5569_v60 = vpop.eup %5568 }
 0x311   : > { %4981 = vmatprep.subr.bf16.mxu1 %v7180_v1 }
 0x312   : > { %2150 = vmatpush1.bf16.msra.mxu0 %v7178_v63  ;;  %v5571_v63 = vpop.eup %5570 }
 0x313   : > { %2530 = vmatprep.subr.bf16.mxu0 %v6550_v62 }
 0x388   : > { %v1336_v5 = vpop.f32.mrb[8].mxu0 }
 0x389   : > { %v4979_v6 = vpop.f32.mrb[9].mxu0  ;;  %v1337_v8 = vadd.f32 %v6559_v3, %v1336_v5  ;;  %v1655_v5 = vmul.f32 0.5, %v5567_v58  ;;  %v6608_v58 = vld [vmem:[#allocation7 + $0x60] ss:$16 sps:$4 sm:$0xff]  }
 0x38a   : > { %v1339_v7 = vpop.f32.mrb[10].mxu0  ;;  %v1664_v6 = vmul.f32 0.5, %v5569_v60  ;;  %v6614_v60 = vld [vmem:[#allocation7 + $0x80] ss:$16 sps:$4 sm:$0xff]  }
 0x38b   : > { %v1340_v9 = vadd.f32 %v6559_v3, %v1339_v7  ;;  %v4980_v10 = vpop.f32.mrb[11].mxu0 }
 0x38c   : > { %v1657_v10 = vadd.f32 0.5, %v1655_v5  ;;  %v6626_v5 = vld [vmem:[#allocation7 + $0xc0] ss:$16 sps:$4 sm:$0xff]  }
 0x38d   : > { %v4905_v11 = vpack.c.bf16 %v1340_v9, %v1337_v8  ;;  %v1665_v8 = vadd.f32 0.5, %v1663_v61  ;;  %v1656_v9 = vmul.f32 0.5, %v5571_v63  ;;  %v6617_v61 = vld [vmem:[#allocation7 + $0xa4] ss:$16 sps:$4 sm:$0xff]   ;;  %v6620_v63 = vld [vmem:[#allocation7 + $0xa0] ss:$16 sps:$4 sm:$0xff]  }
 0x38f   : > { %4906 = vst [vmem:[%s6184_s30] sm:$0xff] %v4905_v11   ;;  %v1666_v11 = vadd.f32 0.5, %v1664_v6  ;;  %v1677_v13 = vmul.f32 %v1665_v8, %v6336_v52  ;;  %v1658_v14 = vadd.f32 0.5, %v1656_v9  ;;  %v6629_v6 = vld [vmem:[#allocation7 + $0xe4] ss:$16 sps:$4 sm:$0xff]  }
 0x390   : > { %v7181_v9 = vld [vmem:[#allocation23_spill] sm:$0xff] }
 0x391   : > { %v1678_v17 = vmul.f32 %v1666_v11, %v6339_v41  ;;  %v6584_v41 = vld [vmem:[#allocation7] ss:$16 sps:$4 sm:$0xff]  }
 0x3a8   : > { %v1632_v28 = vpop.f32.mrb[12].mxu0 }
 0x3a9   : > { %v1643_v33 = vadd.f32 %v4538_v25, %v1632_v28  ;;  %v1634_v34 = vpop.f32.mrb[13].mxu0 }
 0x3aa   : > { %v1636_v36 = vpop.f32.mrb[14].mxu0  ;;  %v1644_v38 = vadd.f32 %v4539_v29, %v1634_v34 }
 0x3ab   : > { %5572 = vtanh.f32 %v1643_v33  ;;  %v1647_v30 = vadd.f32 %v4542_v32, %v1636_v36  ;;  %v1638_v44 = vpop.f32.mrb[15].mxu0  ;;  %v6588_v36 = vld [vmem:[#allocation7 + $0x24] ss:$16 sps:$4 sm:$0xff]  }
 0x3ac   : > { %v1648_v59 = vadd.f32 %v4543_v35, %v1638_v44  ;;  %v1669_v0 = vmul.f32 0.5, %v1644_v38  ;;  %v6597_v38 = vld [vmem:[#allocation7 + $0x44] ss:$16 sps:$4 sm:$0xff]  }
 0x3ad   : > { %5574 = vtanh.f32 %v1647_v30  ;;  %v6602_v30 = vld [vmem:[#allocation7 + $0x40] ss:$16 sps:$4 sm:$0xff]   ;;  %v6605_v44 = vld [vmem:[#allocation7 + $0x64] ss:$16 sps:$4 sm:$0xff]  }
 0x3ae   : > { %v1670_v7 = vmul.f32 0.5, %v1648_v59  ;;  %5576 = vtanh.f32 %v1669_v0  ;;  %v6611_v59 = vld [vmem:[#allocation7 + $0x84] ss:$16 sps:$4 sm:$0xff]  }
 0x3af   : > { %v6623_v0 = vld [vmem:[#allocation7 + $0xc4] ss:$16 sps:$4 sm:$0xff]  }
 0x3b0   : > { %5578 = vtanh.f32 %v1670_v7  ;;  %v6632_v7 = vld [vmem:[#allocation7 + $0xe0] ss:$16 sps:$4 sm:$0xff]  }
 0x3b5   : > { %v5573_v12 = vpop.eup %5572 }
 0x3b6   : > { %v1679_v15 = vmul.f32 %v5573_v12, %v1657_v10 }
 0x3b7   : > { %v5575_v16 = vpop.eup %5574 }
 0x3b8   : > { %v6578_v18 = vadd.f32 %v1679_v15, %v1677_v13  ;;  %v1680_v19 = vmul.f32 %v5575_v16, %v1658_v14  ;;  %v5577_v21 = vpop.eup %5576 }
 0x3b9   : > { %v1673_v23 = vmul.f32 0.5, %v5577_v21 }
 0x3ba   : > { %5580 = vtanh.f32 %v6578_v18  ;;  %v6581_v20 = vadd.f32 %v1680_v19, %v1678_v17  ;;  %v5579_v22 = vpop.eup %5578 }
 0x3bb   : > { %v1674_v25 = vmul.f32 0.5, %v5579_v22  ;;  %v1675_v52 = vadd.f32 0.5, %v1673_v23 }
 0x3bc   : > { %5582 = vtanh.f32 %v6581_v20 }
 0x3bd   : > { %v1676_v29 = vadd.f32 0.5, %v1674_v25 }
 0x3c4   : > { %v5581_v28 = vpop.eup %5580 }
 0x3c5   : > { %v1685_v33 = vmul.f32 %v5581_v28, %v1675_v52  ;;  %v7183_v28 = vld [vmem:[#allocation25_spill] sm:$0xff] }
 0x3c6   : > { %v5583_v32 = vpop.eup %5582 }
 0x3c7   : > { %v1686_v34 = vmul.f32 %v5583_v32, %v1676_v29 }
 0x3c9   : > { %v6586_v35 = vpack.c.bf16 %v1686_v34, %v1685_v33 }
 0x3cb   : > { %2109 = vmatmul.mubr.bf16.vlgmr.msra.gmra.mrb[12].mxu1 %v6586_v35  ;;  %2152 = vmatmul.mubr.bf16.vlgmr.msra.gmra.mrb[16].mxu0 %v6586_v35 }
 0x3cc   : > { %2531 = vmatpush1.bf16.msra.mxu0 %v6584_v41  ;;  %2562 = vmatprep.mubr.bf16.mxu0 %v7152_v43 }
 0x3cd   : > { %2532 = vmatprep.subr.bf16.mxu0 %v6588_v36  ;;  %4997 = vmatprep.mubr.msk.bf16.mxu1 %vm5917_vm0, %v7180_v1 }
 0x3d0   : > { %2533 = vmatpush1.bf16.msra.mxu0 %v6593_v37 }
 0x3d1   : > { %2534 = vmatprep.subr.bf16.mxu0 %v6597_v38 }
 0x3d4   : > { %2535 = vmatpush1.bf16.msra.mxu0 %v6602_v30 }
 0x3d5   : > { %2536 = vmatprep.subr.bf16.mxu0 %v6605_v44 }
 0x3d8   : > { %2537 = vmatpush1.bf16.msra.mxu0 %v6608_v58 }
 0x3d9   : > { %2538 = vmatprep.subr.bf16.mxu0 %v6611_v59 }
 0x3dc   : > { %2539 = vmatpush1.bf16.msra.mxu0 %v6614_v60 }
 0x3dd   : > { %2540 = vmatprep.subr.bf16.mxu0 %v6617_v61 }
 0x3e0   : > { %2541 = vmatpush1.bf16.msra.mxu0 %v6620_v63 }
 0x3e1   : > { %2542 = vmatprep.subr.bf16.mxu0 %v6623_v0 }
 0x3e4   : > { %2543 = vmatpush1.bf16.msra.mxu0 %v6626_v5 }
 0x3e5   : > { %2544 = vmatprep.subr.bf16.mxu0 %v6629_v6 }
 0x3e8   : > { %2545 = vmatpush1.bf16.msra.mxu0 %v6632_v7 }
 0x3e9   : > { %3051 = vmatprep.subr.bf16.mxu0 %v6444_v27  ;;  %v5380_v27 = vld [vmem:[#allocation10] sm:$0xff]  }
 0x3ea   : > { %4982 = vmatpush3.bf16.msra.mxu1 %v5380_v27 }
 0x3eb   : > { %2563 = vmatmul.mubr.bf16.vlgmr.msra.gmra.mrb[20].mxu0 %v6586_v35  ;;  %4983 = vmatprep.subr.bf16.mxu1 %v7180_v1 }
 0x3ec   : > { %3052 = vmatpush1.bf16.msra.mxu0 %v6447_v54  ;;  %v5381_v54 = vld [vmem:[#allocation10 + $0x8] sm:$0xff]  }
 0x3ed   : > { %3053 = vmatprep.subr.bf16.mxu0 %v6456_v47 }
 0x3ee   : > { %4984 = vmatpush3.bf16.msra.mxu1 %v5381_v54 }
 0x3ef   : > { %4985 = vmatprep.subr.bf16.mxu1 %v7180_v1 }
 0x3f0   : > { %3054 = vmatpush1.bf16.msra.mxu0 %v6459_v46 }
 0x3f1   : > { %3055 = vmatprep.subr.bf16.mxu0 %v6467_v39  ;;  %v5382_v39 = vld [vmem:[#allocation10 + $0x10] sm:$0xff]  }
 0x3f2   : > { %4986 = vmatpush3.bf16.msra.mxu1 %v5382_v39 }
 0x3f3   : > { %4987 = vmatprep.subr.bf16.mxu1 %v7180_v1 }
 0x3f4   : > { %3056 = vmatpush1.bf16.msra.mxu0 %v6471_v2  ;;  %v5383_v2 = vld [vmem:[#allocation10 + $0x18] sm:$0xff]  }
 0x3f5   : > { %3057 = vmatprep.subr.bf16.mxu0 %v6476_v40 }
 0x3f6   : > { %4988 = vmatpush3.bf16.msra.mxu1 %v5383_v2 }
 0x3f7   : > { %4989 = vmatprep.subr.bf16.mxu1 %v7180_v1 }
 0x3f8   : > { %3058 = vmatpush1.bf16.msra.mxu0 %v6483_v4 }
 0x3f9   : > { %3059 = vmatprep.subr.bf16.mxu0 %v6488_v24  ;;  %v5387_v24 = vld [vmem:[#allocation10 + $0x38] sm:$0xff]  }
 0x3fc   : > { %3060 = vmatpush1.bf16.msra.mxu0 %v6495_v53  ;;  %v5384_v53 = vld [vmem:[#allocation10 + $0x20] sm:$0xff]  }
 0x3fd   : > { %3061 = vmatprep.subr.bf16.mxu0 %v6500_v45  ;;  %4990 = vmatpush3.bf16.msra.mxu1 %v5384_v53  ;;  %v5386_v45 = vld [vmem:[#allocation10 + $0x30] sm:$0xff]  }
 0x3fe   : > { %4991 = vmatprep.subr.bf16.mxu1 %v7180_v1 }
 0x400   : > { %3062 = vmatpush1.bf16.msra.mxu0 %v6507_v26  ;;  %v5385_v26 = vld [vmem:[#allocation10 + $0x28] sm:$0xff]  }
 0x401   : > { %4992 = vmatpush3.bf16.msra.mxu1 %v5385_v26 }
 0x402   : > { %4993 = vmatprep.subr.bf16.mxu1 %v7180_v1 }
 0x405   : > { %4994 = vmatpush3.bf16.msra.mxu1 %v5386_v45 }
 0x406   : > { %4995 = vmatprep.subr.bf16.mxu1 %v7180_v1 }
 0x409   : > { %4996 = vmatpush3.bf16.msra.mxu1 %v5387_v24 }
 0x40a   : > { %2573 = vmatprep.subr.bf16.mxu1 %v6361_v55  ;;  %v7182_v55 = vld [vmem:[#allocation24_spill] sm:$0xff] }
 0x49e   : > { %v2110_v40 = vpop.f32.mrb[12].mxu1  ;;  %v2153_v4 = vpop.f32.mrb[16].mxu0 }
 0x49f   : > { %v2162_v47 = vadd.f32 %v2110_v40, %v6369_v42  ;;  %v2112_v46 = vpop.f32.mrb[13].mxu1  ;;  %v2155_v8 = vpop.f32.mrb[17].mxu0  ;;  %v2164_v21 = vadd.f32 %v2153_v4, %v7182_v55 }
 0x4a0   : > { %v2163_v10 = vadd.f32 %v2112_v46, %v7181_v9  ;;  %v2114_v11 = vpop.f32.mrb[14].mxu1  ;;  %v2157_v12 = vpop.f32.mrb[18].mxu0  ;;  %v2165_v52 = vadd.f32 %v2155_v8, %v7183_v28 }
 0x4a1   : > { %v2172_v13 = vmul.f32 0.5, %v2162_v47  ;;  %v2166_v14 = vadd.f32 %v2114_v11, %v6369_v42  ;;  %v2116_v15 = vpop.f32.mrb[15].mxu1  ;;  %v2159_v16 = vpop.f32.mrb[19].mxu0  ;;  %v2168_v25 = vadd.f32 %v2157_v12, %v7182_v55 }
 0x4a2   : > { %v2180_v17 = vmul.f32 0.5, %v2163_v10  ;;  %v2167_v19 = vadd.f32 %v2116_v15, %v7181_v9  ;;  %v2169_v29 = vadd.f32 %v2159_v16, %v7183_v28  ;;  %v2190_v27 = vmul.f32 0.5, %v2165_v52 }
 0x4a3   : > { %5584 = vtanh.f32 %v2172_v13  ;;  %v2173_v22 = vmul.f32 0.5, %v2166_v14 }
 0x4a4   : > { %5586 = vtanh.f32 %v2180_v17  ;;  %v2181_v23 = vmul.f32 0.5, %v2167_v19  ;;  %v2191_v39 = vmul.f32 0.5, %v2169_v29 }
 0x4a5   : > { %5588 = vtanh.f32 %v2173_v22 }
 0x4a6   : > { %5590 = vtanh.f32 %v2164_v21 }
 0x4a7   : > { %5592 = vtanh.f32 %v2181_v23 }
 0x4a8   : > { %5594 = vtanh.f32 %v2168_v25 }
 0x4a9   : > { %5596 = vtanh.f32 %v2190_v27 }
 0x4aa   : > { %5598 = vtanh.f32 %v2191_v39  ;;  %v7185_v39 = vld [vmem:[#allocation27_spill] sm:$0xff] }
 0x4ad   : > { %v5585_v32 = vpop.eup %5584 }
 0x4ae   : > { %v5587_v33 = vpop.eup %5586  ;;  %v2176_v34 = vmul.f32 0.5, %v5585_v32 }
 0x4af   : > { %v2184_v54 = vmul.f32 0.5, %v5587_v33  ;;  %v5589_v2 = vpop.eup %5588 }
 0x4b0   : > { %v2178_v53 = vadd.f32 0.5, %v2176_v34  ;;  %v5591_v26 = vpop.eup %5590  ;;  %v2177_v24 = vmul.f32 0.5, %v5589_v2  ;;  %v7186_v2 = vld [vmem:[#allocation28_spill] sm:$0xff] }
 0x4b1   : > { %v2186_v45 = vadd.f32 0.5, %v2184_v54  ;;  %v5593_v40 = vpop.eup %5592  ;;  %v7184_v54 = vld [vmem:[#allocation26_spill] sm:$0xff] }
 0x4b2   : > { %v2200_v4 = vmul.f32 %v5591_v26, %v2178_v53  ;;  %v2179_v46 = vadd.f32 0.5, %v2177_v24  ;;  %v2185_v8 = vmul.f32 0.5, %v5593_v40  ;;  %v5595_v10 = vpop.eup %5594  ;;  %v7187_v53 = vld [vmem:[#allocation29_spill] sm:$0xff]  ;;  %v7188_v26 = vld [vmem:[#allocation30_spill] sm:$0xff]  ;;  %v7190_v24 = vld [vmem:[#allocation32_spill] sm:$0xff] }
 0x4b3   : > { %v2198_v47 = vmul.f32 %v2186_v45, %v6385_v48  ;;  %v5597_v16 = vpop.eup %5596  ;;  %v7189_v45 = vld [vmem:[#allocation31_spill] sm:$0xff]  ;;  %v7191_v40 = vld [vmem:[#allocation33_spill] sm:$0xff] }
 0x4b4   : > { %v2187_v12 = vadd.f32 0.5, %v2185_v8  ;;  %v2201_v13 = vmul.f32 %v5595_v10, %v2179_v46  ;;  %v5599_v17 = vpop.eup %5598  ;;  %v2194_v21 = vmul.f32 0.5, %v5597_v16  ;;  %v6694_v46 = vld [vmem:[#allocation7 + $0xec] ss:$16 sps:$4 sm:$0xff]   ;;  %v7195_v8 = vld [vmem:[#allocation37_spill] sm:$0xff] }
 0x4b5   : > { %v6666_v11 = vadd.f32 %v2200_v4, %v2198_v47  ;;  %v2195_v22 = vmul.f32 0.5, %v5599_v17  ;;  %v7192_v4 = vld [vmem:[#allocation34_spill] sm:$0xff]  ;;  %v7194_v47 = vld [vmem:[#allocation36_spill] sm:$0xff]  ;;  %v7199_v16 = vld [vmem:[#allocation41_spill] sm:$0xff] }
 0x4b6   : > { %v2199_v14 = vmul.f32 %v2187_v12, %v6388_v56  ;;  %v2196_v56 = vadd.f32 0.5, %v2194_v21  ;;  %v6697_v10 = vld [vmem:[#allocation7 + $0xe8] ss:$16 sps:$4 sm:$0xff]   ;;  %v7196_v12 = vld [vmem:[#allocation39_spill] sm:$0xff] }
 0x4b7   : > { %5600 = vtanh.f32 %v6666_v11  ;;  %v2197_v29 = vadd.f32 0.5, %v2195_v22  ;;  %v7200_v17 = vld [vmem:[#allocation42_spill] sm:$0xff]  ;;  %v7201_v21 = vld [vmem:[#allocation43_spill] sm:$0xff]  ;;  %v7202_v22 = vld [vmem:[#allocation44_spill] sm:$0xff] }
 0x4b8   : > { %v6670_v15 = vadd.f32 %v2201_v13, %v2199_v14  ;;  %v7197_v13 = vld [vmem:[#allocation38_spill] sm:$0xff]  ;;  %v7198_v14 = vld [vmem:[#allocation40_spill] sm:$0xff] }
 0x4ba   : > { %5602 = vtanh.f32 %v6670_v15 }
 0x4be   : > { %v6673_v19 = vpop.f32.mrb[20].mxu0 }
 0x4bf   : > { %v6675_v48 = vpop.f32.mrb[21].mxu0 }
 0x4c0   : > { %v6677_v23 = vpop.f32.mrb[22].mxu0 }
 0x4c1   : > { %v6679_v25 = vpop.f32.mrb[23].mxu0  ;;  %v5601_v52 = vpop.eup %5600 }
 0x4c2   : > { %v2206_v33 = vmul.f32 %v5601_v52, %v2196_v56  ;;  %v7203_v52 = vld [vmem:[#allocation45_spill] sm:$0xff]  ;;  %v6716_v56 = vld [vmem:[#allocation9 + $0xcc] ss:$16 sps:$4 sm:$0xff]  }
 0x4c4   : > { %v5603_v32 = vpop.eup %5602 }
 0x4c5   : > { %v2207_v34 = vmul.f32 %v5603_v32, %v2197_v29  ;;  %v6718_v29 = vld [vmem:[#allocation9 + $0xc0] ss:$16 sps:$4 sm:$0xff]   ;;  %v6720_v32 = vld [vmem:[#allocation9 + $0xc4] ss:$16 sps:$4 sm:$0xff]  }
 0x4c6   : > { %3063 = vmatprep.subr.bf16.mxu0 %v6720_v32 }
 0x4c7   : > { %v2208_v27 = vpack.c.bf16 %v2207_v34, %v2206_v33  ;;  %v6722_v33 = vld [vmem:[#allocation9 + $0xec] ss:$16 sps:$4 sm:$0xff]   ;;  %v6725_v34 = vld [vmem:[#allocation9 + $0xe4] ss:$16 sps:$4 sm:$0xff]   ;;  %3064 = vmatpush1.bf16.msra.mxu0 %v6718_v29 }
 0x4c8   : > { %3065 = vmatprep.subr.bf16.mxu0 %v6725_v34 }
 0x4c9   : > { %4998 = vmatmul.mubr.bf16.vlgmr.msra.gmra.mrb[16].mxu1 %v2208_v27  ;;  %3083 = vmatprep.mubr.bf16.mxu0 %v2208_v27 }
 0x4ca   : > { %2574 = vmatpush1.bf16.msra.mxu1 %v6399_v51  ;;  %2605 = vmatprep.mubr.bf16.mxu1 %v7152_v43  ;;  %v7193_v51 = vld [vmem:[#allocation35_spill] sm:$0xff] }
 0x4cb   : > { %2575 = vmatprep.subr.bf16.mxu1 %v7184_v54  ;;  %v6745_v54 = vld [vmem:[#allocation9 + $0x100] ss:$16 sps:$4 sm:$0xff]  }
 0x4ce   : > { %2576 = vmatpush1.bf16.msra.mxu1 %v7185_v39  ;;  %v6750_v39 = vld [vmem:[#allocation9 + $0x12c] ss:$16 sps:$4 sm:$0xff]  }
 0x4cf   : > { %2577 = vmatprep.subr.bf16.mxu1 %v7186_v2  ;;  %v6752_v2 = vld [vmem:[#allocation9 + $0x128] ss:$16 sps:$4 sm:$0xff]  }
 0x4d0   : > { %7204 = vst [vmem:[#allocation19_spill] sm:$0xff] %v6752_v2 }
 0x4d2   : > { %2578 = vmatpush1.bf16.msra.mxu1 %v7187_v53  ;;  %v6754_v53 = vld [vmem:[#allocation9 + $0x124] ss:$16 sps:$4 sm:$0xff]  }
 0x4d3   : > { %2579 = vmatprep.subr.bf16.mxu1 %v7188_v26  ;;  %v6757_v26 = vld [vmem:[#allocation9 + $0x120] ss:$16 sps:$4 sm:$0xff]  }
 0x4d4   : > { %7205 = vst [vmem:[#allocation21_spill] sm:$0xff] %v6757_v26 }
 0x4d6   : > { %2580 = vmatpush1.bf16.msra.mxu1 %v7189_v45  ;;  %v6762_v45 = vld [vmem:[#allocation9 + $0x14c] ss:$16 sps:$4 sm:$0xff]  }
 0x4d7   : > { %2581 = vmatprep.subr.bf16.mxu1 %v7190_v24  ;;  %7206 = vst [vmem:[#allocation20_spill] sm:$0xff] %v6762_v45  ;;  %v6764_v24 = vld [vmem:[#allocation9 + $0x148] ss:$16 sps:$4 sm:$0xff]  }
 0x4d8   : > { %7207 = vst [vmem:[#allocation22_spill] sm:$0xff] %v6764_v24 }
 0x4da   : > { %2582 = vmatpush1.bf16.msra.mxu1 %v7191_v40  ;;  %v6766_v40 = vld [vmem:[#allocation9 + $0x144] ss:$16 sps:$4 sm:$0xff]  }
 0x4db   : > { %2583 = vmatprep.subr.bf16.mxu1 %v7192_v4  ;;  %7208 = vst [vmem:[#allocation23_spill] sm:$0xff] %v6766_v40  ;;  %v6769_v4 = vld [vmem:[#allocation9 + $0x140] ss:$16 sps:$4 sm:$0xff]  }
 0x4dc   : > { %7209 = vst [vmem:[#allocation24_spill] sm:$0xff] %v6769_v4 }
 0x4de   : > { %2584 = vmatpush1.bf16.msra.mxu1 %v7193_v51  ;;  %v6774_v51 = vld [vmem:[#allocation9 + $0x16c] ss:$16 sps:$4 sm:$0xff]  }
 0x4df   : > { %2585 = vmatprep.subr.bf16.mxu1 %v7194_v47  ;;  %7210 = vst [vmem:[#allocation25_spill] sm:$0xff] %v6774_v51  ;;  %v6776_v47 = vld [vmem:[#allocation9 + $0x168] ss:$16 sps:$4 sm:$0xff]  }
 0x4e0   : > { %7211 = vst [vmem:[#allocation26_spill] sm:$0xff] %v6776_v47 }
 0x4e2   : > { %2586 = vmatpush1.bf16.msra.mxu1 %v7195_v8  ;;  %v6778_v8 = vld [vmem:[#allocation9 + $0x164] ss:$16 sps:$4 sm:$0xff]  }
 0x4e3   : > { %2587 = vmatprep.subr.bf16.mxu1 %v6694_v46  ;;  %7212 = vst [vmem:[#allocation27_spill] sm:$0xff] %v6778_v8 }
 0x4e6   : > { %2588 = vmatpush1.bf16.msra.mxu1 %v6697_v10 }
 0x4e7   : > { %3094 = vmatprep.subr.bf16.mxu1 %v7196_v12  ;;  %v6781_v12 = vld [vmem:[#allocation9 + $0x160] ss:$16 sps:$4 sm:$0xff]  }
 0x4e8   : > { %7213 = vst [vmem:[#allocation28_spill] sm:$0xff] %v6781_v12 }
 0x4e9   : > { %2606 = vmatmul.mubr.bf16.vlgmr.msra.gmra.mrb[20].mxu1 %v6586_v35  ;;  %v6714_v35 = vld [vmem:[#allocation9 + $0xc8] ss:$16 sps:$4 sm:$0xff]  }
 0x4ea   : > { %3126 = vmatprep.mubr.bf16.mxu1 %v2208_v27  ;;  %3095 = vmatpush1.bf16.msra.mxu1 %v7197_v13  ;;  %v6742_v27 = vld [vmem:[#allocation9 + $0x104] ss:$16 sps:$4 sm:$0xff]   ;;  %v6786_v13 = vld [vmem:[#allocation9 + $0x18c] ss:$16 sps:$4 sm:$0xff]  }
 0x4eb   : > { %3096 = vmatprep.subr.bf16.mxu1 %v7198_v14  ;;  %7214 = vst [vmem:[#allocation29_spill] sm:$0xff] %v6786_v13  ;;  %v6788_v14 = vld [vmem:[#allocation9 + $0x188] ss:$16 sps:$4 sm:$0xff]  }
 0x4ec   : > { %7215 = vst [vmem:[#allocation30_spill] sm:$0xff] %v6788_v14 }
 0x4ee   : > { %3097 = vmatpush1.bf16.msra.mxu1 %v7199_v16  ;;  %v6790_v16 = vld [vmem:[#allocation9 + $0x184] ss:$16 sps:$4 sm:$0xff]  }
 0x4ef   : > { %3098 = vmatprep.subr.bf16.mxu1 %v7200_v17  ;;  %7216 = vst [vmem:[#allocation31_spill] sm:$0xff] %v6790_v16  ;;  %v6793_v17 = vld [vmem:[#allocation9 + $0x180] ss:$16 sps:$4 sm:$0xff]  }
 0x4f0   : > { %7217 = vst [vmem:[#allocation32_spill] sm:$0xff] %v6793_v17 }
 0x4f2   : > { %3099 = vmatpush1.bf16.msra.mxu1 %v7201_v21  ;;  %v6798_v21 = vld [vmem:[#allocation9 + $0x1ac] ss:$16 sps:$4 sm:$0xff]  }
 0x4f3   : > { %3100 = vmatprep.subr.bf16.mxu1 %v7202_v22  ;;  %7218 = vst [vmem:[#allocation33_spill] sm:$0xff] %v6798_v21  ;;  %v6800_v22 = vld [vmem:[#allocation9 + $0x1a8] ss:$16 sps:$4 sm:$0xff]  }
 0x4f4   : > { %7219 = vst [vmem:[#allocation34_spill] sm:$0xff] %v6800_v22 }
 0x4f6   : > { %3101 = vmatpush1.bf16.msra.mxu1 %v7203_v52  ;;  %v6802_v52 = vld [vmem:[#allocation9 + $0x1a4] ss:$16 sps:$4 sm:$0xff]  }
 0x4f7   : > { %3102 = vmatprep.subr.bf16.mxu1 %v6485_v57  ;;  %v6740_v57 = vld [vmem:[#allocation9 + $0x108] ss:$16 sps:$4 sm:$0xff]   ;;  %7220 = vst [vmem:[#allocation35_spill] sm:$0xff] %v6802_v52 }
 0x4fa   : > { %3103 = vmatpush1.bf16.msra.mxu1 %v6491_v50  ;;  %v6738_v50 = vld [vmem:[#allocation9 + $0x10c] ss:$16 sps:$4 sm:$0xff]  }
 0x4fb   : > { %3104 = vmatprep.subr.bf16.mxu1 %v6497_v49  ;;  %v6729_v49 = vld [vmem:[#allocation9 + $0xe8] ss:$16 sps:$4 sm:$0xff]  }
 0x4fe   : > { %3105 = vmatpush1.bf16.msra.mxu1 %v6503_v31  ;;  %v6733_v31 = vld [vmem:[#allocation9 + $0xe0] ss:$16 sps:$4 sm:$0xff]  }
 0x4ff   : > { %3106 = vmatprep.subr.bf16.mxu1 %v6716_v56  ;;  %3066 = vmatpush1.bf16.msra.mxu0 %v6733_v31 }
 0x500   : > { %3067 = vmatprep.subr.bf16.mxu0 %v6742_v27 }
 0x502   : > { %3107 = vmatpush1.bf16.msra.mxu1 %v6714_v35 }
 0x503   : > { %3108 = vmatprep.subr.bf16.mxu1 %v6722_v33  ;;  %3068 = vmatpush1.bf16.msra.mxu0 %v6745_v54 }
 0x504   : > { %3069 = vmatprep.subr.bf16.mxu0 %v6754_v53 }
 0x506   : > { %3109 = vmatpush1.bf16.msra.mxu1 %v6729_v49 }
 0x507   : > { %3110 = vmatprep.subr.bf16.mxu1 %v6738_v50  ;;  %3070 = vmatpush1.bf16.msra.mxu0 %v6757_v26 }
 0x508   : > { %3071 = vmatprep.subr.bf16.mxu0 %v6766_v40 }
 0x50a   : > { %3111 = vmatpush1.bf16.msra.mxu1 %v6740_v57 }
 0x50b   : > { %3112 = vmatprep.subr.bf16.mxu1 %v6750_v39  ;;  %3072 = vmatpush1.bf16.msra.mxu0 %v6769_v4 }
 0x50c   : > { %3073 = vmatprep.subr.bf16.mxu0 %v6778_v8  ;;  %v4657_v8 = vld [vmem:[%s6169_s20 + $0xa8] sm:$0xff] }
 0x50e   : > { %3113 = vmatpush1.bf16.msra.mxu1 %v6752_v2 }
 0x50f   : > { %3114 = vmatprep.subr.bf16.mxu1 %v6762_v45  ;;  %3074 = vmatpush1.bf16.msra.mxu0 %v6781_v12 }
 0x510   : > { %3075 = vmatprep.subr.bf16.mxu0 %v6790_v16  ;;  %v6817_v16 = vld [vmem:[#allocation9 + $0x1c0] ss:$16 sps:$4 sm:$0xff]  }
 0x511   : > { %7225 = vst [vmem:[#allocation40_spill] sm:$0xff] %v6817_v16 }
 0x512   : > { %3115 = vmatpush1.bf16.msra.mxu1 %v6764_v24  ;;  %v4656_v24 = vld [vmem:[%s6169_s20 + $0xa0] sm:$0xff] }
 0x513   : > { %3116 = vmatprep.subr.bf16.mxu1 %v6774_v51  ;;  %3076 = vmatpush1.bf16.msra.mxu0 %v6793_v17  ;;  %v6814_v17 = vld [vmem:[#allocation9 + $0x1c4] ss:$16 sps:$4 sm:$0xff]  }
 0x514   : > { %3077 = vmatprep.subr.bf16.mxu0 %v6802_v52  ;;  %7224 = vst [vmem:[#allocation38_spill] sm:$0xff] %v6814_v17 }
 0x516   : > { %3117 = vmatpush1.bf16.msra.mxu1 %v6776_v47  ;;  %v6805_v47 = vld [vmem:[#allocation9 + $0x1a0] ss:$16 sps:$4 sm:$0xff]  }
 0x517   : > { %3118 = vmatprep.subr.bf16.mxu1 %v6786_v13  ;;  %7221 = vst [vmem:[#allocation36_spill] sm:$0xff] %v6805_v47  ;;  %3078 = vmatpush1.bf16.msra.mxu0 %v6805_v47  ;;  %v6810_v13 = vld [vmem:[#allocation9 + $0x1cc] ss:$16 sps:$4 sm:$0xff]   ;;  %v6826_v47 = vld [vmem:[#allocation9 + $0x1e4] ss:$16 sps:$4 sm:$0xff]  }
 0x518   : > { %7222 = vst [vmem:[#allocation37_spill] sm:$0xff] %v6810_v13  ;;  %3079 = vmatprep.subr.bf16.mxu0 %v6814_v17  ;;  %7228 = vst [vmem:[#allocation43_spill] sm:$0xff] %v6826_v47 }
 0x51a   : > { %3119 = vmatpush1.bf16.msra.mxu1 %v6788_v14  ;;  %v6812_v14 = vld [vmem:[#allocation9 + $0x1c8] ss:$16 sps:$4 sm:$0xff]  }
 0x51b   : > { %3120 = vmatprep.subr.bf16.mxu1 %v6798_v21  ;;  %7223 = vst [vmem:[#allocation39_spill] sm:$0xff] %v6812_v14  ;;  %3080 = vmatpush1.bf16.msra.mxu0 %v6817_v16  ;;  %v6822_v21 = vld [vmem:[#allocation9 + $0x1ec] ss:$16 sps:$4 sm:$0xff]  }
 0x51c   : > { %7226 = vst [vmem:[#allocation41_spill] sm:$0xff] %v6822_v21  ;;  %3081 = vmatprep.subr.bf16.mxu0 %v6826_v47  ;;  %v4653_v47 = vld [vmem:[%s6169_s20 + $0x88] sm:$0xff] }
 0x51e   : > { %3121 = vmatpush1.bf16.msra.mxu1 %v6800_v22  ;;  %v6824_v22 = vld [vmem:[#allocation9 + $0x1e8] ss:$16 sps:$4 sm:$0xff]  }
 0x51f   : > { %3122 = vmatprep.subr.bf16.mxu1 %v6810_v13  ;;  %7227 = vst [vmem:[#allocation42_spill] sm:$0xff] %v6824_v22  ;;  %v6829_v13 = vld [vmem:[#allocation9 + $0x1e0] ss:$16 sps:$4 sm:$0xff]  }
 0x520   : > { %7229 = vst [vmem:[#allocation44_spill] sm:$0xff] %v6829_v13  ;;  %3082 = vmatpush1.bf16.msra.mxu0 %v6829_v13  ;;  %v2617_v13 = vadd.f32 %v4653_v47, %v6675_v48  ;;  %v4655_v48 = vld [vmem:[%s6169_s20 + $0x98] sm:$0xff]  ;;  %v4658_v47 = vld [vmem:[%s6169_s20 + $0xb0] sm:$0xff] }
 0x521   : > { %5001 = vmatprep.subr.bf16.mxu0 %v7180_v1 }
 0x522   : > { %3123 = vmatpush1.bf16.msra.mxu1 %v6812_v14 }
 0x523   : > { %3124 = vmatprep.subr.bf16.mxu1 %v6822_v21 }
 0x526   : > { %3125 = vmatpush1.bf16.msra.mxu1 %v6824_v22  ;;  %v4652_v22 = vld [vmem:[%s6169_s20 + $0x80] sm:$0xff] }
 0x527   : > { %3505 = vmatprep.subr.bf16.mxu1 %v6550_v62  ;;  %v2616_v62 = vadd.f32 %v4652_v22, %v6673_v19  ;;  %v4659_v22 = vld [vmem:[%s6169_s20 + $0xb8] sm:$0xff] }
 0x59c   : > { %v2310_v14 = vpop.f32.mrb[16].mxu1 }
 0x59d   : > { %v4999_v16 = vpop.f32.mrb[17].mxu1  ;;  %v2311_v21 = vadd.f32 %v6559_v3, %v2310_v14  ;;  %v2634_v14 = vmul.f32 0.5, %v2617_v13 }
 0x59e   : > { %v2313_v17 = vpop.f32.mrb[18].mxu1  ;;  %v2621_v16 = vadd.f32 %v4657_v8, %v6679_v25 }
 0x59f   : > { %v2314_v52 = vadd.f32 %v6559_v3, %v2313_v17  ;;  %v5000_v12 = vpop.f32.mrb[19].mxu1  ;;  %v2620_v3 = vadd.f32 %v4656_v24, %v6677_v23  ;;  %5604 = vtanh.f32 %v2634_v14 }
 0x5a0   : > { %v2626_v12 = vmul.f32 0.5, %v2616_v62  ;;  %v2635_v17 = vmul.f32 0.5, %v2621_v16 }
 0x5a1   : > { %v4910_v51 = vpack.c.bf16 %v2314_v52, %v2311_v21  ;;  %v4654_v21 = vld [vmem:[%s6169_s20 + $0x90] sm:$0xff] }
 0x5a2   : > { %5606 = vtanh.f32 %v2626_v12 }
 0x5a3   : > { %4922 = vst [vmem:[%s6184_s30 + $0x8] sm:$0xff] %v4910_v51   ;;  %v2627_v51 = vmul.f32 0.5, %v2620_v3  ;;  %5608 = vtanh.f32 %v2635_v17 }
 0x5a5   : > { %5610 = vtanh.f32 %v2627_v51 }
 0x5a9   : > { %v5605_v25 = vpop.eup %5604 }
 0x5aa   : > { %v2638_v14 = vmul.f32 0.5, %v5605_v25 }
 0x5ac   : > { %v5607_v24 = vpop.eup %5606  ;;  %v2640_v2 = vadd.f32 0.5, %v2638_v14 }
 0x5ad   : > { %v5609_v16 = vpop.eup %5608  ;;  %v2630_v17 = vmul.f32 0.5, %v5607_v24 }
 0x5ae   : > { %v2639_v51 = vmul.f32 0.5, %v5609_v16 }
 0x5af   : > { %v5611_v3 = vpop.eup %5610 }
 0x5b0   : > { %v2641_v26 = vadd.f32 0.5, %v2639_v51 }
 0x5bc   : > { %v2607_v52 = vpop.f32.mrb[20].mxu1 }
 0x5bd   : > { %v2618_v4 = vadd.f32 %v4654_v21, %v2607_v52  ;;  %v2609_v19 = vpop.f32.mrb[21].mxu1  ;;  %v2631_v21 = vmul.f32 0.5, %v5611_v3  ;;  %v2632_v52 = vadd.f32 0.5, %v2630_v17 }
 0x5be   : > { %v2611_v45 = vpop.f32.mrb[22].mxu1  ;;  %v2619_v8 = vadd.f32 %v4655_v48, %v2609_v19 }
 0x5bf   : > { %5612 = vtanh.f32 %v2618_v4  ;;  %v2622_v13 = vadd.f32 %v4658_v47, %v2611_v45  ;;  %v2613_v23 = vpop.f32.mrb[23].mxu1  ;;  %v2652_v45 = vmul.f32 %v2640_v2, %v6578_v18  ;;  %v2633_v48 = vadd.f32 0.5, %v2631_v21 }
 0x5c0   : > { %v2623_v62 = vadd.f32 %v4659_v22, %v2613_v23  ;;  %v2644_v12 = vmul.f32 0.5, %v2619_v8  ;;  %v2653_v22 = vmul.f32 %v2641_v26, %v6581_v20 }
 0x5c1   : > { %5614 = vtanh.f32 %v2622_v13 }
 0x5c2   : > { %v2645_v40 = vmul.f32 0.5, %v2623_v62  ;;  %5616 = vtanh.f32 %v2644_v12 }
 0x5c4   : > { %5618 = vtanh.f32 %v2645_v40 }
 0x5c9   : > { %v5613_v4 = vpop.eup %5612 }
 0x5ca   : > { %v2654_v47 = vmul.f32 %v5613_v4, %v2632_v52 }
 0x5cb   : > { %v5615_v19 = vpop.eup %5614 }
 0x5cc   : > { %v6853_v25 = vadd.f32 %v2654_v47, %v2652_v45  ;;  %v2655_v8 = vmul.f32 %v5615_v19, %v2633_v48  ;;  %v5617_v23 = vpop.eup %5616 }
 0x5cd   : > { %v2648_v40 = vmul.f32 0.5, %v5617_v23 }
 0x5ce   : > { %5620 = vtanh.f32 %v6853_v25  ;;  %v6856_v13 = vadd.f32 %v2655_v8, %v2653_v22  ;;  %v5619_v24 = vpop.eup %5618 }
 0x5cf   : > { %v2649_v62 = vmul.f32 0.5, %v5619_v24  ;;  %v2650_v18 = vadd.f32 0.5, %v2648_v40 }
 0x5d0   : > { %5622 = vtanh.f32 %v6856_v13 }
 0x5d1   : > { %v2651_v2 = vadd.f32 0.5, %v2649_v62 }
 0x5d8   : > { %v5621_v16 = vpop.eup %5620 }
 0x5d9   : > { %v2660_v3 = vmul.f32 %v5621_v16, %v2650_v18 }
 0x5da   : > { %v5623_v14 = vpop.eup %5622 }
 0x5db   : > { %v2661_v12 = vmul.f32 %v5623_v14, %v2651_v2 }
 0x5dd   : > { %v6859_v20 = vpack.c.bf16 %v2661_v12, %v2660_v3 }
 0x5df   : > { %3084 = vmatmul.mubr.bf16.vlgmr.msra.gmra.mrb[24].mxu0 %v6859_v20  ;;  %3127 = vmatmul.mubr.bf16.vlgmr.msra.gmra.mrb[24].mxu1 %v6859_v20 }
 0x5e0   : > { %3506 = vmatpush1.bf16.msra.mxu1 %v6584_v41  ;;  %3537 = vmatprep.mubr.bf16.mxu1 %v7152_v43  ;;  %v5451_v41 = vld [vmem:[#allocation10] sm:$0xff]  }
 0x5e1   : > { %3507 = vmatprep.subr.bf16.mxu1 %v6588_v36  ;;  %5017 = vmatprep.mubr.msk.bf16.mxu0 %vm5917_vm0, %v7180_v1  ;;  %v5452_v36 = vld [vmem:[#allocation10 + $0x8] sm:$0xff]  }
 0x5e2   : > { %5002 = vmatpush3.bf16.msra.mxu0 %v5451_v41 }
 0x5e3   : > { %5003 = vmatprep.subr.bf16.mxu0 %v7180_v1 }
 0x5e4   : > { %3508 = vmatpush1.bf16.msra.mxu1 %v6593_v37  ;;  %v5453_v37 = vld [vmem:[#allocation10 + $0x10] sm:$0xff]  }
 0x5e5   : > { %3509 = vmatprep.subr.bf16.mxu1 %v6597_v38  ;;  %v5454_v38 = vld [vmem:[#allocation10 + $0x18] sm:$0xff]  }
 0x5e6   : > { %5004 = vmatpush3.bf16.msra.mxu0 %v5452_v36 }
 0x5e7   : > { %5005 = vmatprep.subr.bf16.mxu0 %v7180_v1 }
 0x5e8   : > { %3510 = vmatpush1.bf16.msra.mxu1 %v6602_v30  ;;  %v5455_v30 = vld [vmem:[#allocation10 + $0x20] sm:$0xff]  }
 0x5e9   : > { %3511 = vmatprep.subr.bf16.mxu1 %v6605_v44  ;;  %v5456_v44 = vld [vmem:[#allocation10 + $0x28] sm:$0xff]  }
 0x5ea   : > { %5006 = vmatpush3.bf16.msra.mxu0 %v5453_v37 }
 0x5eb   : > { %5007 = vmatprep.subr.bf16.mxu0 %v7180_v1 }
 0x5ec   : > { %3512 = vmatpush1.bf16.msra.mxu1 %v6608_v58  ;;  %v5457_v58 = vld [vmem:[#allocation10 + $0x30] sm:$0xff]  }
 0x5ed   : > { %3513 = vmatprep.subr.bf16.mxu1 %v6611_v59  ;;  %v5458_v59 = vld [vmem:[#allocation10 + $0x38] sm:$0xff]  }
 0x5ee   : > { %5008 = vmatpush3.bf16.msra.mxu0 %v5454_v38 }
 0x5ef   : > { %5009 = vmatprep.subr.bf16.mxu0 %v7180_v1 }
 0x5f0   : > { %3514 = vmatpush1.bf16.msra.mxu1 %v6614_v60  ;;  %v5461_v60 = vld [vmem:[#allocation7 + $0xc] ss:$16 sps:$4 sm:$0xff]  }
 0x5f1   : > { %3515 = vmatprep.subr.bf16.mxu1 %v6617_v61 }
 0x5f2   : > { %5010 = vmatpush3.bf16.msra.mxu0 %v5455_v30 }
 0x5f3   : > { %5011 = vmatprep.subr.bf16.mxu0 %v7180_v1 }
 0x5f4   : > { %3516 = vmatpush1.bf16.msra.mxu1 %v6620_v63 }
 0x5f5   : > { %3517 = vmatprep.subr.bf16.mxu1 %v6623_v0 }
 0x5f6   : > { %5012 = vmatpush3.bf16.msra.mxu0 %v5456_v44 }
 0x5f7   : > { %5013 = vmatprep.subr.bf16.mxu0 %v7180_v1 }
 0x5f8   : > { %3518 = vmatpush1.bf16.msra.mxu1 %v6626_v5 }
 0x5f9   : > { %3519 = vmatprep.subr.bf16.mxu1 %v6629_v6 }
 0x5fa   : > { %5014 = vmatpush3.bf16.msra.mxu0 %v5457_v58 }
 0x5fb   : > { %5015 = vmatprep.subr.bf16.mxu0 %v7180_v1 }
 0x5fc   : > { %3520 = vmatpush1.bf16.msra.mxu1 %v6632_v7 }
 0x5fe   : > { %5016 = vmatpush3.bf16.msra.mxu0 %v5458_v59 }
 0x5ff   : > { %3538 = vmatmul.mubr.bf16.vlgmr.msra.gmra.mrb[28].mxu1 %v6859_v20  ;;  %3548 = vmatprep.subr.bf16.mxu0 %v5461_v60 }
 0x6b2   : > { %v3085_v61 = vpop.f32.mrb[24].mxu0  ;;  %v3128_v63 = vpop.f32.mrb[24].mxu1 }
 0x6b3   : > { %v3137_v0 = vadd.f32 %v3085_v61, %v6369_v42  ;;  %v3087_v5 = vpop.f32.mrb[25].mxu0  ;;  %v3130_v6 = vpop.f32.mrb[25].mxu1  ;;  %v3139_v47 = vadd.f32 %v3128_v63, %v7182_v55 }
 0x6b4   : > { %v3138_v7 = vadd.f32 %v3087_v5, %v7181_v9  ;;  %v3089_v26 = vpop.f32.mrb[26].mxu0  ;;  %v3132_v17 = vpop.f32.mrb[26].mxu1  ;;  %v3140_v23 = vadd.f32 %v3130_v6, %v7183_v28 }
 0x6b5   : > { %v3147_v51 = vmul.f32 0.5, %v3137_v0  ;;  %v3141_v21 = vadd.f32 %v3089_v26, %v6369_v42  ;;  %v3091_v52 = vpop.f32.mrb[27].mxu0  ;;  %v3134_v4 = vpop.f32.mrb[27].mxu1  ;;  %v3143_v8 = vadd.f32 %v3132_v17, %v7182_v55 }
 0x6b6   : > { %v3155_v45 = vmul.f32 0.5, %v3138_v7  ;;  %v3142_v48 = vadd.f32 %v3091_v52, %v7181_v9  ;;  %v3144_v24 = vadd.f32 %v3134_v4, %v7183_v28  ;;  %v3165_v18 = vmul.f32 0.5, %v3140_v23 }
 0x6b7   : > { %5624 = vtanh.f32 %v3147_v51  ;;  %v3148_v19 = vmul.f32 0.5, %v3141_v21 }
 0x6b8   : > { %5626 = vtanh.f32 %v3155_v45  ;;  %v3156_v22 = vmul.f32 0.5, %v3142_v48  ;;  %v3166_v14 = vmul.f32 0.5, %v3144_v24  ;;  %v5464_v24 = vld [vmem:[#allocation7 + $0x2c] ss:$16 sps:$4 sm:$0xff]  }
 0x6b9   : > { %5628 = vtanh.f32 %v3148_v19 }
 0x6ba   : > { %5630 = vtanh.f32 %v3139_v47 }
 0x6bb   : > { %5632 = vtanh.f32 %v3156_v22 }
 0x6bc   : > { %5634 = vtanh.f32 %v3143_v8  ;;  %v5459_v8 = vld [vmem:[#allocation7 + $0x8] ss:$16 sps:$4 sm:$0xff]  }
 0x6bd   : > { %5636 = vtanh.f32 %v3165_v18  ;;  %v5470_v18 = vld [vmem:[#allocation7 + $0x6c] ss:$16 sps:$4 sm:$0xff]  }
 0x6be   : > { %5638 = vtanh.f32 %v3166_v14  ;;  %v5473_v14 = vld [vmem:[#allocation7 + $0x8c] ss:$16 sps:$4 sm:$0xff]  }
 0x6c1   : > { %v5625_v40 = vpop.eup %5624 }
 0x6c2   : > { %v5627_v62 = vpop.eup %5626  ;;  %v3151_v16 = vmul.f32 0.5, %v5625_v40  ;;  %v5462_v40 = vld [vmem:[#allocation7 + $0x28] ss:$16 sps:$4 sm:$0xff]  }
 0x6c3   : > { %v3159_v2 = vmul.f32 0.5, %v5627_v62  ;;  %v5629_v3 = vpop.eup %5628  ;;  %v5467_v62 = vld [vmem:[#allocation7 + $0x4c] ss:$16 sps:$4 sm:$0xff]  }
 0x6c4   : > { %v3153_v12 = vadd.f32 0.5, %v3151_v16  ;;  %v5631_v41 = vpop.eup %5630  ;;  %v3152_v37 = vmul.f32 0.5, %v5629_v3  ;;  %v5465_v16 = vld [vmem:[#allocation7 + $0x48] ss:$16 sps:$4 sm:$0xff]  }
 0x6c5   : > { %v3161_v36 = vadd.f32 0.5, %v3159_v2  ;;  %v5633_v38 = vpop.eup %5632  ;;  %v5468_v2 = vld [vmem:[#allocation7 + $0x68] ss:$16 sps:$4 sm:$0xff]  }
 0x6c6   : > { %v3175_v30 = vmul.f32 %v5631_v41, %v3153_v12  ;;  %v3154_v58 = vadd.f32 0.5, %v3152_v37  ;;  %v3160_v59 = vmul.f32 0.5, %v5633_v38  ;;  %v5635_v60 = vpop.eup %5634  ;;  %v5471_v3 = vld [vmem:[#allocation7 + $0x88] ss:$16 sps:$4 sm:$0xff]   ;;  %v5476_v12 = vld [vmem:[#allocation7 + $0xac] ss:$16 sps:$4 sm:$0xff]  }
 0x6c7   : > { %v3173_v44 = vmul.f32 %v3161_v36, %v6666_v11  ;;  %v5637_v7 = vpop.eup %5636  ;;  %v5474_v41 = vld [vmem:[#allocation7 + $0xa8] ss:$16 sps:$4 sm:$0xff]   ;;  %v5479_v36 = vld [vmem:[#allocation7 + $0xcc] ss:$16 sps:$4 sm:$0xff]   ;;  %v5482_v37 = vld [vmem:[#allocation9 + $0x4] ss:$16 sps:$4 sm:$0xff]  }
 0x6c8   : > { %v3162_v63 = vadd.f32 0.5, %v3160_v59  ;;  %v3176_v0 = vmul.f32 %v5635_v60, %v3154_v58  ;;  %v5639_v26 = vpop.eup %5638  ;;  %v3169_v51 = vmul.f32 0.5, %v5637_v7  ;;  %v5485_v38 = vld [vmem:[#allocation9 + $0xc] ss:$16 sps:$4 sm:$0xff]   ;;  %4026 = vmatprep.subr.bf16.mxu1 %v5482_v37  ;;  %v5488_v58 = vld [vmem:[#allocation9 + $0x24] ss:$16 sps:$4 sm:$0xff]  }
 0x6c9   : > { %v6898_v61 = vadd.f32 %v3175_v30, %v3173_v44  ;;  %v3170_v21 = vmul.f32 0.5, %v5639_v26  ;;  %v5480_v30 = vld [vmem:[#allocation9] ss:$16 sps:$4 sm:$0xff]   ;;  %v5483_v44 = vld [vmem:[#allocation9 + $0x8] ss:$16 sps:$4 sm:$0xff]  }
 0x6ca   : > { %v3174_v5 = vmul.f32 %v3162_v63, %v6670_v15  ;;  %v3171_v15 = vadd.f32 0.5, %v3169_v51  ;;  %4027 = vmatpush1.bf16.msra.mxu1 %v5480_v30  ;;  %v5491_v59 = vld [vmem:[#allocation9 + $0x2c] ss:$16 sps:$4 sm:$0xff]   ;;  %v5486_v60 = vld [vmem:[#allocation9 + $0x20] ss:$16 sps:$4 sm:$0xff]  }
 0x6cb   : > { %5640 = vtanh.f32 %v6898_v61  ;;  %v3172_v48 = vadd.f32 0.5, %v3170_v21  ;;  %v5489_v63 = vld [vmem:[#allocation9 + $0x28] ss:$16 sps:$4 sm:$0xff]   ;;  %4028 = vmatprep.subr.bf16.mxu1 %v5488_v58  ;;  %v5503_v7 = vld [vmem:[#allocation9 + $0x6c] ss:$16 sps:$4 sm:$0xff]  }
 0x6cc   : > { %v6902_v6 = vadd.f32 %v3176_v0, %v3174_v5  ;;  %v5497_v0 = vld [vmem:[#allocation9 + $0x4c] ss:$16 sps:$4 sm:$0xff]   ;;  %v5500_v5 = vld [vmem:[#allocation9 + $0x64] ss:$16 sps:$4 sm:$0xff]   ;;  %v5498_v26 = vld [vmem:[#allocation9 + $0x60] ss:$16 sps:$4 sm:$0xff]  }
 0x6cd   : > { %v5501_v51 = vld [vmem:[#allocation9 + $0x68] ss:$16 sps:$4 sm:$0xff]   ;;  %v5506_v21 = vld [vmem:[#allocation9 + $0x84] ss:$16 sps:$4 sm:$0xff]   ;;  %v6961_v30 = vld [vmem:[%s7063_s5] ss:$0 sm:$0xff] }
 0x6ce   : > { %5642 = vtanh.f32 %v6902_v6  ;;  %4029 = vmatpush1.bf16.msra.mxu1 %v5486_v60 }
 0x6d2   : > { %v6905_v17 = vpop.f32.mrb[28].mxu1 }
 0x6d3   : > { %v6907_v11 = vpop.f32.mrb[29].mxu1 }
 0x6d4   : > { %v6909_v52 = vpop.f32.mrb[30].mxu1 }
 0x6d5   : > { %v6911_v4 = vpop.f32.mrb[31].mxu1  ;;  %v5641_v45 = vpop.eup %5640 }
 0x6d6   : > { %v3181_v19 = vmul.f32 %v5641_v45, %v3171_v15  ;;  %v5509_v45 = vld [vmem:[#allocation9 + $0x8c] ss:$16 sps:$4 sm:$0xff]   ;;  %v5504_v15 = vld [vmem:[#allocation9 + $0x80] ss:$16 sps:$4 sm:$0xff]  }
 0x6d8   : > { %v5643_v47 = vpop.eup %5642 }
 0x6d9   : > { %v3182_v22 = vmul.f32 %v5643_v47, %v3172_v48  ;;  %v5507_v48 = vld [vmem:[#allocation9 + $0x88] ss:$16 sps:$4 sm:$0xff]   ;;  %v5512_v47 = vld [vmem:[#allocation9 + $0xa4] ss:$16 sps:$4 sm:$0xff]  }
 0x6db   : > { %v3183_v23 = vpack.c.bf16 %v3182_v22, %v3181_v19  ;;  %v5515_v19 = vld [vmem:[#allocation9 + $0xac] ss:$16 sps:$4 sm:$0xff]   ;;  %v5510_v22 = vld [vmem:[#allocation9 + $0xa0] ss:$16 sps:$4 sm:$0xff]  }
 0x6dd   : > { %5018 = vmatmul.mubr.bf16.vlgmr.msra.gmra.mrb[28].mxu0 %v3183_v23  ;;  %4058 = vmatprep.mubr.bf16.mxu1 %v3183_v23 }
 0x6de   : > { %3549 = vmatpush1.bf16.msra.mxu0 %v5459_v8  ;;  %3580 = vmatprep.mubr.bf16.mxu0 %v7152_v43  ;;  %v5477_v43 = vld [vmem:[#allocation7 + $0xc8] ss:$16 sps:$4 sm:$0xff]  }
 0x6df   : > { %3550 = vmatprep.subr.bf16.mxu0 %v5464_v24  ;;  %v5513_v8 = vld [vmem:[#allocation9 + $0xa8] ss:$16 sps:$4 sm:$0xff]   ;;  %v7245_v24 = vld [vmem:[#allocation33_spill] sm:$0xff] }
 0x6e2   : > { %3551 = vmatpush1.bf16.msra.mxu0 %v5462_v40  ;;  %v7246_v40 = vld [vmem:[#allocation36_spill] sm:$0xff] }
 0x6e3   : > { %3552 = vmatprep.subr.bf16.mxu0 %v5467_v62  ;;  %v7247_v62 = vld [vmem:[#allocation34_spill] sm:$0xff] }
 0x6e6   : > { %3553 = vmatpush1.bf16.msra.mxu0 %v5465_v16  ;;  %v7248_v16 = vld [vmem:[#allocation38_spill] sm:$0xff] }
 0x6e7   : > { %3554 = vmatprep.subr.bf16.mxu0 %v5470_v18  ;;  %v7249_v18 = vld [vmem:[#allocation37_spill] sm:$0xff] }
 0x6ea   : > { %3555 = vmatpush1.bf16.msra.mxu0 %v5468_v2  ;;  %v7250_v2 = vld [vmem:[#allocation40_spill] sm:$0xff] }
 0x6eb   : > { %3556 = vmatprep.subr.bf16.mxu0 %v5473_v14  ;;  %v7251_v14 = vld [vmem:[#allocation39_spill] sm:$0xff] }
 0x6ee   : > { %3557 = vmatpush1.bf16.msra.mxu0 %v5471_v3  ;;  %v7252_v3 = vld [vmem:[#allocation43_spill] sm:$0xff] }
 0x6ef   : > { %3558 = vmatprep.subr.bf16.mxu0 %v5476_v12  ;;  %v7253_v12 = vld [vmem:[#allocation41_spill] sm:$0xff] }
 0x6f2   : > { %3559 = vmatpush1.bf16.msra.mxu0 %v5474_v41  ;;  %v7254_v41 = vld [vmem:[#allocation44_spill] sm:$0xff] }
 0x6f3   : > { %3560 = vmatprep.subr.bf16.mxu0 %v5479_v36  ;;  %v7255_v36 = vld [vmem:[#allocation42_spill] sm:$0xff] }
 0x6f6   : > { %3561 = vmatpush1.bf16.msra.mxu0 %v5477_v43 }
 0x6f7   : > { %3562 = vmatprep.subr.bf16.mxu0 %v6694_v46  ;;  %v5494_v46 = vld [vmem:[#allocation9 + $0x44] ss:$16 sps:$4 sm:$0xff]  }
 0x6f8   : > { %4030 = vmatprep.subr.bf16.mxu1 %v5494_v46  ;;  %v4768_v46 = vld [vmem:[%s6169_s20 + $0xc0] sm:$0xff] }
 0x6fa   : > { %3563 = vmatpush1.bf16.msra.mxu0 %v6697_v10  ;;  %v5492_v10 = vld [vmem:[#allocation9 + $0x40] ss:$16 sps:$4 sm:$0xff]  }
 0x6fb   : > { %4069 = vmatprep.subr.bf16.mxu0 %v5485_v38  ;;  %4031 = vmatpush1.bf16.msra.mxu1 %v5492_v10 }
 0x6fc   : > { %4032 = vmatprep.subr.bf16.mxu1 %v5500_v5  ;;  %v4772_v5 = vld [vmem:[%s6169_s20 + $0xe0] sm:$0xff] }
 0x6fd   : > { %3581 = vmatmul.mubr.bf16.vlgmr.msra.gmra.mrb[32].mxu0 %v6859_v20  ;;  %v5495_v20 = vld [vmem:[#allocation9 + $0x48] ss:$16 sps:$4 sm:$0xff]  }
 0x6fe   : > { %4101 = vmatprep.mubr.bf16.mxu0 %v3183_v23  ;;  %4070 = vmatpush1.bf16.msra.mxu0 %v5483_v44  ;;  %v7244_v23 = vld [vmem:[#allocation35_spill] sm:$0xff] }
 0x6ff   : > { %4071 = vmatprep.subr.bf16.mxu0 %v5491_v59  ;;  %4033 = vmatpush1.bf16.msra.mxu1 %v5498_v26 }
 0x700   : > { %4034 = vmatprep.subr.bf16.mxu1 %v5506_v21 }
 0x702   : > { %4072 = vmatpush1.bf16.msra.mxu0 %v5489_v63  ;;  %v4769_v63 = vld [vmem:[%s6169_s20 + $0xc8] sm:$0xff] }
 0x703   : > { %4073 = vmatprep.subr.bf16.mxu0 %v5497_v0  ;;  %4035 = vmatpush1.bf16.msra.mxu1 %v5504_v15  ;;  %v4773_v0 = vld [vmem:[%s6169_s20 + $0xe8] sm:$0xff]  ;;  %v3592_v10 = vadd.f32 %v4769_v63, %v6907_v11 }
 0x704   : > { %4036 = vmatprep.subr.bf16.mxu1 %v5512_v47  ;;  %v4771_v47 = vld [vmem:[%s6169_s20 + $0xd8] sm:$0xff] }
 0x705   : > { %v3609_v26 = vmul.f32 0.5, %v3592_v10  ;;  %v5518_v10 = vld [vmem:[#allocation10 + $0x10] sm:$0xff]  }
 0x706   : > { %4074 = vmatpush1.bf16.msra.mxu0 %v5495_v20  ;;  %v3591_v20 = vadd.f32 %v4768_v46, %v6905_v17 }
 0x707   : > { %4075 = vmatprep.subr.bf16.mxu0 %v5503_v7  ;;  %4037 = vmatpush1.bf16.msra.mxu1 %v5510_v22  ;;  %v3596_v7 = vadd.f32 %v4773_v0, %v6911_v4  ;;  %5644 = vtanh.f32 %v3609_v26  ;;  %v5517_v0 = vld [vmem:[#allocation10 + $0x8] sm:$0xff]   ;;  %v5522_v26 = vld [vmem:[#allocation10 + $0x30] sm:$0xff]  }
 0x708   : > { %4038 = vmatprep.subr.bf16.mxu1 %v6720_v32  ;;  %v7233_v32 = vld [vmem:[#allocation20_spill] sm:$0xff]  ;;  %v3601_v21 = vmul.f32 0.5, %v3591_v20  ;;  %v5519_v20 = vld [vmem:[#allocation10 + $0x18] sm:$0xff]  }
 0x70a   : > { %4076 = vmatpush1.bf16.msra.mxu0 %v5501_v51  ;;  %v3595_v51 = vadd.f32 %v4772_v5, %v6909_v52  ;;  %5646 = vtanh.f32 %v3601_v21  ;;  %v5520_v5 = vld [vmem:[#allocation10 + $0x20] sm:$0xff]  }
 0x70b   : > { %4077 = vmatprep.subr.bf16.mxu0 %v5509_v45  ;;  %4039 = vmatpush1.bf16.msra.mxu1 %v6718_v29  ;;  %v7232_v29 = vld [vmem:[#allocation23_spill] sm:$0xff]  ;;  %v3610_v45 = vmul.f32 0.5, %v3596_v7  ;;  %v5521_v7 = vld [vmem:[#allocation10 + $0x28] sm:$0xff]  }
 0x70c   : > { %4040 = vmatprep.subr.bf16.mxu1 %v6725_v34  ;;  %v7235_v34 = vld [vmem:[#allocation22_spill] sm:$0xff]  ;;  %v3602_v15 = vmul.f32 0.5, %v3595_v51 }
 0x70d   : > { %5648 = vtanh.f32 %v3610_v45  ;;  %v5523_v51 = vld [vmem:[#allocation10 + $0x38] sm:$0xff]  }
 0x70e   : > { %4078 = vmatpush1.bf16.msra.mxu0 %v5507_v48  ;;  %5650 = vtanh.f32 %v3602_v15  ;;  %v4770_v48 = vld [vmem:[%s6169_s20 + $0xd0] sm:$0xff] }
 0x70f   : > { %4079 = vmatprep.subr.bf16.mxu0 %v5515_v19  ;;  %4041 = vmatpush1.bf16.msra.mxu1 %v6733_v31  ;;  %v7237_v31 = vld [vmem:[#allocation25_spill] sm:$0xff] }
 0x710   : > { %4042 = vmatprep.subr.bf16.mxu1 %v6742_v27  ;;  %v7240_v27 = vld [vmem:[#allocation31_spill] sm:$0xff]  ;;  %v4774_v19 = vld [vmem:[%s6169_s20 + $0xf0] sm:$0xff] }
 0x712   : > { %4080 = vmatpush1.bf16.msra.mxu0 %v5513_v8  ;;  %v4775_v8 = vld [vmem:[%s6169_s20 + $0xf8] sm:$0xff]  ;;  %s5918_s20 = smov [#allocation12]  }
 0x713   : > { %4081 = vmatprep.subr.bf16.mxu0 %v6716_v56  ;;  %4043 = vmatpush1.bf16.msra.mxu1 %v6745_v54  ;;  %v7231_v56 = vld [vmem:[#allocation19_spill] sm:$0xff]  ;;  %v7241_v54 = vld [vmem:[#allocation29_spill] sm:$0xff]  ;;  %s5815_s9 = sshll.u32 %s5918_s20, 4  ;;  %s5816_s9 = int_to_ptr.vmem [resolvable:$false] %s5815_s9 }
 0x714   : > { %4044 = vmatprep.subr.bf16.mxu1 %v6754_v53  ;;  %v7243_v53 = vld [vmem:[#allocation30_spill] sm:$0xff]  ;;  %s5817_s29 = scalar_lea.vmem %s5816_s9, 1024  ;;  %p5818_p7 = scmp.lt.s32.totalorder %s7008_s13, %s5816_s9 }
 0x715   : > { %p5819_p9 = scmp.lt.s32.totalorder %s5817_s29, %s5811_s16 }
 0x716   : > { %4082 = vmatpush1.bf16.msra.mxu0 %v6714_v35  ;;  %v7230_v35 = vld [vmem:[#allocation21_spill] sm:$0xff] }
 0x717   : > { %4083 = vmatprep.subr.bf16.mxu0 %v6722_v33  ;;  %4045 = vmatpush1.bf16.msra.mxu1 %v7230_v35  ;;  %v7234_v33 = vld [vmem:[#allocation24_spill] sm:$0xff]  ;;  %p5820_p0 = por %p5819_p9, %p5818_p7 }
 0x718   : > { %4046 = vmatprep.subr.bf16.mxu1 %v7232_v29 }
 0x719   : > { %p5821_p4 = pnand %p5820_p0, %p5814_p5 }
 0x71a   : > { %4084 = vmatpush1.bf16.msra.mxu0 %v6729_v49  ;;  %v7236_v49 = vld [vmem:[#allocation27_spill] sm:$0xff] }
 0x71b   : > { %4085 = vmatprep.subr.bf16.mxu0 %v6738_v50  ;;  %4047 = vmatpush1.bf16.msra.mxu1 %v7234_v33  ;;  %v7238_v50 = vld [vmem:[#allocation28_spill] sm:$0xff] }
 0x71c   : > { %4048 = vmatprep.subr.bf16.mxu1 %v7236_v49 }
 0x71e   : > { %4086 = vmatpush1.bf16.msra.mxu0 %v6740_v57  ;;  %v7239_v57 = vld [vmem:[#allocation26_spill] sm:$0xff] }
 0x71f   : > { %4087 = vmatprep.subr.bf16.mxu0 %v6750_v39  ;;  %4049 = vmatpush1.bf16.msra.mxu1 %v7238_v50  ;;  %v7242_v39 = vld [vmem:[#allocation32_spill] sm:$0xff] }
 0x720   : > { %4050 = vmatprep.subr.bf16.mxu1 %v7240_v27 }
 0x722   : > { %4088 = vmatpush1.bf16.msra.mxu0 %v7231_v56  ;;  %v5645_v56 = vpop.eup %5644 }
 0x723   : > { %4089 = vmatprep.subr.bf16.mxu0 %v7233_v32  ;;  %4051 = vmatpush1.bf16.msra.mxu1 %v7242_v39  ;;  %v5647_v32 = vpop.eup %5646  ;;  %v3613_v49 = vmul.f32 0.5, %v5645_v56 }
 0x724   : > { %4052 = vmatprep.subr.bf16.mxu1 %v7244_v23 }
 0x725   : > { %v3615_v39 = vadd.f32 0.5, %v3613_v49 }
 0x726   : > { %4090 = vmatpush1.bf16.msra.mxu0 %v7235_v34  ;;  %v5649_v34 = vpop.eup %5648 }
 0x727   : > { %4091 = vmatprep.subr.bf16.mxu0 %v7237_v31  ;;  %4053 = vmatpush1.bf16.msra.mxu1 %v7246_v40  ;;  %v5651_v50 = vpop.eup %5650  ;;  %v3614_v27 = vmul.f32 0.5, %v5649_v34 }
 0x728   : > { %4054 = vmatprep.subr.bf16.mxu1 %v7248_v16 }
 0x72a   : > { %4092 = vmatpush1.bf16.msra.mxu0 %v7239_v57  ;;  %v3605_v57 = vmul.f32 0.5, %v5647_v32 }
 0x72b   : > { %4093 = vmatprep.subr.bf16.mxu0 %v7241_v54  ;;  %4055 = vmatpush1.bf16.msra.mxu1 %v7250_v2 }
 0x72c   : > { %4056 = vmatprep.subr.bf16.mxu1 %v7252_v3  ;;  %v3607_v23 = vadd.f32 0.5, %v3605_v57 }
 0x72e   : > { %4094 = vmatpush1.bf16.msra.mxu0 %v7243_v53  ;;  %v3606_v53 = vmul.f32 0.5, %v5651_v50 }
 0x72f   : > { %4095 = vmatprep.subr.bf16.mxu0 %v7245_v24  ;;  %4057 = vmatpush1.bf16.msra.mxu1 %v7254_v41  ;;  %v3616_v24 = vadd.f32 0.5, %v3614_v27 }
 0x730   : > { %5021 = vmatprep.subr.bf16.mxu1 %v7180_v1  ;;  %v3608_v16 = vadd.f32 0.5, %v3606_v53 }
 0x732   : > { %4096 = vmatpush1.bf16.msra.mxu0 %v7247_v62  ;;  %v3627_v62 = vmul.f32 %v3615_v39, %v6853_v25 }
 0x733   : > { %4097 = vmatprep.subr.bf16.mxu0 %v7249_v18 }
 0x736   : > { %4098 = vmatpush1.bf16.msra.mxu0 %v7251_v14  ;;  %v3628_v14 = vmul.f32 %v3616_v24, %v6856_v13  ;;  %v5516_v13 = vld [vmem:[#allocation10] sm:$0xff]  }
 0x737   : > { %4099 = vmatprep.subr.bf16.mxu0 %v7253_v12 }
 0x73a   : > { %4100 = vmatpush1.bf16.msra.mxu0 %v7255_v36 }
 0x7b0   : > { %v3285_v43 = vpop.f32.mrb[28].mxu0 }
 0x7b1   : > { %v5019_v37 = vpop.f32.mrb[29].mxu0  ;;  %v3286_v44 = vadd.f32 %v6961_v30, %v3285_v43 }
 0x7b2   : > { %v3288_v38 = vpop.f32.mrb[30].mxu0 }
 0x7b3   : > { %v3289_v58 = vadd.f32 %v6961_v30, %v3288_v38  ;;  %v5020_v59 = vpop.f32.mrb[31].mxu0 }
 0x7b5   : > { %v4915_v60 = vpack.c.bf16 %v3289_v58, %v3286_v44 }
 0x7b7   : > { %4923 = vst [vmem:[%s6184_s30 + $0x10] sm:$0xff] %v4915_v60  }
 0x7d0   : > { %v3582_v11 = vpop.f32.mrb[32].mxu0 }
 0x7d1   : > { %v3593_v22 = vadd.f32 %v4770_v48, %v3582_v11  ;;  %v3584_v17 = vpop.f32.mrb[33].mxu0 }
 0x7d2   : > { %v3594_v35 = vadd.f32 %v4771_v47, %v3584_v17  ;;  %v3586_v4 = vpop.f32.mrb[34].mxu0 }
 0x7d3   : > { %5652 = vtanh.f32 %v3593_v22  ;;  %v3597_v29 = vadd.f32 %v4774_v19, %v3586_v4  ;;  %v3588_v52 = vpop.f32.mrb[35].mxu0 }
 0x7d4   : > { %v3598_v33 = vadd.f32 %v4775_v8, %v3588_v52  ;;  %v3619_v31 = vmul.f32 0.5, %v3594_v35 }
 0x7d5   : > { %5654 = vtanh.f32 %v3597_v29 }
 0x7d6   : > { %v3620_v54 = vmul.f32 0.5, %v3598_v33  ;;  %5656 = vtanh.f32 %v3619_v31 }
 0x7d8   : > { %5658 = vtanh.f32 %v3620_v54 }
 0x7dd   : > { %v5653_v40 = vpop.eup %5652 }
 0x7de   : > { %v3629_v18 = vmul.f32 %v5653_v40, %v3607_v23 }
 0x7df   : > { %v5655_v2 = vpop.eup %5654 }
 0x7e0   : > { %v3631_v3 = vadd.f32 %v3629_v18, %v3627_v62  ;;  %v3630_v12 = vmul.f32 %v5655_v2, %v3608_v16  ;;  %v5657_v36 = vpop.eup %5656 }
 0x7e1   : > { %v3623_v37 = vmul.f32 0.5, %v5657_v36 }
 0x7e2   : > { %5660 = vtanh.f32 %v3631_v3  ;;  %3639 = vst [vmem:[#allocation3] sm:$0xff] %v3631_v3  ;;  %v3632_v41 = vadd.f32 %v3630_v12, %v3628_v14  ;;  %v5659_v43 = vpop.eup %5658 }
 0x7e3   : > { %v3624_v38 = vmul.f32 0.5, %v5659_v43  ;;  %v3625_v44 = vadd.f32 0.5, %v3623_v37 }
 0x7e4   : > { %5662 = vtanh.f32 %v3632_v41  ;;  %3640 = vst [vmem:[#allocation3 + $0x8] sm:$0xff] %v3632_v41 }
 0x7e5   : > { %v3626_v25 = vadd.f32 0.5, %v3624_v38 }
 0x7ec   : > { %v5661_v58 = vpop.eup %5660 }
 0x7ed   : > { %v3635_v59 = vmul.f32 %v5661_v58, %v3625_v44 }
 0x7ee   : > { %v5663_v60 = vpop.eup %5662 }
 0x7ef   : > { %v3636_v63 = vmul.f32 %v5663_v60, %v3626_v25 }
 0x7f1   : > { %v3637_v46 = vpack.c.bf16 %v3636_v63, %v3635_v59 }
 0x7f3   : > { %3638 = vst [vmem:[#allocation2] sm:$0xff] %v3637_v46  ;;  %4059 = vmatmul.mubr.bf16.vlgmr.msra.gmra.mrb[32].mxu1 %v3637_v46  ;;  %4102 = vmatmul.mubr.bf16.vlgmr.msra.gmra.mrb[36].mxu0 %v3637_v46 }
 0x7f4   : > { %5037 = vmatprep.mubr.msk.bf16.mxu1 %vm5917_vm0, %v7180_v1  ;;  %5022 = vmatpush3.bf16.msra.mxu1 %v5516_v13 }
 0x7f5   : > { %5023 = vmatprep.subr.bf16.mxu1 %v7180_v1 }
 0x7f8   : > { %5024 = vmatpush3.bf16.msra.mxu1 %v5517_v0 }
 0x7f9   : > { %5025 = vmatprep.subr.bf16.mxu1 %v7180_v1 }
 0x7fc   : > { %5026 = vmatpush3.bf16.msra.mxu1 %v5518_v10 }
 0x7fd   : > { %5027 = vmatprep.subr.bf16.mxu1 %v7180_v1 }
 0x800   : > { %5028 = vmatpush3.bf16.msra.mxu1 %v5519_v20 }
 0x801   : > { %5029 = vmatprep.subr.bf16.mxu1 %v7180_v1 }
 0x804   : > { %5030 = vmatpush3.bf16.msra.mxu1 %v5520_v5 }
 0x805   : > { %5031 = vmatprep.subr.bf16.mxu1 %v7180_v1 }
 0x808   : > { %5032 = vmatpush3.bf16.msra.mxu1 %v5521_v7 }
 0x809   : > { %5033 = vmatprep.subr.bf16.mxu1 %v7180_v1 }
 0x80c   : > { %5034 = vmatpush3.bf16.msra.mxu1 %v5522_v26 }
 0x80d   : > { %5035 = vmatprep.subr.bf16.mxu1 %v7180_v1 }
 0x810   : > { %5036 = vmatpush3.bf16.msra.mxu1 %v5523_v51 }
 0x8c6   : > { %v4060_v21 = vpop.f32.mrb[32].mxu1  ;;  %v4103_v45 = vpop.f32.mrb[36].mxu0 }
 0x8c7   : > { %v4112_v15 = vadd.f32 %v4060_v21, %v6369_v42  ;;  %v4062_v48 = vpop.f32.mrb[33].mxu1  ;;  %v4105_v47 = vpop.f32.mrb[37].mxu0  ;;  %v4114_v29 = vadd.f32 %v4103_v45, %v7182_v55 }
 0x8c8   : > { %v4113_v11 = vadd.f32 %v4062_v48, %v7181_v9  ;;  %v4064_v19 = vpop.f32.mrb[34].mxu1  ;;  %v4107_v22 = vpop.f32.mrb[38].mxu0  ;;  %v4115_v34 = vadd.f32 %v4105_v47, %v7183_v28 }
 0x8c9   : > { %v4122_v17 = vmul.f32 0.5, %v4112_v15  ;;  %v4116_v8 = vadd.f32 %v4064_v19, %v6369_v42  ;;  %v4066_v35 = vpop.f32.mrb[35].mxu1  ;;  %v4109_v4 = vpop.f32.mrb[39].mxu0  ;;  %v4118_v33 = vadd.f32 %v4107_v22, %v7182_v55 }
 0x8ca   : > { %v4130_v56 = vmul.f32 0.5, %v4113_v11  ;;  %v4117_v1 = vadd.f32 %v4066_v35, %v7181_v9  ;;  %v4140_v42 = vmul.f32 0.5, %v4115_v34  ;;  %v4119_v49 = vadd.f32 %v4109_v4, %v7183_v28 }
 0x8cb   : > { %5664 = vtanh.f32 %v4122_v17  ;;  %v4123_v52 = vmul.f32 0.5, %v4116_v8 }
 0x8cc   : > { %5666 = vtanh.f32 %v4130_v56  ;;  %v4131_v32 = vmul.f32 0.5, %v4117_v1  ;;  %v4141_v27 = vmul.f32 0.5, %v4119_v49 }
 0x8cd   : > { %5668 = vtanh.f32 %v4123_v52 }
 0x8ce   : > { %5670 = vtanh.f32 %v4114_v29 }
 0x8cf   : > { %5672 = vtanh.f32 %v4131_v32 }
 0x8d0   : > { %5674 = vtanh.f32 %v4118_v33 }
 0x8d1   : > { %5676 = vtanh.f32 %v4140_v42 }
 0x8d2   : > { %5678 = vtanh.f32 %v4141_v27 }
 0x8d5   : > { %v5665_v31 = vpop.eup %5664 }
 0x8d6   : > { %v5667_v50 = vpop.eup %5666  ;;  %v4126_v9 = vmul.f32 0.5, %v5665_v31 }
 0x8d7   : > { %v4134_v57 = vmul.f32 0.5, %v5667_v50  ;;  %v5669_v54 = vpop.eup %5668 }
 0x8d8   : > { %v4128_v39 = vadd.f32 0.5, %v4126_v9  ;;  %v5671_v53 = vpop.eup %5670  ;;  %v4127_v24 = vmul.f32 0.5, %v5669_v54 }
 0x8d9   : > { %v4136_v23 = vadd.f32 0.5, %v4134_v57  ;;  %v5673_v55 = vpop.eup %5672 }
 0x8da   : > { %v4150_v40 = vmul.f32 %v5671_v53, %v4128_v39  ;;  %v4129_v16 = vadd.f32 0.5, %v4127_v24  ;;  %v4135_v18 = vmul.f32 0.5, %v5673_v55  ;;  %v5675_v2 = vpop.eup %5674 }
 0x8db   : > { %v4148_v62 = vmul.f32 %v4136_v23, %v6898_v61  ;;  %v5677_v41 = vpop.eup %5676 }
 0x8dc   : > { %v4137_v14 = vadd.f32 0.5, %v4135_v18  ;;  %v4151_v3 = vmul.f32 %v5675_v2, %v4129_v16  ;;  %v4144_v43 = vmul.f32 0.5, %v5677_v41  ;;  %v5679_v37 = vpop.eup %5678 }
 0x8dd   : > { %v4152_v28 = vadd.f32 %v4150_v40, %v4148_v62  ;;  %v4145_v38 = vmul.f32 0.5, %v5679_v37 }
 0x8de   : > { %v4149_v12 = vmul.f32 %v4137_v14, %v6902_v6  ;;  %v4146_v61 = vadd.f32 0.5, %v4144_v43 }
 0x8df   : > { %5680 = vtanh.f32 %v4152_v28  ;;  %4160 = vst [vmem:[#allocation3 + $0x10] sm:$0xff] %v4152_v28  ;;  %v4147_v59 = vadd.f32 0.5, %v4145_v38 }
 0x8e0   : > { %v4153_v36 = vadd.f32 %v4151_v3, %v4149_v12 }
 0x8e2   : > { %5682 = vtanh.f32 %v4153_v36  ;;  %4161 = vst [vmem:[#allocation3 + $0x18] sm:$0xff] %v4153_v36 }
 0x8e9   : > { %v5681_v44 = vpop.eup %5680 }
 0x8ea   : > { %v4156_v58 = vmul.f32 %v5681_v44, %v4146_v61 }
 0x8ec   : > { %v5683_v25 = vpop.eup %5682 }
 0x8ed   : > { %v4157_v60 = vmul.f32 %v5683_v25, %v4147_v59 }
 0x8ef   : > { %v4158_v63 = vpack.c.bf16 %v4157_v60, %v4156_v58 }
 0x8f1   : > { %4159 = vst [vmem:[#allocation2 + $0x8] sm:$0xff] %v4158_v63  ;;  %5038 = vmatmul.mubr.bf16.vlgmr.msra.gmra.mrb[36].mxu1 %v4158_v63 }
 0x9c4   : > { %v4260_v6 = vpop.f32.mrb[36].mxu1 }
 0x9c5   : > { %v5039_v46 = vpop.f32.mrb[37].mxu1  ;;  %v4261_v0 = vadd.f32 %v6961_v30, %v4260_v6 }
 0x9c6   : > { %v4263_v13 = vpop.f32.mrb[38].mxu1 }
 0x9c7   : > { %v4264_v10 = vadd.f32 %v6961_v30, %v4263_v13  ;;  %v5040_v20 = vpop.f32.mrb[39].mxu1 }
 0x9c9   : > { %v4920_v5 = vpack.c.bf16 %v4264_v10, %v4261_v0 }
 0x9cb   : > { %4924 = vst [vmem:[%s6184_s30 + $0x18] sm:$0xff] %v4920_v5  }
 0x9cc   : > { %5824 = shalt.err (!%p5821_p4)
}
 0x9cd   : > { %s5825_s30 = scalar_lea.hbm %s7006_s19, 512  ;;  %s5829_s14 = scalar_lea.hbm %s7256_s18, 1024 }
 0x9ce   : > { %p5826_p2 = scmp.ne.s32.totalorder %s7006_s19, %s5825_s30  ;;  %p5830_p1 = scmp.lt.u32.totalorder %s7006_s19, %s7256_s18 }
 0x9cf   : > { %p5831_p11 = scmp.lt.u32.totalorder %s5829_s14, %s5825_s30  ;;  %p5833_p6 = scmp.lt.u32.totalorder %s5825_s30, %s7006_s19 }
 0x9d0   : > { %p5827_p8 = pnand %p5826_p2, %p6107_p10 }
 0x9d1   : > { %p5832_p13 = por %p5831_p11, %p5830_p1 }
 0x9d2   : > { %p5828_p12 = pneg %p5827_p8 }
 0x9d3   : > { %p5834_p3 = por %p5833_p6, %p5832_p13 }
 0x9d5   : > { %p5835_p5 = pnand %p5834_p3, %p5828_p12 }
 0x9d7   : > { %5838 = shalt.err (!%p5835_p5)
}
 0x9d8   : > { %s5919_s10 = smov 64   ;;  %s5920_s15 = smov 4  }
 0x9d9   : > { %5055 = dma.vmem_to_hbm [thread:$0]  (%p6107_p10), %s7008_s13, 512, %s7006_s19, %s4279_s24, %s5919_s10, %s5919_s10, %s5920_s15  }
 0x9da PF: > { %s7257_s17 = sld [smem:[#allocation17_spill]]  ;;  %s7258_s16 = sld [smem:[#allocation18_spill]] }
 0x9db   : > { %p7260_p9 = scmp.ge.s32.totalorder %s5901_s26, 2 }
 0x9e0   : > { %s4310_s20 = sand.u32 1, %s7257_s17   ;;  %p7259_p7 = scmp.ne.s32.totalorder %s7258_s16, 0 }
 0x9e1   : > { %s4311_s9 = scalar_lea.sflag [#allocation6], %s4310_s20 }
 0x9e2   : > { %p5072_p0 = pnand %p7260_p9, %p7259_p7 }
 0x9e4   : > { %5876 = dma.done.wait (!%p5072_p0), %s4311_s9, 512  }
 0x9e5   : > { %5878 = vsyncadd (!%p5072_p0), %s4311_s9, 4294966784  ;;  %s24_s26 = sadd.s32 1, %s5901_s26   ;;  %s7261_s8 = smov %s7268_s21 }
 0x9e6   : > { %p21_p4 = scmp.ge.s32.totalorder %s24_s26, 4   ;;  %s7262_s21 = smov %s5885_s22 }
 0x9e7   : > { %s7263_s22 = smov %s5889_s23  ;;  %s7264_s23 = smov %s6119_s27 }
 0x9e8   : > { %s7265_s24 = smov %s5897_s25  ;;  %s7266_s25 = smov %s7261_s8 }
 0x9e9   :  { %23 = sbr.rel (!%p21_p4) target bundleno = 10 (0xa), region = 113 }
 0x9f0   :  { %4316 = vsyncpa [#allocation5], 1 }
 0x9f1   :  { %4318 = vsyncpa [#allocation5 + $0x1], 1 }
 0x9f2   :  { %4319 = vsyncpa [#allocation8], 1 }
 0x9f3   :  { %4320 = vsyncpa [#allocation11], 1 }
 0x9f4   :  { %4321 = vsyncpa [#allocation6], 1 }
 0x9f5   :  { %4323 = vsyncpa [#allocation6 + $0x1], 1 }

</bundles_post_ra>
